<compile_context>
chip_gen: v6e
topology: v6e:2x2x1
jax: 0.10.0
libtpu: 0.0.40
codegen_flags: <defaults>
</compile_context>

<pallas_src>
import functools

import jax
import jax.numpy as jnp
from jax import lax
from jax.experimental import pallas as pl
from jax.experimental.pallas import tpu as pltpu

EPS = 1e-5
NUM_GROUPS = 8

_TAPS = [(dy, dx) for dy in range(3) for dx in range(3)]  # matches HWIO flattening


def head_gn_kernel(slab1_ref, w1_ref, gm_ref, g1_ref, b1_ref, w2_ref, g2_ref,
                   b2_ref, o_ref, slab2_ref, *, H, W, CL, cg, eps):
    # slab1_ref: (HW, K1P)      bf16  pre-packed conv1 im2col slab (lane-dense)
    # w1_ref:    (K1P, CL)      bf16  folded, zero-padded conv1 weights
    # gm_ref:    (CL, CL)       f32   group incidence matrix (precomputed)
    # g*/b*:     (1, CL)        f32   GroupNorm affine params (tiled across fold)
    # w2_ref:    (9*CL, CL)     bf16  folded block-diagonal conv2 weights
    # o_ref:     (HW, CL)       f32   output block (128-lane dense)
    # slab2_ref: (H, W, 9*CL)   bf16  conv2 im2col scratch
    HW = H * W
    inv_count = 1.0 / float(HW * cg)

    # ---------------- Conv1: single MXU matmul on the pre-packed slab ----------------
    a1 = jnp.dot(slab1_ref[...], w1_ref[...],
                 preferred_element_type=jnp.float32)                # (HW, CL) f32

    def gn_scale_shift(a, gamma, beta):
        # One-pass GroupNorm stats; group reduce + broadcast back with ONE stacked
        # [sum; sum_sq] matmul against the (CL, CL) group mask.
        s1 = jnp.sum(a, axis=0, keepdims=True)                      # (1, CL)
        s2 = jnp.sum(a * a, axis=0, keepdims=True)                  # (1, CL)
        # Stack [s1; s2] without a sublane concatenate (broadcast+select lowers
        # robustly and costs < 1 vreg of work).
        row = lax.broadcasted_iota(jnp.int32, (2, CL), 0)
        stats = jnp.where(row == 0,
                          jnp.broadcast_to(s1, (2, CL)),
                          jnp.broadcast_to(s2, (2, CL)))
        g = jnp.dot(stats, gm_ref[...], preferred_element_type=jnp.float32)
        mean = g[0:1, :] * inv_count
        var = g[1:2, :] * inv_count - mean * mean
        scale = gamma * lax.rsqrt(var + eps)
        shift = beta - mean * scale
        return scale, shift

    # ---------------- GroupNorm1 (affine fused into the scatter source) --------------
    sc1, sh1 = gn_scale_shift(a1, g1_ref[...], b1_ref[...])
    y1 = (a1 * sc1 + sh1).astype(jnp.bfloat16)                      # (HW, CL)
    y1_img = y1.reshape(H, W, CL)

    # ------- Conv2 im2col: scatter shifted y1 straight into slab2 (no h1pad) ---------
    # Every store below is CL = fold*C lanes wide (128 for C=64, fold=2) => unmasked.
    zrow = jnp.zeros((1, W, CL), jnp.bfloat16)
    zcol = jnp.zeros((H, 1, CL), jnp.bfloat16)
    for t, (dy, dx) in enumerate(_TAPS):
        c0 = t * CL
        # Only the 1-px border of this tap's column block needs zeros; it is zeroed
        # every step because with a "parallel" grid axis the scratch may be per-core.
        if dy == 0:
            slab2_ref[0:1, :, c0:c0 + CL] = zrow
        if dy == 2:
            slab2_ref[H - 1:H, :, c0:c0 + CL] = zrow
        if dx == 0:
            slab2_ref[:, 0:1, c0:c0 + CL] = zcol
        if dx == 2:
            slab2_ref[:, W - 1:W, c0:c0 + CL] = zcol
        oy0, oy1 = max(0, 1 - dy), H - max(0, dy - 1)
        ox0, ox1 = max(0, 1 - dx), W - max(0, dx - 1)
        iy0, ix0 = max(0, dy - 1), max(0, dx - 1)
        slab2_ref[oy0:oy1, ox0:ox1, c0:c0 + CL] = (
            y1_img[iy0:iy0 + (oy1 - oy0), ix0:ix0 + (ox1 - ox0), :])

    # ---------------- Conv2: single MXU matmul on the flattened slab -----------------
    a2 = jnp.dot(slab2_ref[...].reshape(HW, 9 * CL), w2_ref[...],
                 preferred_element_type=jnp.float32)                # (HW, CL) f32

    # -------- GroupNorm2, affine fused into the 128-lane-dense output store ----------
    sc2, sh2 = gn_scale_shift(a2, g2_ref[...], b2_ref[...])
    o_ref[...] = a2 * sc2 + sh2


def head_gn_pallas(x_nhwc, w1, g1, b1, w2, g2, b2, *, fold=None):
    """x_nhwc: (N, H, W, Cin) f32.  w1: (3,3,Cin,C), w2: (3,3,C,C) HWIO, no bias.
    g*/b*: (1, C) GroupNorm affine.  Returns (N, H, W, C) f32."""
    N, H, W, Cin = x_nhwc.shape
    C = w1.shape[-1]
    assert w1.shape == (3, 3, Cin, C) and w2.shape == (3, 3, C, C)
    assert C % NUM_GROUPS == 0

    # Fold `fold` samples into the lane dim so the working lane width is >= 128.
    if fold is None:
        fold = max(1, 128 // C)
        while fold > 1 and N % fold != 0:
            fold -= 1
    assert N % fold == 0
    CL = fold * C
    HW = H * W
    K1 = 9 * Cin
    K1P = -(-(fold * K1) // 128) * 128          # conv1 K padded to a lane multiple

    # ---- layout plumbing only (gathers / pads / casts, no activation arithmetic) ----
    # Pre-packed, lane-dense conv1 im2col slab with `fold` samples folded into lanes.
    xp = jnp.pad(x_nhwc, ((0, 0), (1, 1), (1, 1), (0, 0)))
    cols = [xp[:, dy:dy + H, dx:dx + W, :] for dy, dx in _TAPS]
    slab1 = jnp.concatenate(cols, axis=-1).reshape(N // fold, fold, HW, K1)
    slab1 = jnp.transpose(slab1, (0, 2, 1, 3)).reshape(N // fold, HW, fold * K1)
    slab1 = jnp.pad(slab1, ((0, 0), (0, 0), (0, K1P - fold * K1)))
    slab1 = slab1.astype(jnp.bfloat16)

    # Folded (block-diagonal per fold-half), zero-padded bf16 MXU weights.
    eye_f = jnp.eye(fold, dtype=jnp.float32)
    w1f = jnp.kron(eye_f, w1.reshape(K1, C))                        # (fold*K1, CL)
    w1f = jnp.pad(w1f, ((0, K1P - fold * K1), (0, 0))).astype(jnp.bfloat16)
    w2_taps = w2.reshape(9, C, C)
    w2f = jnp.concatenate([jnp.kron(eye_f, w2_taps[t]) for t in range(9)],
                          axis=0).astype(jnp.bfloat16)              # (9*CL, CL)

    # GroupNorm affine params tiled across fold halves; precomputed group mask.
    g1f, b1f = jnp.tile(g1, (1, fold)), jnp.tile(b1, (1, fold))
    g2f, b2f = jnp.tile(g2, (1, fold)), jnp.tile(b2, (1, fold))
    cg = C // NUM_GROUPS
    gid = jnp.arange(CL) // cg                  # disjoint group ids per fold half
    gmask = (gid[:, None] == gid[None, :]).astype(jnp.float32)      # (CL, CL)

    kernel = functools.partial(head_gn_kernel, H=H, W=W, CL=CL, cg=cg, eps=EPS)

    out = pl.pallas_call(
        kernel,
        out_shape=jax.ShapeDtypeStruct((N // fold, HW, CL), jnp.float32),
        grid_spec=pltpu.PrefetchScalarGridSpec(
            num_scalar_prefetch=0,
            grid=(N // fold,),
            in_specs=[
                pl.BlockSpec((None, HW, K1P), lambda n: (n, 0, 0)),   # conv1 slab
                pl.BlockSpec((K1P, CL), lambda n: (0, 0)),            # w1 (resident)
                pl.BlockSpec((CL, CL), lambda n: (0, 0)),             # group mask
                pl.BlockSpec((1, CL), lambda n: (0, 0)),              # gamma1
                pl.BlockSpec((1, CL), lambda n: (0, 0)),              # beta1
                pl.BlockSpec((9 * CL, CL), lambda n: (0, 0)),         # w2 (resident)
                pl.BlockSpec((1, CL), lambda n: (0, 0)),              # gamma2
                pl.BlockSpec((1, CL), lambda n: (0, 0)),              # beta2
            ],
            out_specs=pl.BlockSpec((None, HW, CL), lambda n: (n, 0, 0)),
            scratch_shapes=[pltpu.VMEM((H, W, 9 * CL), jnp.bfloat16)],  # conv2 im2col
        ),
        compiler_params=pltpu.CompilerParams(
            dimension_semantics=("parallel",),
            vmem_limit_bytes=32 * 1024 * 1024),
    )(slab1, w1f, gmask, g1f, b1f, w2f, g2f, b2f)

    # Un-fold the lane-packed samples back to (N, H, W, C) -- layout plumbing only.
    out = out.reshape(N // fold, H, W, fold, C)
    return jnp.transpose(out, (0, 3, 1, 2, 4)).reshape(N, H, W, C)


# ------------------------------ pure-JAX references ------------------------------
def _group_norm_ref(x, gamma, beta, num_groups, eps):
    N, H, W, C = x.shape
    cg = C // num_groups
    xr = x.reshape(N, H * W, num_groups, cg)
    mean = jnp.mean(xr, axis=(1, 3), keepdims=True)
    var = jnp.mean((xr - mean) ** 2, axis=(1, 3), keepdims=True)
    xn = (xr - mean) / jnp.sqrt(var + eps)
    return (xn.reshape(N, H, W, C) * gamma[None, None, None, :]
            + beta[None, None, None, :])


def head_gn_ref(x_nhwc, w1, g1, b1, w2, g2, b2, *, mxu_dtype=jnp.bfloat16):
    """mxu_dtype=bf16 mirrors the kernel's MXU operand precision (f32 accumulation);
    pass jnp.float32 for the full-precision reference."""
    dn = ("NHWC", "HWIO", "NHWC")
    y = lax.conv_general_dilated(x_nhwc.astype(mxu_dtype), w1.astype(mxu_dtype),
                                 (1, 1), "SAME", dimension_numbers=dn,
                                 preferred_element_type=jnp.float32)
    y = _group_norm_ref(y, g1[0], b1[0], NUM_GROUPS, EPS)
    y = lax.conv_general_dilated(y.astype(mxu_dtype), w2.astype(mxu_dtype),
                                 (1, 1), "SAME", dimension_numbers=dn,
                                 preferred_element_type=jnp.float32)
    y = _group_norm_ref(y, g2[0], b2[0], NUM_GROUPS, EPS)
    return y


if __name__ == "__main__":
    # head_GN(in_channel=3, out_channel=decode_channels=64) at a small spatial size.
    N, Cin, Cout, H, W = 4, 3, 64, 16, 16

    key = jax.random.PRNGKey(0)
    kx, kw1, kw2, kg1, kb1, kg2, kb2 = jax.random.split(key, 7)

    x_nchw = jax.random.normal(kx, (N, Cin, H, W), jnp.float32)   # PyTorch-style input
    x_nhwc = jnp.transpose(x_nchw, (0, 2, 3, 1))                  # kernel layout

    w1 = 0.1 * jax.random.normal(kw1, (3, 3, Cin, Cout), jnp.float32)
    w2 = 0.1 * jax.random.normal(kw2, (3, 3, Cout, Cout), jnp.float32)
    g1 = 1.0 + 0.1 * jax.random.normal(kg1, (1, Cout), jnp.float32)
    b1 = 0.1 * jax.random.normal(kb1, (1, Cout), jnp.float32)
    g2 = 1.0 + 0.1 * jax.random.normal(kg2, (1, Cout), jnp.float32)
    b2 = 0.1 * jax.random.normal(kb2, (1, Cout), jnp.float32)

    out = head_gn_pallas(x_nhwc, w1, g1, b1, w2, g2, b2)
    out = jax.block_until_ready(out)
    assert out.shape == (N, H, W, Cout)

    # Primary check: reference with matching MXU operand precision (bf16 in, f32 acc).
    ref_bf16 = head_gn_ref(x_nhwc, w1, g1, b1, w2, g2, b2, mxu_dtype=jnp.bfloat16)
    err = jnp.max(jnp.abs(out - ref_bf16))
    assert jnp.allclose(out, ref_bf16, atol=5e-3, rtol=5e-3), f"max abs err {err}"

    # Sanity check vs. the full-f32 reference: differences are bounded by bf16
    # matmul-operand rounding (signal std ~1.0 after GroupNorm).
    ref_f32 = head_gn_ref(x_nhwc, w1, g1, b1, w2, g2, b2, mxu_dtype=jnp.float32)
    err32 = jnp.max(jnp.abs(out - ref_f32))
    assert err32 < 0.15, f"max abs err vs f32 reference {err32}"

    print("KERNEL_OK")
</pallas_src>

<mosaic_0001>
module attributes {stable_mosaic.version = 11 : i64} {
  func.func @head_gn_kernel(%arg0: i32, %arg1: memref<1x256x128xbf16, #tpu.memory_space<vmem>>, %arg2: memref<128x128xbf16, #tpu.memory_space<vmem>>, %arg3: memref<128x128xf32, #tpu.memory_space<vmem>>, %arg4: memref<1x128xf32, #tpu.memory_space<vmem>>, %arg5: memref<1x128xf32, #tpu.memory_space<vmem>>, %arg6: memref<1152x128xbf16, #tpu.memory_space<vmem>>, %arg7: memref<1x128xf32, #tpu.memory_space<vmem>>, %arg8: memref<1x128xf32, #tpu.memory_space<vmem>>, %arg9: memref<1x256x128xf32, #tpu.memory_space<vmem>>, %arg10: memref<16x16x1152xbf16, #tpu.memory_space<vmem>>) attributes {dimension_semantics = [#tpu.dimension_semantics<parallel>], iteration_bounds = array<i64: 2>, scalar_prefetch = 0 : i64, scratch_operands = 1 : i64, tpu.core_type = #tpu.core_type<tc>, window_params = [{transform_indices = @transform_0, window_bounds = array<i64: 1, 256, 128>}, {pipeline_mode = #tpu.pipeline_mode<synchronous>, transform_indices = @transform_1, window_bounds = array<i64: 128, 128>}, {pipeline_mode = #tpu.pipeline_mode<synchronous>, transform_indices = @transform_2, window_bounds = array<i64: 128, 128>}, {pipeline_mode = #tpu.pipeline_mode<synchronous>, transform_indices = @transform_3, window_bounds = array<i64: 1, 128>}, {pipeline_mode = #tpu.pipeline_mode<synchronous>, transform_indices = @transform_4, window_bounds = array<i64: 1, 128>}, {pipeline_mode = #tpu.pipeline_mode<synchronous>, transform_indices = @transform_5, window_bounds = array<i64: 1152, 128>}, {pipeline_mode = #tpu.pipeline_mode<synchronous>, transform_indices = @transform_6, window_bounds = array<i64: 1, 128>}, {pipeline_mode = #tpu.pipeline_mode<synchronous>, transform_indices = @transform_7, window_bounds = array<i64: 1, 128>}, {transform_indices = @transform_8, window_bounds = array<i64: 1, 256, 128>}]} {
    %c0 = arith.constant 0 : index
    %c0_0 = arith.constant 0 : index
    %c0_1 = arith.constant 0 : index
    %0 = vector.load %arg1[%c0, %c0_0, %c0_1] : memref<1x256x128xbf16, #tpu.memory_space<vmem>>, vector<1x256x128xbf16>
    %1 = vector.shape_cast %0 : vector<1x256x128xbf16> to vector<256x128xbf16>
    %c0_2 = arith.constant 0 : index
    %c0_3 = arith.constant 0 : index
    %2 = vector.load %arg2[%c0_2, %c0_3] : memref<128x128xbf16, #tpu.memory_space<vmem>>, vector<128x128xbf16>
    %cst = arith.constant dense<0.000000e+00> : vector<256x128xf32>
    %3 = tpu.matmul %1, %2, %cst {dimension_numbers = #tpu.dot_dimension_numbers<[1], [0], [0], [1], [0, 0, 1, 1], [], []>} : vector<256x128xbf16>, vector<128x128xbf16>, vector<256x128xf32> -> vector<256x128xf32>
    %c0_4 = arith.constant 0 : index
    %c0_5 = arith.constant 0 : index
    %4 = vector.load %arg4[%c0_4, %c0_5] : memref<1x128xf32, #tpu.memory_space<vmem>>, vector<1x128xf32>
    %c0_6 = arith.constant 0 : index
    %c0_7 = arith.constant 0 : index
    %5 = vector.load %arg5[%c0_6, %c0_7] : memref<1x128xf32, #tpu.memory_space<vmem>>, vector<1x128xf32>
    %cst_8 = arith.constant dense<0.000000e+00> : vector<128xf32>
    %6 = vector.multi_reduction <add>, %3, %cst_8 [0] : vector<256x128xf32> to vector<128xf32>
    %7 = vector.shape_cast %6 : vector<128xf32> to vector<1x128xf32>
    %8 = arith.mulf %3, %3 : vector<256x128xf32>
    %cst_9 = arith.constant dense<0.000000e+00> : vector<128xf32>
    %9 = vector.multi_reduction <add>, %8, %cst_9 [0] : vector<256x128xf32> to vector<128xf32>
    %10 = vector.shape_cast %9 : vector<128xf32> to vector<1x128xf32>
    %11 = tpu.iota {dimensions = array<i32: 0>} : vector<2x128xi32>
    %c0_i32 = arith.constant 0 : i32
    %12 = vector.broadcast %c0_i32 : i32 to vector<2x128xi32>
    %13 = arith.cmpi eq, %11, %12 : vector<2x128xi32>
    %14 = vector.shape_cast %7 : vector<1x128xf32> to vector<1x128xf32>
    %15 = vector.broadcast %14 : vector<1x128xf32> to vector<2x128xf32>
    %16 = vector.shape_cast %10 : vector<1x128xf32> to vector<1x128xf32>
    %17 = vector.broadcast %16 : vector<1x128xf32> to vector<2x128xf32>
    %18 = arith.select %13, %15, %17 : vector<2x128xi1>, vector<2x128xf32>
    %c0_10 = arith.constant 0 : index
    %c0_11 = arith.constant 0 : index
    %19 = vector.load %arg3[%c0_10, %c0_11] : memref<128x128xf32, #tpu.memory_space<vmem>>, vector<128x128xf32>
    %cst_12 = arith.constant dense<0.000000e+00> : vector<2x128xf32>
    %20 = tpu.matmul %18, %19, %cst_12 {dimension_numbers = #tpu.dot_dimension_numbers<[1], [0], [0], [1], [0, 0, 1, 1], [], []>} : vector<2x128xf32>, vector<128x128xf32>, vector<2x128xf32> -> vector<2x128xf32>
    %21 = vector.extract_strided_slice %20 {offsets = [0, 0], sizes = [1, 128], strides = [1, 1]} : vector<2x128xf32> to vector<1x128xf32>
    %cst_13 = arith.constant 4.8828125E-4 : f32
    %22 = vector.broadcast %cst_13 : f32 to vector<1x128xf32>
    %23 = arith.mulf %21, %22 : vector<1x128xf32>
    %24 = vector.extract_strided_slice %20 {offsets = [1, 0], sizes = [1, 128], strides = [1, 1]} : vector<2x128xf32> to vector<1x128xf32>
    %cst_14 = arith.constant 4.8828125E-4 : f32
    %25 = vector.broadcast %cst_14 : f32 to vector<1x128xf32>
    %26 = arith.mulf %24, %25 : vector<1x128xf32>
    %27 = arith.mulf %23, %23 : vector<1x128xf32>
    %28 = arith.subf %26, %27 : vector<1x128xf32>
    %cst_15 = arith.constant 9.99999974E-6 : f32
    %29 = vector.broadcast %cst_15 : f32 to vector<1x128xf32>
    %30 = arith.addf %28, %29 : vector<1x128xf32>
    %31 = math.rsqrt %30 : vector<1x128xf32>
    %32 = arith.mulf %4, %31 : vector<1x128xf32>
    %33 = arith.mulf %23, %32 : vector<1x128xf32>
    %34 = arith.subf %5, %33 : vector<1x128xf32>
    %35 = vector.broadcast %32 : vector<1x128xf32> to vector<256x128xf32>
    %36 = arith.mulf %3, %35 : vector<256x128xf32>
    %37 = vector.broadcast %34 : vector<1x128xf32> to vector<256x128xf32>
    %38 = arith.addf %36, %37 : vector<256x128xf32>
    %39 = arith.truncf %38 : vector<256x128xf32> to vector<256x128xbf16>
    %40 = vector.shape_cast %39 : vector<256x128xbf16> to vector<16x16x128xbf16>
    %cst_16 = arith.constant 0.000000e+00 : bf16
    %41 = vector.broadcast %cst_16 : bf16 to vector<1x16x128xbf16>
    %cst_17 = arith.constant 0.000000e+00 : bf16
    %42 = vector.broadcast %cst_17 : bf16 to vector<16x1x128xbf16>
    %c0_18 = arith.constant 0 : index
    %c0_19 = arith.constant 0 : index
    %c0_20 = arith.constant 0 : index
    %43 = vector.load %arg10[%c0_18, %c0_19, %c0_20] : memref<16x16x1152xbf16, #tpu.memory_space<vmem>>, vector<1x16x128xbf16>
    tpu.vector_store %arg10[%c0_18, %c0_19, %c0_20], %41 {strides = array<i32>} : memref<16x16x1152xbf16, #tpu.memory_space<vmem>>, vector<1x16x128xbf16>,
    %c0_21 = arith.constant 0 : index
    %c0_22 = arith.constant 0 : index
    %c0_23 = arith.constant 0 : index
    %44 = vector.load %arg10[%c0_21, %c0_22, %c0_23] : memref<16x16x1152xbf16, #tpu.memory_space<vmem>>, vector<16x1x128xbf16>
    tpu.vector_store %arg10[%c0_21, %c0_22, %c0_23], %42 {strides = array<i32>} : memref<16x16x1152xbf16, #tpu.memory_space<vmem>>, vector<16x1x128xbf16>,
    %45 = vector.extract_strided_slice %40 {offsets = [0, 0, 0], sizes = [15, 15, 128], strides = [1, 1, 1]} : vector<16x16x128xbf16> to vector<15x15x128xbf16>
    %c1 = arith.constant 1 : index
    %c1_24 = arith.constant 1 : index
    %c0_25 = arith.constant 0 : index
    %46 = vector.load %arg10[%c1, %c1_24, %c0_25] : memref<16x16x1152xbf16, #tpu.memory_space<vmem>>, vector<15x15x128xbf16>
    tpu.vector_store %arg10[%c1, %c1_24, %c0_25], %45 {strides = array<i32>} : memref<16x16x1152xbf16, #tpu.memory_space<vmem>>, vector<15x15x128xbf16>,
    %c0_26 = arith.constant 0 : index
    %c0_27 = arith.constant 0 : index
    %c128 = arith.constant 128 : index
    %47 = vector.load %arg10[%c0_26, %c0_27, %c128] : memref<16x16x1152xbf16, #tpu.memory_space<vmem>>, vector<1x16x128xbf16>
    tpu.vector_store %arg10[%c0_26, %c0_27, %c128], %41 {strides = array<i32>} : memref<16x16x1152xbf16, #tpu.memory_space<vmem>>, vector<1x16x128xbf16>,
    %48 = vector.extract_strided_slice %40 {offsets = [0, 0, 0], sizes = [15, 16, 128], strides = [1, 1, 1]} : vector<16x16x128xbf16> to vector<15x16x128xbf16>
    %c1_28 = arith.constant 1 : index
    %c0_29 = arith.constant 0 : index
    %c128_30 = arith.constant 128 : index
    %49 = vector.load %arg10[%c1_28, %c0_29, %c128_30] : memref<16x16x1152xbf16, #tpu.memory_space<vmem>>, vector<15x16x128xbf16>
    tpu.vector_store %arg10[%c1_28, %c0_29, %c128_30], %48 {strides = array<i32>} : memref<16x16x1152xbf16, #tpu.memory_space<vmem>>, vector<15x16x128xbf16>,
    %c0_31 = arith.constant 0 : index
    %c0_32 = arith.constant 0 : index
    %c256 = arith.constant 256 : index
    %50 = vector.load %arg10[%c0_31, %c0_32, %c256] : memref<16x16x1152xbf16, #tpu.memory_space<vmem>>, vector<1x16x128xbf16>
    tpu.vector_store %arg10[%c0_31, %c0_32, %c256], %41 {strides = array<i32>} : memref<16x16x1152xbf16, #tpu.memory_space<vmem>>, vector<1x16x128xbf16>,
    %c0_33 = arith.constant 0 : index
    %c15 = arith.constant 15 : index
    %c256_34 = arith.constant 256 : index
    %51 = vector.load %arg10[%c0_33, %c15, %c256_34] : memref<16x16x1152xbf16, #tpu.memory_space<vmem>>, vector<16x1x128xbf16>
    tpu.vector_store %arg10[%c0_33, %c15, %c256_34], %42 {strides = array<i32>} : memref<16x16x1152xbf16, #tpu.memory_space<vmem>>, vector<16x1x128xbf16>,
    %52 = vector.extract_strided_slice %40 {offsets = [0, 1, 0], sizes = [15, 15, 128], strides = [1, 1, 1]} : vector<16x16x128xbf16> to vector<15x15x128xbf16>
    %c1_35 = arith.constant 1 : index
    %c0_36 = arith.constant 0 : index
    %c256_37 = arith.constant 256 : index
    %53 = vector.load %arg10[%c1_35, %c0_36, %c256_37] : memref<16x16x1152xbf16, #tpu.memory_space<vmem>>, vector<15x15x128xbf16>
    tpu.vector_store %arg10[%c1_35, %c0_36, %c256_37], %52 {strides = array<i32>} : memref<16x16x1152xbf16, #tpu.memory_space<vmem>>, vector<15x15x128xbf16>,
    %c0_38 = arith.constant 0 : index
    %c0_39 = arith.constant 0 : index
    %c384 = arith.constant 384 : index
    %54 = vector.load %arg10[%c0_38, %c0_39, %c384] : memref<16x16x1152xbf16, #tpu.memory_space<vmem>>, vector<16x1x128xbf16>
    tpu.vector_store %arg10[%c0_38, %c0_39, %c384], %42 {strides = array<i32>} : memref<16x16x1152xbf16, #tpu.memory_space<vmem>>, vector<16x1x128xbf16>,
    %55 = vector.extract_strided_slice %40 {offsets = [0, 0, 0], sizes = [16, 15, 128], strides = [1, 1, 1]} : vector<16x16x128xbf16> to vector<16x15x128xbf16>
    %c0_40 = arith.constant 0 : index
    %c1_41 = arith.constant 1 : index
    %c384_42 = arith.constant 384 : index
    %56 = vector.load %arg10[%c0_40, %c1_41, %c384_42] : memref<16x16x1152xbf16, #tpu.memory_space<vmem>>, vector<16x15x128xbf16>
    tpu.vector_store %arg10[%c0_40, %c1_41, %c384_42], %55 {strides = array<i32>} : memref<16x16x1152xbf16, #tpu.memory_space<vmem>>, vector<16x15x128xbf16>,
    %c0_43 = arith.constant 0 : index
    %c0_44 = arith.constant 0 : index
    %c512 = arith.constant 512 : index
    %57 = vector.load %arg10[%c0_43, %c0_44, %c512] : memref<16x16x1152xbf16, #tpu.memory_space<vmem>>, vector<16x16x128xbf16>
    tpu.vector_store %arg10[%c0_43, %c0_44, %c512], %40 {strides = array<i32>} : memref<16x16x1152xbf16, #tpu.memory_space<vmem>>, vector<16x16x128xbf16>,
    %c0_45 = arith.constant 0 : index
    %c15_46 = arith.constant 15 : index
    %c640 = arith.constant 640 : index
    %58 = vector.load %arg10[%c0_45, %c15_46, %c640] : memref<16x16x1152xbf16, #tpu.memory_space<vmem>>, vector<16x1x128xbf16>
    tpu.vector_store %arg10[%c0_45, %c15_46, %c640], %42 {strides = array<i32>} : memref<16x16x1152xbf16, #tpu.memory_space<vmem>>, vector<16x1x128xbf16>,
    %59 = vector.extract_strided_slice %40 {offsets = [0, 1, 0], sizes = [16, 15, 128], strides = [1, 1, 1]} : vector<16x16x128xbf16> to vector<16x15x128xbf16>
    %c0_47 = arith.constant 0 : index
    %c0_48 = arith.constant 0 : index
    %c640_49 = arith.constant 640 : index
    %60 = vector.load %arg10[%c0_47, %c0_48, %c640_49] : memref<16x16x1152xbf16, #tpu.memory_space<vmem>>, vector<16x15x128xbf16>
    tpu.vector_store %arg10[%c0_47, %c0_48, %c640_49], %59 {strides = array<i32>} : memref<16x16x1152xbf16, #tpu.memory_space<vmem>>, vector<16x15x128xbf16>,
    %c15_50 = arith.constant 15 : index
    %c0_51 = arith.constant 0 : index
    %c768 = arith.constant 768 : index
    %61 = vector.load %arg10[%c15_50, %c0_51, %c768] : memref<16x16x1152xbf16, #tpu.memory_space<vmem>>, vector<1x16x128xbf16>
    tpu.vector_store %arg10[%c15_50, %c0_51, %c768], %41 {strides = array<i32>} : memref<16x16x1152xbf16, #tpu.memory_space<vmem>>, vector<1x16x128xbf16>,
    %c0_52 = arith.constant 0 : index
    %c0_53 = arith.constant 0 : index
    %c768_54 = arith.constant 768 : index
    %62 = vector.load %arg10[%c0_52, %c0_53, %c768_54] : memref<16x16x1152xbf16, #tpu.memory_space<vmem>>, vector<16x1x128xbf16>
    tpu.vector_store %arg10[%c0_52, %c0_53, %c768_54], %42 {strides = array<i32>} : memref<16x16x1152xbf16, #tpu.memory_space<vmem>>, vector<16x1x128xbf16>,
    %63 = vector.extract_strided_slice %40 {offsets = [1, 0, 0], sizes = [15, 15, 128], strides = [1, 1, 1]} : vector<16x16x128xbf16> to vector<15x15x128xbf16>
    %c0_55 = arith.constant 0 : index
    %c1_56 = arith.constant 1 : index
    %c768_57 = arith.constant 768 : index
    %64 = vector.load %arg10[%c0_55, %c1_56, %c768_57] : memref<16x16x1152xbf16, #tpu.memory_space<vmem>>, vector<15x15x128xbf16>
    tpu.vector_store %arg10[%c0_55, %c1_56, %c768_57], %63 {strides = array<i32>} : memref<16x16x1152xbf16, #tpu.memory_space<vmem>>, vector<15x15x128xbf16>,
    %c15_58 = arith.constant 15 : index
    %c0_59 = arith.constant 0 : index
    %c896 = arith.constant 896 : index
    %65 = vector.load %arg10[%c15_58, %c0_59, %c896] : memref<16x16x1152xbf16, #tpu.memory_space<vmem>>, vector<1x16x128xbf16>
    tpu.vector_store %arg10[%c15_58, %c0_59, %c896], %41 {strides = array<i32>} : memref<16x16x1152xbf16, #tpu.memory_space<vmem>>, vector<1x16x128xbf16>,
    %66 = vector.extract_strided_slice %40 {offsets = [1, 0, 0], sizes = [15, 16, 128], strides = [1, 1, 1]} : vector<16x16x128xbf16> to vector<15x16x128xbf16>
    %c0_60 = arith.constant 0 : index
    %c0_61 = arith.constant 0 : index
    %c896_62 = arith.constant 896 : index
    %67 = vector.load %arg10[%c0_60, %c0_61, %c896_62] : memref<16x16x1152xbf16, #tpu.memory_space<vmem>>, vector<15x16x128xbf16>
    tpu.vector_store %arg10[%c0_60, %c0_61, %c896_62], %66 {strides = array<i32>} : memref<16x16x1152xbf16, #tpu.memory_space<vmem>>, vector<15x16x128xbf16>,
    %c15_63 = arith.constant 15 : index
    %c0_64 = arith.constant 0 : index
    %c1024 = arith.constant 1024 : index
    %68 = vector.load %arg10[%c15_63, %c0_64, %c1024] : memref<16x16x1152xbf16, #tpu.memory_space<vmem>>, vector<1x16x128xbf16>
    tpu.vector_store %arg10[%c15_63, %c0_64, %c1024], %41 {strides = array<i32>} : memref<16x16x1152xbf16, #tpu.memory_space<vmem>>, vector<1x16x128xbf16>,
    %c0_65 = arith.constant 0 : index
    %c15_66 = arith.constant 15 : index
    %c1024_67 = arith.constant 1024 : index
    %69 = vector.load %arg10[%c0_65, %c15_66, %c1024_67] : memref<16x16x1152xbf16, #tpu.memory_space<vmem>>, vector<16x1x128xbf16>
    tpu.vector_store %arg10[%c0_65, %c15_66, %c1024_67], %42 {strides = array<i32>} : memref<16x16x1152xbf16, #tpu.memory_space<vmem>>, vector<16x1x128xbf16>,
    %70 = vector.extract_strided_slice %40 {offsets = [1, 1, 0], sizes = [15, 15, 128], strides = [1, 1, 1]} : vector<16x16x128xbf16> to vector<15x15x128xbf16>
    %c0_68 = arith.constant 0 : index
    %c0_69 = arith.constant 0 : index
    %c1024_70 = arith.constant 1024 : index
    %71 = vector.load %arg10[%c0_68, %c0_69, %c1024_70] : memref<16x16x1152xbf16, #tpu.memory_space<vmem>>, vector<15x15x128xbf16>
    tpu.vector_store %arg10[%c0_68, %c0_69, %c1024_70], %70 {strides = array<i32>} : memref<16x16x1152xbf16, #tpu.memory_space<vmem>>, vector<15x15x128xbf16>,
    %c0_71 = arith.constant 0 : index
    %c0_72 = arith.constant 0 : index
    %c0_73 = arith.constant 0 : index
    %72 = vector.load %arg10[%c0_71, %c0_72, %c0_73] : memref<16x16x1152xbf16, #tpu.memory_space<vmem>>, vector<16x16x1152xbf16>
    %73 = vector.shape_cast %72 : vector<16x16x1152xbf16> to vector<256x1152xbf16>
    %c0_74 = arith.constant 0 : index
    %c0_75 = arith.constant 0 : index
    %74 = vector.load %arg6[%c0_74, %c0_75] : memref<1152x128xbf16, #tpu.memory_space<vmem>>, vector<1152x128xbf16>
    %cst_76 = arith.constant dense<0.000000e+00> : vector<256x128xf32>
    %75 = tpu.matmul %73, %74, %cst_76 {dimension_numbers = #tpu.dot_dimension_numbers<[1], [0], [0], [1], [0, 0, 1, 1], [], []>} : vector<256x1152xbf16>, vector<1152x128xbf16>, vector<256x128xf32> -> vector<256x128xf32>
    %c0_77 = arith.constant 0 : index
    %c0_78 = arith.constant 0 : index
    %76 = vector.load %arg7[%c0_77, %c0_78] : memref<1x128xf32, #tpu.memory_space<vmem>>, vector<1x128xf32>
    %c0_79 = arith.constant 0 : index
    %c0_80 = arith.constant 0 : index
    %77 = vector.load %arg8[%c0_79, %c0_80] : memref<1x128xf32, #tpu.memory_space<vmem>>, vector<1x128xf32>
    %cst_81 = arith.constant dense<0.000000e+00> : vector<128xf32>
    %78 = vector.multi_reduction <add>, %75, %cst_81 [0] : vector<256x128xf32> to vector<128xf32>
    %79 = vector.shape_cast %78 : vector<128xf32> to vector<1x128xf32>
    %80 = arith.mulf %75, %75 : vector<256x128xf32>
    %cst_82 = arith.constant dense<0.000000e+00> : vector<128xf32>
    %81 = vector.multi_reduction <add>, %80, %cst_82 [0] : vector<256x128xf32> to vector<128xf32>
    %82 = vector.shape_cast %81 : vector<128xf32> to vector<1x128xf32>
    %83 = tpu.iota {dimensions = array<i32: 0>} : vector<2x128xi32>
    %c0_i32_83 = arith.constant 0 : i32
    %84 = vector.broadcast %c0_i32_83 : i32 to vector<2x128xi32>
    %85 = arith.cmpi eq, %83, %84 : vector<2x128xi32>
    %86 = vector.shape_cast %79 : vector<1x128xf32> to vector<1x128xf32>
    %87 = vector.broadcast %86 : vector<1x128xf32> to vector<2x128xf32>
    %88 = vector.shape_cast %82 : vector<1x128xf32> to vector<1x128xf32>
    %89 = vector.broadcast %88 : vector<1x128xf32> to vector<2x128xf32>
    %90 = arith.select %85, %87, %89 : vector<2x128xi1>, vector<2x128xf32>
    %c0_84 = arith.constant 0 : index
    %c0_85 = arith.constant 0 : index
    %91 = vector.load %arg3[%c0_84, %c0_85] : memref<128x128xf32, #tpu.memory_space<vmem>>, vector<128x128xf32>
    %cst_86 = arith.constant dense<0.000000e+00> : vector<2x128xf32>
    %92 = tpu.matmul %90, %91, %cst_86 {dimension_numbers = #tpu.dot_dimension_numbers<[1], [0], [0], [1], [0, 0, 1, 1], [], []>} : vector<2x128xf32>, vector<128x128xf32>, vector<2x128xf32> -> vector<2x128xf32>
    %93 = vector.extract_strided_slice %92 {offsets = [0, 0], sizes = [1, 128], strides = [1, 1]} : vector<2x128xf32> to vector<1x128xf32>
    %cst_87 = arith.constant 4.8828125E-4 : f32
    %94 = vector.broadcast %cst_87 : f32 to vector<1x128xf32>
    %95 = arith.mulf %93, %94 : vector<1x128xf32>
    %96 = vector.extract_strided_slice %92 {offsets = [1, 0], sizes = [1, 128], strides = [1, 1]} : vector<2x128xf32> to vector<1x128xf32>
    %cst_88 = arith.constant 4.8828125E-4 : f32
    %97 = vector.broadcast %cst_88 : f32 to vector<1x128xf32>
    %98 = arith.mulf %96, %97 : vector<1x128xf32>
    %99 = arith.mulf %95, %95 : vector<1x128xf32>
    %100 = arith.subf %98, %99 : vector<1x128xf32>
    %cst_89 = arith.constant 9.99999974E-6 : f32
    %101 = vector.broadcast %cst_89 : f32 to vector<1x128xf32>
    %102 = arith.addf %100, %101 : vector<1x128xf32>
    %103 = math.rsqrt %102 : vector<1x128xf32>
    %104 = arith.mulf %76, %103 : vector<1x128xf32>
    %105 = arith.mulf %95, %104 : vector<1x128xf32>
    %106 = arith.subf %77, %105 : vector<1x128xf32>
    %107 = vector.broadcast %104 : vector<1x128xf32> to vector<256x128xf32>
    %108 = arith.mulf %75, %107 : vector<256x128xf32>
    %109 = vector.broadcast %106 : vector<1x128xf32> to vector<256x128xf32>
    %110 = arith.addf %108, %109 : vector<256x128xf32>
    %c0_90 = arith.constant 0 : index
    %c0_91 = arith.constant 0 : index
    %c0_92 = arith.constant 0 : index
    %111 = vector.load %arg9[%c0_90, %c0_91, %c0_92] : memref<1x256x128xf32, #tpu.memory_space<vmem>>, vector<1x256x128xf32>
    %112 = vector.shape_cast %111 : vector<1x256x128xf32> to vector<256x128xf32>
    %113 = vector.shape_cast %110 : vector<256x128xf32> to vector<1x256x128xf32>
    tpu.vector_store %arg9[%c0_90, %c0_91, %c0_92], %113 {strides = array<i32>} : memref<1x256x128xf32, #tpu.memory_space<vmem>>, vector<1x256x128xf32>,
    return
  }
  func.func @transform_0(%arg0: i32) -> (i32, i32, i32) {
    %c0_i32 = arith.constant 0 : i32
    %c0_i32_0 = arith.constant 0 : i32
    %c0_i32_1 = arith.constant 0 : i32
    return %arg0, %c0_i32, %c0_i32_0 : i32, i32, i32
  }
  func.func @transform_1(%arg0: i32) -> (i32, i32) {
    %c0_i32 = arith.constant 0 : i32
    %c0_i32_0 = arith.constant 0 : i32
    %c0_i32_1 = arith.constant 0 : i32
    return %c0_i32, %c0_i32_0 : i32, i32
  }
  func.func @transform_2(%arg0: i32) -> (i32, i32) {
    %c0_i32 = arith.constant 0 : i32
    %c0_i32_0 = arith.constant 0 : i32
    %c0_i32_1 = arith.constant 0 : i32
    return %c0_i32, %c0_i32_0 : i32, i32
  }
  func.func @transform_3(%arg0: i32) -> (i32, i32) {
    %c0_i32 = arith.constant 0 : i32
    %c0_i32_0 = arith.constant 0 : i32
    %c0_i32_1 = arith.constant 0 : i32
    return %c0_i32, %c0_i32_0 : i32, i32
  }
  func.func @transform_4(%arg0: i32) -> (i32, i32) {
    %c0_i32 = arith.constant 0 : i32
    %c0_i32_0 = arith.constant 0 : i32
    %c0_i32_1 = arith.constant 0 : i32
    return %c0_i32, %c0_i32_0 : i32, i32
  }
  func.func @transform_5(%arg0: i32) -> (i32, i32) {
    %c0_i32 = arith.constant 0 : i32
    %c0_i32_0 = arith.constant 0 : i32
    %c0_i32_1 = arith.constant 0 : i32
    return %c0_i32, %c0_i32_0 : i32, i32
  }
  func.func @transform_6(%arg0: i32) -> (i32, i32) {
    %c0_i32 = arith.constant 0 : i32
    %c0_i32_0 = arith.constant 0 : i32
    %c0_i32_1 = arith.constant 0 : i32
    return %c0_i32, %c0_i32_0 : i32, i32
  }
  func.func @transform_7(%arg0: i32) -> (i32, i32) {
    %c0_i32 = arith.constant 0 : i32
    %c0_i32_0 = arith.constant 0 : i32
    %c0_i32_1 = arith.constant 0 : i32
    return %c0_i32, %c0_i32_0 : i32, i32
  }
  func.func @transform_8(%arg0: i32) -> (i32, i32, i32) {
    %c0_i32 = arith.constant 0 : i32
    %c0_i32_0 = arith.constant 0 : i32
    %c0_i32_1 = arith.constant 0 : i32
    return %arg0, %c0_i32, %c0_i32_0 : i32, i32, i32
  }
}

</mosaic_0001>

<bundles_post_ra>
// kernel: tpu_custom_call.1
= control target key start
LH: loop header
LB: loop body
LE: loop exit
PB: predicated region body
PF: predicated region fallthrough
CT: control target
= control target key end

     0   :  { %s9325_s0 = inlined_call_operand.hbm [shape: bf16[2,256,128], index: 0, kind: input, shape index: {}]   ;;  %s9326_s1 = inlined_call_operand.hbm [shape: bf16[128,128], index: 1, kind: input, shape index: {}]   ;;  %s9327_s2 = inlined_call_operand.hbm [shape: f32[128,128], index: 2, kind: input, shape index: {}]   ;;  %s9328_s3 = inlined_call_operand.vmem [shape: f32[1,128], index: 3, kind: input, shape index: {}]   ;;  %s9329_s4 = inlined_call_operand.vmem [shape: f32[1,128], index: 4, kind: input, shape index: {}]   ;;  %s9330_s5 = inlined_call_operand.hbm [shape: bf16[1152,128], index: 5, kind: input, shape index: {}]   ;;  %s9331_s6 = inlined_call_operand.vmem [shape: f32[1,128], index: 6, kind: input, shape index: {}]   ;;  %s9332_s7 = inlined_call_operand.vmem [shape: f32[1,128], index: 7, kind: input, shape index: {}]   ;;  %s9333_s8 = inlined_call_operand.hbm [shape: f32[2,256,128], index: 8, kind: output, shape index: {}]  }
   0x1   :  { %9420 = sst [smem:[#allocation36_spill]] %s9326_s1 }
   0x2   :  { %9421 = sst [smem:[#allocation37_spill]] %s9327_s2 }
   0x3   :  { %13 = vsyncpa [#allocation4], 0 }
   0x4   :  { %15 = vsyncpa [#allocation4 + $0x1], 0 }
   0x5   :  { %16 = vsyncpa [#allocation7], 0 }
   0x6   :  { %17 = vsyncpa [#allocation10], 0 }
   0x7   :  { %18 = vsyncpa [#allocation5], 0 }
   0x8   :  { %20 = vsyncpa [#allocation5 + $0x1], 0  ;;  %s6774_s27 = smov 0   ;;  %s6776_s28 = smov 0  }
   0x9   :  { %s6778_s29 = smov 0   ;;  %s6780_s30 = smov 0  }
   0xa LB: > { %s6795_s9 = sadd.s32 4294967295, %s6712_s30   ;;  %s5117_s10 = sadd.s32 4294967294, %s6712_s30   ;;  %s6712_s30 = sphi %s6780_s30, %s9603_s30   ;;  %s6708_s29 = sphi %s6778_s29, %s9602_s29   ;;  %s6704_s28 = sphi %s6776_s28, %s9601_s28   ;;  %s6700_s27 = sphi %s6774_s27, %s9600_s27  }
   0xb   : > { %p46_p0 = scmp.ne.s32.totalorder %s6704_s28, %s6700_s27  ;;  %p9336_p1 = scmp.eq.s32.totalorder %s6795_s9, 0 }
   0xc   : > { %p217_p2 = scmp.eq.s32.totalorder %s6795_s9, 1  ;;  %p223_p3 = scmp.eq.s32.totalorder %s5117_s10, 1 }
   0xd   : > { %p6804_p4 = por %p9336_p1, %p46_p0  ;;  %p5118_p5 = scmp.ge.s32.totalorder %s6712_s30, 1 }
   0xe   : > { %p6809_p6 = por %p223_p3, %p46_p0  ;;  %p230_p7 = scmp.lt.s32.totalorder %s6712_s30, 3 }
   0xf   : > { %s9422_s11 = scalar_select %p6804_p4, 1, 0 }
  0x10   : > { %s9423_s12 = scalar_select %p6809_p6, 1, 0 }
  0x11   : > { %p6814_p8 = pnand %p5118_p5, %p230_p7  ;;  %s6714_s14 = smov [#allocation6]  }
  0x12   : > { %s242_s15 = sshll.u32 %s6714_s14, 4  ;;  %s6715_s17 = smov [#allocation8]   ;;  %s243_s15 = int_to_ptr.vmem [resolvable:$true] %s242_s15 }
  0x13   : > { %s9424_s13 = scalar_select %p6814_p8, 1, 0 }
  0x14   : > { %p6155_p9 = pneg %p6814_p8  ;;  %s255_s18 = sshll.u32 %s6715_s17, 4  ;;  %s256_s18 = int_to_ptr.vmem [resolvable:$true] %s255_s18 }
  0x15   : > { %s6545_s19 = scalar_lea.vmem %s243_s15, 1024  ;;  %p6553_p5 = scmp.lt.s32.totalorder %s243_s15, %s243_s15 }
  0x16   : > { %p6823_p11 = pnand %p6155_p9, %p9336_p1  ;;  %p6546_p13 = scmp.ne.s32.totalorder %s243_s15, %s6545_s19 }
  0x17   : > { %p6554_p7 = scmp.lt.s32.totalorder %s6545_s19, %s6545_s19 }
  0x18   : > { %p6536_p12 = pneg %p6823_p11 }
  0x19   : > { %p6555_p10 = por %p6554_p7, %p6553_p5 }
  0x1a   : > { %p6548_p0 = pnand %p6546_p13, %p6536_p12 }
  0x1c   : > { %p6549_p3 = pneg %p6548_p0 }
  0x1e   : > { %p6556_p9 = pnand %p6555_p10, %p6549_p3 }
  0x20   : > { %6559 = shalt.err (!%p6556_p9)
}
  0x21   : > { %s9334_s20 = smov 64   ;;  %s9335_s21 = smov 4  }
  0x22   : > { %s9426_s1 = sld [smem:[#allocation36_spill]]  ;;  %s6571_s24 = scalar_lea.vmem %s256_s18, 2048 }
  0x23   : > { %p6572_p13 = scmp.ne.s32.totalorder %s256_s18, %s6571_s24  ;;  %p6579_p10 = scmp.lt.s32.totalorder %s256_s18, %s256_s18 }
  0x24   : > { %p6580_p3 = scmp.lt.s32.totalorder %s6571_s24, %s6571_s24 }
  0x25   : > { %p6574_p0 = pnand %p6572_p13, %p6536_p12 }
  0x26   : > { %p6581_p7 = por %p6580_p3, %p6579_p10 }
  0x27   : > { %p6575_p5 = pneg %p6574_p0 }
  0x28   : > { %6158 = dma.hbm_to_vmem [thread:$0]  (!%p6823_p11), %s9426_s1, 1024, %s243_s15, [#allocation7], %s9334_s20, %s9334_s20, %s9335_s21  }
  0x29   : > { %p6582_p9 = pnand %p6581_p7, %p6575_p5 }
  0x2b   : > { %6585 = shalt.err (!%p6582_p9)
}
  0x2c   : > { %s6718_s25 = smov 128   ;;  %s6719_s26 = smov 8  }
  0x2d   : > { %s9427_s2 = sld [smem:[#allocation37_spill]]  ;;  %s6720_s15 = smov [#allocation9]  }
  0x2e   : > { %s274_s17 = sshll.u32 %s6720_s15, 4  ;;  %s6849_s19 = sadd.s32 1, %s6712_s30   ;;  %s275_s17 = int_to_ptr.vmem [resolvable:$true] %s274_s17 }
  0x2f   : > { %s6597_s22 = scalar_lea.vmem %s275_s17, 9216  ;;  %p6605_p10 = scmp.lt.s32.totalorder %s275_s17, %s275_s17 }
  0x30   : > { %p6598_p13 = scmp.ne.s32.totalorder %s275_s17, %s6597_s22  ;;  %p6606_p3 = scmp.lt.s32.totalorder %s6597_s22, %s6597_s22 }
  0x32   : > { %p6600_p0 = pnand %p6598_p13, %p6536_p12  ;;  %p6607_p7 = por %p6606_p3, %p6605_p10 }
  0x33   : > { %6161 = dma.hbm_to_vmem [thread:$0]  (!%p6823_p11), %s9427_s2, 2048, %s256_s18, [#allocation7], %s6718_s25, %s6718_s25, %s6719_s26  }
  0x34   : > { %p6601_p5 = pneg %p6600_p0 }
  0x36   : > { %p6608_p9 = pnand %p6607_p7, %p6601_p5 }
  0x38   : > { %6611 = shalt.err (!%p6608_p9)
}
  0x39   : > { %6164 = dma.hbm_to_vmem [thread:$0]  (!%p6823_p11), %s9330_s5, 9216, %s275_s17, [#allocation10], %s9334_s20, %s9334_s20, %s9335_s21  }
  0x3a   : > { %s30_s24 = ssub.s32 %s6712_s30, %s6849_s19  ;;  %s33_s16 = sadd.s32 1, %s6708_s29 }
  0x3b   : > { %p31_p12 = scmp.eq.s32.totalorder %s30_s24, 0  ;;  %p40_p13 = scmp.ne.s32.totalorder %s6708_s29, %s6704_s28 }
  0x3c   : > { %p41_p0 = scmp.eq.s32.totalorder %s6712_s30, 0  ;;  %p6176_p5 = scmp.lt.s32.totalorder %s6712_s30, 2 }
  0x3d   : > { %s6870_s25 = scalar_select %p31_p12, %s6708_s29, %s33_s16  }
  0x3e   : > { %p42_p10 = por %p41_p0, %p40_p13  ;;  %p6874_p3 = por %p217_p2, %p40_p13 }
  0x3f   : > { %s294_s10 = sand.u32 1, %s6708_s29   ;;  %s5409_s14 = sshll.u32 %s6712_s30, 11 }
  0x40   : > { %s9428_s26 = scalar_select %p6874_p3, 1, 0 }
  0x41   : > { %s5123_s15 = sshll.u32 %s294_s10, 7  ;;  %s6883_s17 = scalar_lea.hbm %s9325_s0, %s5409_s14 }
  0x42   : > { %s298_s23 = scalar_lea.vmem [#allocation3], %s5123_s15  ;;  %p6885_p11 = pnand %p6176_p5, %p42_p10 }
  0x43   : > { %s305_s24 = sshll.u32 %s298_s23, 4  ;;  %s6891_s20 = scalar_lea.sflag [#allocation4], %s294_s10  ;;  %s6889_s24 = int_to_ptr.vmem [resolvable:$true] %s305_s24 }
  0x44   : > { %s6612_s21 = scalar_lea.hbm %s6883_s17, 2048  ;;  %p6614_p7 = pneg %p6885_p11 }
  0x45   : > { %p6613_p2 = scmp.ne.s32.totalorder %s6883_s17, %s6612_s21  ;;  %s6617_s15 = scalar_lea.hbm %s9325_s0, 4096 }
  0x46   : > { %p6618_p13 = scmp.lt.s32.totalorder %s6883_s17, %s9325_s0  ;;  %p6619_p0 = scmp.lt.s32.totalorder %s6617_s15, %s6612_s21 }
  0x47   : > { %p6615_p9 = pnand %p6614_p7, %p6613_p2 }
  0x48   : > { %p6620_p5 = por %p6619_p0, %p6618_p13 }
  0x49   : > { %p6616_p12 = pneg %p6615_p9 }
  0x4b   : > { %p6621_p10 = pnand %p6620_p5, %p6616_p12 }
  0x4d   : > { %6624 = shalt.err (!%p6621_p10)
}
  0x4e   : > { %s6625_s10 = scalar_lea.vmem %s6889_s24, 2048  ;;  %s6721_s1 = smov [#allocation3]  }
  0x4f   : > { %p6626_p1 = scmp.ne.s32.totalorder %s6889_s24, %s6625_s10  ;;  %s6630_s2 = sshll.u32 %s6721_s1, 4  ;;  %s6631_s2 = int_to_ptr.vmem [resolvable:$false] %s6630_s2 }
  0x50   : > { %s6632_s14 = scalar_lea.vmem %s6631_s2, 4096  ;;  %p6633_p9 = scmp.lt.s32.totalorder %s6889_s24, %s6631_s2 }
  0x51   : > { %p6628_p6 = pnand %p6626_p1, %p6614_p7  ;;  %p6634_p3 = scmp.lt.s32.totalorder %s6632_s14, %s6625_s10 }
  0x53   : > { %p6629_p2 = pneg %p6628_p6  ;;  %p6635_p4 = por %p6634_p3, %p6633_p9 }
  0x55   : > { %p6636_p8 = pnand %p6635_p4, %p6629_p2 }
  0x57   : > { %6639 = shalt.err (!%p6636_p8)
}
  0x58   : > { %s9430_s21 = smov 4   ;;  %s9431_s22 = smov 64  }
  0x59   : > { %6168 = dma.hbm_to_vmem [thread:$0]  (!%p6885_p11), %s6883_s17, 2048, %s6889_s24, %s6891_s20, %s9431_s22, %s9431_s22, %s9430_s21  }
  0x5a   : > { %p9432_p1 = scmp.ne.s32.totalorder %s9424_s13, 0 }
  0x5c   : > { %317 = sbr.rel (%p9432_p1) target bundleno = 1593 (0x639), region = 52 }
  0x61   : > { %s6918_s1 = sand.u32 1, %s6704_s28   ;;  %p9433_p4 = scmp.ne.s32.totalorder %s9422_s11, 0 }
  0x62   : > { %s5127_s2 = sshll.u32 %s6918_s1, 7  ;;  %s320_s15 = scalar_lea.sflag [#allocation4], %s6918_s1 }
  0x63   : > { %s6922_s18 = scalar_lea.vmem [#allocation3], %s5127_s2 }
  0x64   : > { %6683 = dma.done.wait (%p9433_p4), %s320_s15, 2048  }
  0x65   : > { %6685 = vsyncadd (%p9433_p4), %s320_s15, 4294965248  ;;  %p9434_p6 = scmp.eq.s32.totalorder %s6795_s9, 0 }
  0x67   : > { %6687 = dma.done.wait (%p9434_p6), [#allocation7], 3072   ;;  %p9435_p8 = pmov %p9434_p6 }
  0x68   : > { %p9436_p3 = pmov %p9434_p6 }
  0x69   : > { %6689 = vsyncadd (%p9435_p8), [#allocation7], 4294964224 }
  0x6a   : > { %6691 = dma.done.wait (%p9436_p3), [#allocation10], 9216   ;;  %p9437_p11 = pmov %p9436_p3 }
  0x6b   : > { %v6226_v0 = vld [vmem:[#allocation6 + $0x38] sm:$0xff]   ;;  %v6227_v1 = vld [vmem:[#allocation6 + $0x30] sm:$0xff]   ;;  %v6228_v2 = vld [vmem:[#allocation6 + $0x28] sm:$0xff]   ;;  %vm1042_vm0 = vcmask 1040384   ;;  %vm1043_vm1 = vsmask.f32 256 }
  0x6c   : > { %6693 = vsyncadd (%p9437_p11), [#allocation10], 4294958080  ;;  %5973 = vmatprep.subr.bf16.mxu0 %v6226_v0  ;;  %v6229_v3 = vld [vmem:[#allocation6 + $0x20] sm:$0xff]   ;;  %v6230_v5 = vld [vmem:[#allocation6 + $0x18] sm:$0xff]   ;;  %v9438_v25 = vmov 0  ;;  %vm1568_vm3 = vcmask 1043459  }
  0x6d   : > { %5974 = vmatpush3.bf16.msra.mxu0 %v6226_v0  ;;  %v6234_v4 = vld [vmem:[%s6922_s18] sm:$0xff]   ;;  %v6231_v6 = vld [vmem:[#allocation6 + $0x10] sm:$0xff]   ;;  %v6232_v7 = vld [vmem:[#allocation6 + $0x8] sm:$0xff]   ;;  %vm1569_vm4 = vsmask.f32 7950  ;;  %v9441_v36 = vmov 0 }
  0x6e   : > { %5975 = vmatprep.subr.bf16.mxu0 %v6227_v1  ;;  %5989 = vmatprep.mubr.bf16.mxu0 %v6234_v4  ;;  %v6233_v8 = vld [vmem:[#allocation6] sm:$0xff]   ;;  %v6235_v9 = vld [vmem:[%s6922_s18 + $0x8] sm:$0xff]   ;;  %v6236_v10 = vld [vmem:[%s6922_s18 + $0x10] sm:$0xff]   ;;  %vm6723_vm6 = vmmov 0   ;;  %vm1168_vm8 = vsmask.f32 4368 }
  0x6f   : > { %v6237_v11 = vld [vmem:[%s6922_s18 + $0x18] sm:$0xff]   ;;  %v6238_v12 = vld [vmem:[%s6922_s18 + $0x20] sm:$0xff]   ;;  %v6239_v13 = vld [vmem:[%s6922_s18 + $0x28] sm:$0xff]   ;;  %vm1441_vm10 = vcmask 1043456   ;;  %vm1442_vm11 = vsmask.f32 7938 }
  0x70   : > { %v6240_v14 = vld [vmem:[%s6922_s18 + $0x30] sm:$0xff]   ;;  %v6241_v15 = vld [vmem:[%s6922_s18 + $0x38] sm:$0xff]   ;;  %v6242_v16 = vld [vmem:[%s6922_s18 + $0x40] sm:$0xff]   ;;  %vm1619_vm12 = vsmask.f32 3328  ;;  %s5131_s14 = sshll.u32 %s6918_s1, 8 }
  0x71   : > { %5976 = vmatpush3.bf16.msra.mxu0 %v6227_v1  ;;  %v6243_v17 = vld [vmem:[%s6922_s18 + $0x48] sm:$0xff]   ;;  %v6244_v18 = vld [vmem:[%s6922_s18 + $0x50] sm:$0xff]   ;;  %v6245_v19 = vld [vmem:[%s6922_s18 + $0x58] sm:$0xff]   ;;  %vm1620_vm13 = vsmask.f32 7440  ;;  %s9219_s21 = scalar_lea.vmem [#allocation11], %s5131_s14 }
  0x72   : > { %5977 = vmatprep.subr.bf16.mxu0 %v6228_v2  ;;  %v6246_v20 = vld [vmem:[%s6922_s18 + $0x60] sm:$0xff]   ;;  %v6247_v21 = vld [vmem:[%s6922_s18 + $0x68] sm:$0xff]   ;;  %v6248_v22 = vld [vmem:[%s6922_s18 + $0x70] sm:$0xff]   ;;  %s5442_s22 = sshll.u32 %s6795_s9, 12  ;;  %s5015_s2 = sshll.u32 %s9219_s21, 4  ;;  %s9270_s2 = int_to_ptr.vmem [resolvable:$true] %s5015_s2 }
  0x73   : > { %v6249_v23 = vld [vmem:[%s6922_s18 + $0x78] sm:$0xff]   ;;  %v1051_v24 = vld [vmem:[#allocation2 + $0x90] sm:$0x1]  ;;  %vm6953_vm2 = vmand %vm1042_vm0, %vm1043_vm1  ;;  %s9268_s18 = scalar_lea.hbm %s9333_s8, %s5442_s22  ;;  %s5002_s11 = scalar_lea.sflag [#allocation5], %s6918_s1 }
  0x74   : > { %v9439_v25 = vsel %vm6953_vm2, 4294967295, %v9438_v25  ;;  %v1851_v26 = vld [vmem:[#allocation2 + $0x54] sm:$0x1]  ;;  %v2143_v27 = vld [vmem:[#allocation2 + $0x18] sm:$0x1]  ;;  %v1052_v28 = vsel %vm6953_vm2, 0, %v1051_v24  ;;  %vm6967_vm5 = vmand %vm1568_vm3, %vm1569_vm4 }
  0x75   : > { %5978 = vmatpush3.bf16.msra.mxu0 %v6228_v2  ;;  %9440 = vst [vmem:[#allocation16_spill] sm:$0xff] %v9439_v25  ;;  %v1852_v29 = vsel %vm6953_vm2, 0, %v1851_v26  ;;  %v2144_v30 = vsel %vm6953_vm2, 0, %v2143_v27  ;;  %v1048_v31 = vld [vmem:[#allocation2 + $0x48] sm:$0x1]  ;;  %v9442_v36 = vsel %vm6967_vm5, 4294967295, %v9441_v36  ;;  %vm7620_vm9 = vmor %vm1043_vm1, %vm1168_vm8 }
  0x76   : > { %5979 = vmatprep.subr.bf16.mxu0 %v6229_v3  ;;  %1053 = vst [vmem:[#allocation2 + $0x90] sm:$0x1] %v1052_v28  ;;  %1853 = vst [vmem:[#allocation2 + $0x54] sm:$0x1] %v1852_v29  ;;  %v1049_v32 = vsel %vm6953_vm2, 0, %v1048_v31  ;;  %s6640_s13 = scalar_lea.vmem %s9270_s2, 4096 }
  0x77   : > { %2145 = vst [vmem:[#allocation2 + $0x18] sm:$0x1] %v2144_v30  ;;  %v1848_v33 = vld [vmem:[#allocation2 + $0xc] sm:$0x1]  ;;  %1050 = vst [vmem:[#allocation2 + $0x48] sm:$0x1] %v1049_v32  ;;  %p6641_p7 = scmp.ne.s32.totalorder %s9270_s2, %s6640_s13 }
  0x78   : > { %v1849_v34 = vsel %vm6953_vm2, 0, %v1848_v33  ;;  %v1577_v35 = vld [vmem:[#allocation2 + $0xbc] sm:$0x8]  ;;  %9443 = vst [vmem:[#allocation17_spill] sm:$0xff] %v9442_v36  ;;  %v2020_v37 = vld [vmem:[#allocation2 + $0x80] sm:$0x8]  ;;  %vm7821_vm14 = vmand %vm1441_vm10, %vm1442_vm11 }
  0x79   : > { %5980 = vmatpush3.bf16.msra.mxu0 %v6229_v3  ;;  %1850 = vst [vmem:[#allocation2 + $0xc] sm:$0x1] %v1849_v34  ;;  %v2285_v38 = vld [vmem:[#allocation2 + $0x44] sm:$0x8]  ;;  %v1578_v39 = vsel %vm6967_vm5, 0, %v1577_v35  ;;  %v2021_v40 = vsel %vm6967_vm5, 0, %v2020_v37  ;;  %vm7917_vm15 = vmor %vm1619_vm12, %vm1620_vm13 }
  0x7a   : > { %5981 = vmatprep.subr.bf16.mxu0 %v6230_v5  ;;  %v2286_v41 = vsel %vm6967_vm5, 0, %v2285_v38  ;;  %1579 = vst [vmem:[#allocation2 + $0xbc] sm:$0x8] %v1578_v39  ;;  %2022 = vst [vmem:[#allocation2 + $0x80] sm:$0x8] %v2021_v40  ;;  %p9597_p12 = scmp.ne.s32.totalorder %s9428_s26, 0 }
  0x7b   : > { %2287 = vst [vmem:[#allocation2 + $0x44] sm:$0x8] %v2286_v41  ;;  %v1574_v42 = vld [vmem:[#allocation2 + $0x74] sm:$0x8]  ;;  %v2017_v43 = vld [vmem:[#allocation2 + $0x38] sm:$0x8]  ;;  %vm8053_vm0 = vmand %vm1441_vm10, %vm1619_vm12 }
  0x7c   : > { %v1575_v44 = vsel %vm6967_vm5, 0, %v1574_v42  ;;  %v2018_v45 = vsel %vm6967_vm5, 0, %v2017_v43  ;;  %v1057_v46 = vld [vmem:[#allocation2 + $0x120] sm:$0x1]  ;;  %v1857_v47 = vld [vmem:[#allocation2 + $0xe4] sm:$0x1]  ;;  %p6642_p13 = pnand %p6641_p7, %p9597_p12 }
  0x7d   : > { %5982 = vmatpush3.bf16.msra.mxu0 %v6230_v5  ;;  %1576 = vst [vmem:[#allocation2 + $0x74] sm:$0x8] %v1575_v44  ;;  %2019 = vst [vmem:[#allocation2 + $0x38] sm:$0x8] %v2018_v45  ;;  %v1058_v48 = vsel %vm6953_vm2, 0, %v1057_v46  ;;  %v1858_v49 = vsel %vm6953_vm2, 0, %v1857_v47 }
  0x7e   : > { %5983 = vmatprep.subr.bf16.mxu0 %v6231_v6  ;;  %v2149_v50 = vld [vmem:[#allocation2 + $0xa8] sm:$0x1]  ;;  %1059 = vst [vmem:[#allocation2 + $0x120] sm:$0x1] %v1058_v48  ;;  %1859 = vst [vmem:[#allocation2 + $0xe4] sm:$0x1] %v1858_v49  ;;  %p6643_p0 = pneg %p6642_p13 }
  0x7f   : > { %v2150_v51 = vsel %vm6953_vm2, 0, %v2149_v50  ;;  %v1054_v52 = vld [vmem:[#allocation2 + $0xd8] sm:$0x1]  ;;  %v1854_v53 = vld [vmem:[#allocation2 + $0x9c] sm:$0x1]  ;;  %s6726_s20 = smov [#allocation11]  }
  0x80   : > { %2151 = vst [vmem:[#allocation2 + $0xa8] sm:$0x1] %v2150_v51  ;;  %v2146_v54 = vld [vmem:[#allocation2 + $0x60] sm:$0x1]  ;;  %v1055_v55 = vsel %vm6953_vm2, 0, %v1054_v52  ;;  %v1855_v56 = vsel %vm6953_vm2, 0, %v1854_v53 }
  0x81   : > { %5984 = vmatpush3.bf16.msra.mxu0 %v6231_v6  ;;  %v2147_v57 = vsel %vm6953_vm2, 0, %v2146_v54  ;;  %v1583_v58 = vld [vmem:[#allocation2 + $0x14c] sm:$0x8]  ;;  %1056 = vst [vmem:[#allocation2 + $0xd8] sm:$0x1] %v1055_v55  ;;  %s6644_s17 = sshll.u32 %s6726_s20, 4  ;;  %s6645_s17 = int_to_ptr.vmem [resolvable:$false] %s6644_s17 }
  0x82   : > { %5985 = vmatprep.subr.bf16.mxu0 %v6232_v7  ;;  %1856 = vst [vmem:[#allocation2 + $0x9c] sm:$0x1] %v1855_v56  ;;  %2148 = vst [vmem:[#allocation2 + $0x60] sm:$0x1] %v2147_v57  ;;  %v1584_v59 = vsel %vm6967_vm5, 0, %v1583_v58  ;;  %s6646_s24 = scalar_lea.vmem %s6645_s17, 8192  ;;  %p6647_p5 = scmp.lt.s32.totalorder %s9270_s2, %s6645_s17 }
  0x83   : > { %1585 = vst [vmem:[#allocation2 + $0x14c] sm:$0x8] %v1584_v59  ;;  %v2026_v60 = vld [vmem:[#allocation2 + $0x110] sm:$0x8]  ;;  %v2291_v61 = vld [vmem:[#allocation2 + $0xd4] sm:$0x8]  ;;  %p6648_p10 = scmp.lt.s32.totalorder %s6646_s24, %s6640_s13 }
  0x84   : > { %v1580_v62 = vld [vmem:[#allocation2 + $0x104] sm:$0x8]  ;;  %v2027_v63 = vsel %vm6967_vm5, 0, %v2026_v60  ;;  %v2292_v0 = vsel %vm6967_vm5, 0, %v2291_v61  ;;  %v2023_v2 = vld [vmem:[#allocation2 + $0xc8] sm:$0x8] }
  0x85   : > { %5986 = vmatpush3.bf16.msra.mxu0 %v6232_v7  ;;  %2028 = vst [vmem:[#allocation2 + $0x110] sm:$0x8] %v2027_v63  ;;  %2293 = vst [vmem:[#allocation2 + $0xd4] sm:$0x8] %v2292_v0  ;;  %v1581_v1 = vsel %vm6967_vm5, 0, %v1580_v62  ;;  %v2024_v3 = vsel %vm6967_vm5, 0, %v2023_v2  ;;  %p6649_p2 = por %p6648_p10, %p6647_p5 }
  0x86   : > { %5987 = vmatprep.subr.bf16.mxu0 %v6233_v8  ;;  %1582 = vst [vmem:[#allocation2 + $0x104] sm:$0x8] %v1581_v1  ;;  %v2288_v4 = vld [vmem:[#allocation2 + $0x8c] sm:$0x8]  ;;  %v1063_v5 = vld [vmem:[#allocation2 + $0x1b0] sm:$0x1] }
  0x87   : > { %2025 = vst [vmem:[#allocation2 + $0xc8] sm:$0x8] %v2024_v3  ;;  %v2289_v6 = vsel %vm6967_vm5, 0, %v2288_v4  ;;  %v1064_v7 = vsel %vm6953_vm2, 0, %v1063_v5  ;;  %v2029_v27 = vld [vmem:[#allocation2 + $0x158] sm:$0x8]  ;;  %p6650_p9 = pnand %p6649_p2, %p6643_p0 }
  0x88   : > { %2290 = vst [vmem:[#allocation2 + $0x8c] sm:$0x8] %v2289_v6  ;;  %1065 = vst [vmem:[#allocation2 + $0x1b0] sm:$0x1] %v1064_v7  ;;  %v2030_v28 = vsel %vm6967_vm5, 0, %v2029_v27 }
  0x89   : > { %5988 = vmatpush3.bf16.msra.mxu0 %v6233_v8  ;;  %v1863_v8 = vld [vmem:[#allocation2 + $0x174] sm:$0x1]  ;;  %2031 = vst [vmem:[#allocation2 + $0x158] sm:$0x8] %v2030_v28  ;;  %v2294_v29 = vld [vmem:[#allocation2 + $0x11c] sm:$0x8] }
  0x8a   : > { %v2295_v30 = vsel %vm6967_vm5, 0, %v2294_v29  ;;  %v1069_v31 = vld [vmem:[#allocation2 + $0x240] sm:$0x1]  ;;  %v1869_v32 = vld [vmem:[#allocation2 + $0x204] sm:$0x1]  ;;  %v9340_v29 = vmov 0.0  }
  0x8b   : > { %2296 = vst [vmem:[#allocation2 + $0x11c] sm:$0x8] %v2295_v30  ;;  %v1070_v33 = vsel %vm6953_vm2, 0, %v1069_v31  ;;  %v1870_v34 = vsel %vm6953_vm2, 0, %v1869_v32  ;;  %v2161_v35 = vld [vmem:[#allocation2 + $0x1c8] sm:$0x1]  ;;  %6021 = vmatprep.subr.mxu1 %v9340_v29  ;;  %6053 = vmatprep.mubr.msk.f32.mxu1 %vm6723_vm6, %v9340_v29 }
  0x8c   : > { %5990 = vmatmul.mubr.bf16.vlgmr.msra.gmra.mxu0 %v6235_v9  ;;  %v2155_v9 = vld [vmem:[#allocation2 + $0x138] sm:$0x1]  ;;  %1071 = vst [vmem:[#allocation2 + $0x240] sm:$0x1] %v1070_v33  ;;  %1871 = vst [vmem:[#allocation2 + $0x204] sm:$0x1] %v1870_v34 }
  0x8d   : > { %5993 = vmatprep.mubr.bf16.mxu0 %v6236_v10  ;;  %v1864_v10 = vsel %vm6953_vm2, 0, %v1863_v8  ;;  %v1066_v37 = vld [vmem:[#allocation2 + $0x1f8] sm:$0x1]  ;;  %v2162_v38 = vsel %vm6953_vm2, 0, %v2161_v35  ;;  %v1866_v40 = vld [vmem:[#allocation2 + $0x1bc] sm:$0x1] }
  0x8e   : > { %1865 = vst [vmem:[#allocation2 + $0x174] sm:$0x1] %v1864_v10  ;;  %v1067_v39 = vsel %vm6953_vm2, 0, %v1066_v37  ;;  %2163 = vst [vmem:[#allocation2 + $0x1c8] sm:$0x1] %v2162_v38  ;;  %v1867_v43 = vsel %vm6953_vm2, 0, %v1866_v40 }
  0x8f   : > { %1068 = vst [vmem:[#allocation2 + $0x1f8] sm:$0x1] %v1067_v39  ;;  %v2158_v41 = vld [vmem:[#allocation2 + $0x180] sm:$0x1]  ;;  %v1595_v42 = vld [vmem:[#allocation2 + $0x26c] sm:$0x8] }
  0x90   : > { %v2159_v44 = vsel %vm6953_vm2, 0, %v2158_v41  ;;  %1868 = vst [vmem:[#allocation2 + $0x1bc] sm:$0x1] %v1867_v43  ;;  %v1596_v45 = vsel %vm6967_vm5, 0, %v1595_v42  ;;  %v2038_v46 = vld [vmem:[#allocation2 + $0x230] sm:$0x8] }
  0x91   : > { %2160 = vst [vmem:[#allocation2 + $0x180] sm:$0x1] %v2159_v44  ;;  %1597 = vst [vmem:[#allocation2 + $0x26c] sm:$0x8] %v1596_v45  ;;  %v2039_v47 = vsel %vm6967_vm5, 0, %v2038_v46  ;;  %v849_v30 = vld [vmem:[#allocation8 + $0x78] sm:$0xff] }
  0x92   : > { %v2303_v48 = vld [vmem:[#allocation2 + $0x1f4] sm:$0x8]  ;;  %v1592_v49 = vld [vmem:[#allocation2 + $0x224] sm:$0x8]  ;;  %2040 = vst [vmem:[#allocation2 + $0x230] sm:$0x8] %v2039_v47  ;;  %6022 = vmatpush3.msra.mxu1 %v849_v30 }
  0x93   : > { %v2304_v50 = vsel %vm6967_vm5, 0, %v2303_v48  ;;  %v1593_v51 = vsel %vm6967_vm5, 0, %v1592_v49  ;;  %v2035_v52 = vld [vmem:[#allocation2 + $0x1e8] sm:$0x8]  ;;  %v2300_v54 = vld [vmem:[#allocation2 + $0x1ac] sm:$0x8]  ;;  %6023 = vmatprep.subr.mxu1 %v9340_v29 }
  0x94   : > { %5994 = vmatmul.mubr.bf16.gmra.mxu0 %v6237_v11  ;;  %v2156_v11 = vsel %vm6953_vm2, 0, %v2155_v9  ;;  %2305 = vst [vmem:[#allocation2 + $0x1f4] sm:$0x8] %v2304_v50  ;;  %1594 = vst [vmem:[#allocation2 + $0x224] sm:$0x8] %v1593_v51  ;;  %v2036_v53 = vsel %vm6967_vm5, 0, %v2035_v52 }
  0x95   : > { %5997 = vmatprep.mubr.bf16.mxu0 %v6238_v12  ;;  %v1060_v12 = vld [vmem:[#allocation2 + $0x168] sm:$0x1]  ;;  %2157 = vst [vmem:[#allocation2 + $0x138] sm:$0x1] %v2156_v11  ;;  %2037 = vst [vmem:[#allocation2 + $0x1e8] sm:$0x8] %v2036_v53 }
  0x96   : > { %v1075_v55 = vld [vmem:[#allocation2 + $0x2d0] sm:$0x1]  ;;  %v1875_v56 = vld [vmem:[#allocation2 + $0x294] sm:$0x1]  ;;  %v2301_v57 = vsel %vm6967_vm5, 0, %v2300_v54  ;;  %v847_v48 = vld [vmem:[#allocation8 + $0x68] sm:$0xff] }
  0x97   : > { %v1076_v58 = vsel %vm6953_vm2, 0, %v1075_v55  ;;  %2302 = vst [vmem:[#allocation2 + $0x1ac] sm:$0x8] %v2301_v57  ;;  %v1876_v59 = vsel %vm6953_vm2, 0, %v1875_v56  ;;  %v2167_v60 = vld [vmem:[#allocation2 + $0x258] sm:$0x1] }
  0x98   : > { %1077 = vst [vmem:[#allocation2 + $0x2d0] sm:$0x1] %v1076_v58  ;;  %v1072_v61 = vld [vmem:[#allocation2 + $0x288] sm:$0x1]  ;;  %1877 = vst [vmem:[#allocation2 + $0x294] sm:$0x1] %v1876_v59 }
  0x99   : > { %v2168_v62 = vsel %vm6953_vm2, 0, %v2167_v60  ;;  %v1073_v63 = vsel %vm6953_vm2, 0, %v1072_v61  ;;  %v1872_v0 = vld [vmem:[#allocation2 + $0x24c] sm:$0x1]  ;;  %v2164_v1 = vld [vmem:[#allocation2 + $0x210] sm:$0x1] }
  0x9a   : > { %2169 = vst [vmem:[#allocation2 + $0x258] sm:$0x1] %v2168_v62  ;;  %1074 = vst [vmem:[#allocation2 + $0x288] sm:$0x1] %v1073_v63  ;;  %v1873_v2 = vsel %vm6953_vm2, 0, %v1872_v0  ;;  %v2165_v3 = vsel %vm6953_vm2, 0, %v2164_v1 }
  0x9b   : > { %v1601_v4 = vld [vmem:[#allocation2 + $0x2fc] sm:$0x8]  ;;  %1874 = vst [vmem:[#allocation2 + $0x24c] sm:$0x1] %v1873_v2  ;;  %2166 = vst [vmem:[#allocation2 + $0x210] sm:$0x1] %v2165_v3 }
  0x9c   : > { %5998 = vmatmul.mubr.bf16.gmra.mxu0 %v6239_v13  ;;  %v1860_v13 = vld [vmem:[#allocation2 + $0x12c] sm:$0x1]  ;;  %v1602_v5 = vsel %vm6967_vm5, 0, %v1601_v4  ;;  %v2044_v6 = vld [vmem:[#allocation2 + $0x2c0] sm:$0x8]  ;;  %v848_v38 = vld [vmem:[#allocation8 + $0x70] sm:$0xff] }
  0x9d   : > { %6001 = vmatprep.mubr.bf16.mxu0 %v6240_v14  ;;  %v1061_v14 = vsel %vm6953_vm2, 0, %v1060_v12  ;;  %1603 = vst [vmem:[#allocation2 + $0x2fc] sm:$0x8] %v1602_v5  ;;  %v2309_v7 = vld [vmem:[#allocation2 + $0x284] sm:$0x8]  ;;  %v2045_v8 = vsel %vm6967_vm5, 0, %v2044_v6  ;;  %6024 = vmatpush3.msra.mxu1 %v848_v38 }
  0x9e   : > { %1062 = vst [vmem:[#allocation2 + $0x168] sm:$0x1] %v1061_v14  ;;  %v2310_v9 = vsel %vm6967_vm5, 0, %v2309_v7  ;;  %v1598_v10 = vld [vmem:[#allocation2 + $0x2b4] sm:$0x8]  ;;  %6025 = vmatprep.subr.mxu1 %v9340_v29  ;;  %v846_v51 = vld [vmem:[#allocation8 + $0x60] sm:$0xff] }
  0x9f   : > { %v2041_v11 = vld [vmem:[#allocation2 + $0x278] sm:$0x8]  ;;  %2046 = vst [vmem:[#allocation2 + $0x2c0] sm:$0x8] %v2045_v8  ;;  %2311 = vst [vmem:[#allocation2 + $0x284] sm:$0x8] %v2310_v9  ;;  %6026 = vmatpush3.msra.mxu1 %v847_v48 }
  0xa0   : > { %v1599_v12 = vsel %vm6967_vm5, 0, %v1598_v10  ;;  %v2306_v14 = vld [vmem:[#allocation2 + $0x23c] sm:$0x8]  ;;  %v2170_v27 = vld [vmem:[#allocation2 + $0x2a0] sm:$0x1]  ;;  %6027 = vmatprep.subr.mxu1 %v9340_v29  ;;  %v844_v60 = vld [vmem:[#allocation8 + $0x50] sm:$0xff] }
  0xa1   : > { %1600 = vst [vmem:[#allocation2 + $0x2b4] sm:$0x8] %v1599_v12  ;;  %v1607_v28 = vld [vmem:[#allocation2 + $0x38c] sm:$0x8]  ;;  %v2171_v31 = vsel %vm6953_vm2, 0, %v2170_v27  ;;  %v845_v53 = vld [vmem:[#allocation8 + $0x58] sm:$0xff]  ;;  %6028 = vmatpush3.msra.mxu1 %v846_v51 }
  0xa2   : > { %v1608_v32 = vsel %vm6967_vm5, 0, %v1607_v28  ;;  %2172 = vst [vmem:[#allocation2 + $0x2a0] sm:$0x1] %v2171_v31  ;;  %v2050_v33 = vld [vmem:[#allocation2 + $0x350] sm:$0x8]  ;;  %6029 = vmatprep.subr.mxu1 %v9340_v29  ;;  %v843_v1 = vld [vmem:[#allocation8 + $0x48] sm:$0xff] }
  0xa3   : > { %1609 = vst [vmem:[#allocation2 + $0x38c] sm:$0x8] %v1608_v32  ;;  %v2051_v34 = vsel %vm6967_vm5, 0, %v2050_v33  ;;  %v2315_v35 = vld [vmem:[#allocation2 + $0x314] sm:$0x8]  ;;  %6030 = vmatpush3.msra.mxu1 %v845_v53  ;;  %v837_v38 = vld [vmem:[#allocation8 + $0x18] sm:$0xff] }
  0xa4   : > { %6002 = vmatmul.mubr.bf16.gmra.mxu0 %v6241_v15  ;;  %v1861_v15 = vsel %vm6953_vm2, 0, %v1860_v13  ;;  %v2042_v13 = vsel %vm6967_vm5, 0, %v2041_v11  ;;  %v1604_v37 = vld [vmem:[#allocation2 + $0x344] sm:$0x8]  ;;  %2052 = vst [vmem:[#allocation2 + $0x350] sm:$0x8] %v2051_v34  ;;  %6031 = vmatprep.subr.mxu1 %v9340_v29 }
  0xa5   : > { %6005 = vmatprep.mubr.bf16.mxu0 %v6242_v16  ;;  %v2152_v16 = vld [vmem:[#allocation2 + $0xf0] sm:$0x1]  ;;  %1862 = vst [vmem:[#allocation2 + $0x12c] sm:$0x1] %v1861_v15  ;;  %2043 = vst [vmem:[#allocation2 + $0x278] sm:$0x8] %v2042_v13  ;;  %6032 = vmatpush3.msra.mxu1 %v844_v60 }
  0xa6   : > { %v1081_v15 = vld [vmem:[#allocation2 + $0x360] sm:$0x1]  ;;  %v2316_v39 = vsel %vm6967_vm5, 0, %v2315_v35  ;;  %v1605_v40 = vsel %vm6967_vm5, 0, %v1604_v37  ;;  %v2047_v41 = vld [vmem:[#allocation2 + $0x308] sm:$0x8]  ;;  %6033 = vmatprep.subr.mxu1 %v9340_v29 }
  0xa7   : > { %2317 = vst [vmem:[#allocation2 + $0x314] sm:$0x8] %v2316_v39  ;;  %1606 = vst [vmem:[#allocation2 + $0x344] sm:$0x8] %v1605_v40  ;;  %v2312_v42 = vld [vmem:[#allocation2 + $0x2cc] sm:$0x8]  ;;  %6034 = vmatpush3.msra.mxu1 %v843_v1 }
  0xa8   : > { %v1087_v43 = vld [vmem:[#allocation2 + $0x3f0] sm:$0x1]  ;;  %v2048_v44 = vsel %vm6967_vm5, 0, %v2047_v41  ;;  %v2313_v45 = vsel %vm6967_vm5, 0, %v2312_v42  ;;  %v1887_v47 = vld [vmem:[#allocation2 + $0x3b4] sm:$0x1]  ;;  %6035 = vmatprep.subr.mxu1 %v9340_v29 }
  0xa9   : > { %2049 = vst [vmem:[#allocation2 + $0x308] sm:$0x8] %v2048_v44  ;;  %2314 = vst [vmem:[#allocation2 + $0x2cc] sm:$0x8] %v2313_v45  ;;  %v1088_v46 = vsel %vm6953_vm2, 0, %v1087_v43  ;;  %v1888_v49 = vsel %vm6953_vm2, 0, %v1887_v47 }
  0xaa   : > { %1089 = vst [vmem:[#allocation2 + $0x3f0] sm:$0x1] %v1088_v46  ;;  %v2179_v50 = vld [vmem:[#allocation2 + $0x378] sm:$0x1]  ;;  %1889 = vst [vmem:[#allocation2 + $0x3b4] sm:$0x1] %v1888_v49 }
  0xab   : > { %v2180_v52 = vsel %vm6953_vm2, 0, %v2179_v50  ;;  %v1084_v54 = vld [vmem:[#allocation2 + $0x3a8] sm:$0x1]  ;;  %v1884_v55 = vld [vmem:[#allocation2 + $0x36c] sm:$0x1]  ;;  %v842_v11 = vld [vmem:[#allocation8 + $0x40] sm:$0xff] }
  0xac   : > { %6006 = vmatmul.mubr.bf16.gmra.mxu0 %v6243_v17  ;;  %v2153_v17 = vsel %vm6953_vm2, 0, %v2152_v16  ;;  %v2307_v16 = vsel %vm6967_vm5, 0, %v2306_v14  ;;  %2181 = vst [vmem:[#allocation2 + $0x378] sm:$0x1] %v2180_v52  ;;  %v2176_v56 = vld [vmem:[#allocation2 + $0x330] sm:$0x1]  ;;  %6036 = vmatpush3.msra.mxu1 %v842_v11 }
  0xad   : > { %6009 = vmatprep.mubr.bf16.mxu0 %v6244_v18  ;;  %v1589_v18 = vld [vmem:[#allocation2 + $0x1dc] sm:$0x8]  ;;  %2154 = vst [vmem:[#allocation2 + $0xf0] sm:$0x1] %v2153_v17  ;;  %v1082_v17 = vsel %vm6953_vm2, 0, %v1081_v15  ;;  %v1085_v57 = vsel %vm6953_vm2, 0, %v1084_v54  ;;  %6037 = vmatprep.subr.mxu1 %v9340_v29 }
  0xae   : > { %2308 = vst [vmem:[#allocation2 + $0x23c] sm:$0x8] %v2307_v16  ;;  %1083 = vst [vmem:[#allocation2 + $0x360] sm:$0x1] %v1082_v17  ;;  %v1885_v58 = vsel %vm6953_vm2, 0, %v1884_v55  ;;  %v2177_v59 = vsel %vm6953_vm2, 0, %v2176_v56 }
  0xaf   : > { %1086 = vst [vmem:[#allocation2 + $0x3a8] sm:$0x1] %v1085_v57  ;;  %1886 = vst [vmem:[#allocation2 + $0x36c] sm:$0x1] %v1885_v58  ;;  %v1613_v61 = vld [vmem:[#allocation2 + $0x41c] sm:$0x8] }
  0xb0   : > { %2178 = vst [vmem:[#allocation2 + $0x330] sm:$0x1] %v2177_v59  ;;  %v1614_v62 = vsel %vm6967_vm5, 0, %v1613_v61  ;;  %v2056_v63 = vld [vmem:[#allocation2 + $0x3e0] sm:$0x8]  ;;  %v841_v15 = vld [vmem:[#allocation8 + $0x38] sm:$0xff] }
  0xb1   : > { %v2321_v0 = vld [vmem:[#allocation2 + $0x3a4] sm:$0x8]  ;;  %1615 = vst [vmem:[#allocation2 + $0x41c] sm:$0x8] %v1614_v62  ;;  %v2057_v2 = vsel %vm6967_vm5, 0, %v2056_v63  ;;  %6038 = vmatpush3.msra.mxu1 %v841_v15  ;;  %v839_v34 = vld [vmem:[#allocation8 + $0x28] sm:$0xff] }
  0xb2   : > { %v2322_v3 = vsel %vm6967_vm5, 0, %v2321_v0  ;;  %2058 = vst [vmem:[#allocation2 + $0x3e0] sm:$0x8] %v2057_v2  ;;  %v1610_v4 = vld [vmem:[#allocation2 + $0x3d4] sm:$0x8]  ;;  %6039 = vmatprep.subr.mxu1 %v9340_v29  ;;  %v838_v37 = vld [vmem:[#allocation8 + $0x20] sm:$0xff] }
  0xb3   : > { %2323 = vst [vmem:[#allocation2 + $0x3a4] sm:$0x8] %v2322_v3  ;;  %v2053_v5 = vld [vmem:[#allocation2 + $0x398] sm:$0x8]  ;;  %v1611_v6 = vsel %vm6967_vm5, 0, %v1610_v4  ;;  %v836_v39 = vld [vmem:[#allocation8 + $0x10] sm:$0xff] }
  0xb4   : > { %6010 = vmatmul.mubr.bf16.gmra.mxu0 %v6245_v19  ;;  %v2032_v19 = vld [vmem:[#allocation2 + $0x1a0] sm:$0x8]  ;;  %v2054_v7 = vsel %vm6967_vm5, 0, %v2053_v5  ;;  %v2318_v8 = vld [vmem:[#allocation2 + $0x35c] sm:$0x8]  ;;  %v835_v40 = vld [vmem:[#allocation8 + $0x8] sm:$0xff] }
  0xb5   : > { %6013 = vmatprep.mubr.bf16.mxu0 %v6246_v20  ;;  %v1590_v20 = vsel %vm6967_vm5, 0, %v1589_v18  ;;  %v1881_v18 = vld [vmem:[#allocation2 + $0x324] sm:$0x1]  ;;  %1612 = vst [vmem:[#allocation2 + $0x3d4] sm:$0x8] %v1611_v6  ;;  %v2319_v9 = vsel %vm6967_vm5, 0, %v2318_v8 }
  0xb6   : > { %1591 = vst [vmem:[#allocation2 + $0x1dc] sm:$0x8] %v1590_v20  ;;  %v1078_v20 = vld [vmem:[#allocation2 + $0x318] sm:$0x1]  ;;  %2055 = vst [vmem:[#allocation2 + $0x398] sm:$0x8] %v2054_v7 }
  0xb7   : > { %v1893_v10 = vld [vmem:[#allocation2 + $0x444] sm:$0x1]  ;;  %2320 = vst [vmem:[#allocation2 + $0x35c] sm:$0x8] %v2319_v9  ;;  %v2185_v13 = vld [vmem:[#allocation2 + $0x408] sm:$0x1] }
  0xb8   : > { %v1894_v12 = vsel %vm6953_vm2, 0, %v1893_v10  ;;  %v1090_v14 = vld [vmem:[#allocation2 + $0x438] sm:$0x1]  ;;  %v2186_v16 = vsel %vm6953_vm2, 0, %v2185_v13  ;;  %v1616_v27 = vld [vmem:[#allocation2 + $0x464] sm:$0x8] }
  0xb9   : > { %1895 = vst [vmem:[#allocation2 + $0x444] sm:$0x1] %v1894_v12  ;;  %v1091_v17 = vsel %vm6953_vm2, 0, %v1090_v14  ;;  %2187 = vst [vmem:[#allocation2 + $0x408] sm:$0x1] %v2186_v16  ;;  %v1617_v31 = vsel %vm6967_vm5, 0, %v1616_v27 }
  0xba   : > { %1092 = vst [vmem:[#allocation2 + $0x438] sm:$0x1] %v1091_v17  ;;  %v2059_v28 = vld [vmem:[#allocation2 + $0x428] sm:$0x8]  ;;  %1618 = vst [vmem:[#allocation2 + $0x464] sm:$0x8] %v1617_v31 }
  0xbb   : > { %v2060_v32 = vsel %vm6967_vm5, 0, %v2059_v28  ;;  %v2324_v33 = vld [vmem:[#allocation2 + $0x3ec] sm:$0x8]  ;;  %v834_v41 = vld [vmem:[#allocation8] sm:$0xff] }
  0xbc   : > { %6014 = vmatmul.mubr.bf16.gmra.mxu0 %v6247_v21  ;;  %v2033_v21 = vsel %vm6967_vm5, 0, %v2032_v19  ;;  %v2173_v19 = vld [vmem:[#allocation2 + $0x2e8] sm:$0x1]  ;;  %2061 = vst [vmem:[#allocation2 + $0x428] sm:$0x8] %v2060_v32  ;;  %v2325_v35 = vsel %vm6967_vm5, 0, %v2324_v33 }
  0xbd   : > { %6017 = vmatprep.mubr.bf16.mxu0 %v6248_v22  ;;  %2034 = vst [vmem:[#allocation2 + $0x1a0] sm:$0x8] %v2033_v21  ;;  %v2297_v22 = vld [vmem:[#allocation2 + $0x164] sm:$0x8]  ;;  %v1882_v21 = vsel %vm6953_vm2, 0, %v1881_v18 }
  0xbe   : > { %v2298_v24 = vsel %vm6967_vm5, 0, %v2297_v22  ;;  %v2174_v22 = vsel %vm6953_vm2, 0, %v2173_v19  ;;  %1883 = vst [vmem:[#allocation2 + $0x324] sm:$0x1] %v1882_v21  ;;  %v1890_v18 = vld [vmem:[#allocation2 + $0x3fc] sm:$0x1] }
  0xbf   : > { %2299 = vst [vmem:[#allocation2 + $0x164] sm:$0x8] %v2298_v24  ;;  %2175 = vst [vmem:[#allocation2 + $0x2e8] sm:$0x1] %v2174_v22  ;;  %v1878_v24 = vld [vmem:[#allocation2 + $0x2dc] sm:$0x1] }
  0xc0   : > { %v2182_v19 = vld [vmem:[#allocation2 + $0x3c0] sm:$0x1]  ;;  %v2062_v22 = vld [vmem:[#allocation2 + $0x470] sm:$0x8]  ;;  %2326 = vst [vmem:[#allocation2 + $0x3ec] sm:$0x8] %v2325_v35 }
  0xc1   : > { %v2183_v21 = vsel %vm6953_vm2, 0, %v2182_v19 }
  0xc2   : > { %2184 = vst [vmem:[#allocation2 + $0x3c0] sm:$0x1] %v2183_v21 }
  0xc4   : > { %6018 = vmatmul.mubr.bf16.gmra.mxu0 %v6249_v23  ;;  %v1586_v23 = vld [vmem:[#allocation2 + $0x194] sm:$0x8] }
  0xc5   : > { %v1587_v26 = vsel %vm6967_vm5, 0, %v1586_v23  ;;  %v1079_v23 = vsel %vm6953_vm2, 0, %v1078_v20  ;;  %v1891_v20 = vsel %vm6953_vm2, 0, %v1890_v18 }
  0xc6   : > { %1588 = vst [vmem:[#allocation2 + $0x194] sm:$0x8] %v1587_v26  ;;  %1080 = vst [vmem:[#allocation2 + $0x318] sm:$0x1] %v1079_v23  ;;  %v1879_v26 = vsel %vm6953_vm2, 0, %v1878_v24  ;;  %v2063_v23 = vsel %vm6967_vm5, 0, %v2062_v22 }
  0xc7   : > { %1880 = vst [vmem:[#allocation2 + $0x2dc] sm:$0x1] %v1879_v26  ;;  %1892 = vst [vmem:[#allocation2 + $0x3fc] sm:$0x1] %v1891_v20  ;;  %v840_v24 = vld [vmem:[#allocation8 + $0x30] sm:$0xff] }
  0xc8   : > { %2064 = vst [vmem:[#allocation2 + $0x470] sm:$0x8] %v2063_v23  ;;  %v2327_v26 = vld [vmem:[#allocation2 + $0x434] sm:$0x8]  ;;  %6040 = vmatpush3.msra.mxu1 %v840_v24 }
  0xc9   : > { %v2328_v30 = vsel %vm6967_vm5, 0, %v2327_v26  ;;  %6041 = vmatprep.subr.mxu1 %v9340_v29 }
  0xca   : > { %2329 = vst [vmem:[#allocation2 + $0x434] sm:$0x8] %v2328_v30  ;;  %6042 = vmatpush3.msra.mxu1 %v839_v34 }
  0xcb   : > { %6043 = vmatprep.subr.mxu1 %v9340_v29 }
  0xcc   : > { %6044 = vmatpush3.msra.mxu1 %v838_v37 }
  0xcd   : > { %6045 = vmatprep.subr.mxu1 %v9340_v29 }
  0xce   : > { %6046 = vmatpush3.msra.mxu1 %v837_v38 }
  0xcf   : > { %6047 = vmatprep.subr.mxu1 %v9340_v29 }
  0xd0   : > { %6048 = vmatpush3.msra.mxu1 %v836_v39 }
  0xd1   : > { %6049 = vmatprep.subr.mxu1 %v9340_v29 }
  0xd2   : > { %6050 = vmatpush3.msra.mxu1 %v835_v40 }
  0xd3   : > { %6051 = vmatprep.subr.mxu1 %v9340_v29 }
  0xd4   : > { %6052 = vmatpush3.msra.mxu1 %v834_v41 }
 0x14c   : > { %v7163_v42 = vpop.f32.mrf.mxu0 }
 0x14d   : > { %v763_v50 = vmul.f32 %v7163_v42, %v7163_v42 }
 0x14e   : > { %v7165_v43 = vpop.f32.mrf.mxu0 }
 0x14f   : > { %v761_v46 = vmul.f32 %v7165_v43, %v7165_v43 }
 0x150   : > { %v7167_v44 = vpop.f32.mrf.mxu0 }
 0x151   : > { %v764_v54 = vmul.f32 %v7167_v44, %v7167_v44 }
 0x152   : > { %v7169_v45 = vpop.f32.mrf.mxu0 }
 0x153   : > { %v724_v47 = vadd.f32 %v7169_v45, %v7165_v43  ;;  %v762_v48 = vmul.f32 %v7169_v45, %v7169_v45 }
 0x154   : > { %v7177_v49 = vpop.f32.mrf.mxu0 }
 0x155   : > { %v793_v51 = vadd.f32 %v762_v48, %v761_v46  ;;  %v725_v52 = vadd.f32 %v7163_v42, %v724_v47  ;;  %v767_v2 = vmul.f32 %v7177_v49, %v7177_v49 }
 0x156   : > { %v7182_v53 = vpop.f32.mrf.mxu0 }
 0x157   : > { %v726_v55 = vadd.f32 %v7167_v44, %v725_v52  ;;  %v794_v56 = vadd.f32 %v793_v51, %v763_v50  ;;  %v765_v59 = vmul.f32 %v7182_v53, %v7182_v53 }
 0x158   : > { %v7187_v57 = vpop.f32.mrf.mxu0 }
 0x159   : > { %v727_v58 = vadd.f32 %v726_v55, %v7182_v53  ;;  %v795_v60 = vadd.f32 %v794_v56, %v764_v54  ;;  %v768_v6 = vmul.f32 %v7187_v57, %v7187_v57 }
 0x15a   : > { %v7192_v61 = vpop.f32.mrf.mxu0 }
 0x15b   : > { %v796_v62 = vadd.f32 %v795_v60, %v765_v59  ;;  %v728_v63 = vadd.f32 %v727_v58, %v7192_v61  ;;  %v766_v0 = vmul.f32 %v7192_v61, %v7192_v61 }
 0x15c   : > { %v7197_v1 = vpop.f32.mrf.mxu0 }
 0x15d   : > { %v797_v3 = vadd.f32 %v796_v62, %v766_v0  ;;  %v729_v4 = vadd.f32 %v7177_v49, %v728_v63  ;;  %v771_v18 = vmul.f32 %v7197_v1, %v7197_v1 }
 0x15e   : > { %v7202_v5 = vpop.f32.mrf.mxu0 }
 0x15f   : > { %v730_v7 = vadd.f32 %v7187_v57, %v729_v4  ;;  %v798_v8 = vadd.f32 %v797_v3, %v767_v2  ;;  %v769_v11 = vmul.f32 %v7202_v5, %v7202_v5 }
 0x160   : > { %v7207_v9 = vpop.f32.mrf.mxu0 }
 0x161   : > { %v731_v10 = vadd.f32 %v730_v7, %v7202_v5  ;;  %v799_v12 = vadd.f32 %v798_v8, %v768_v6  ;;  %v772_v22 = vmul.f32 %v7207_v9, %v7207_v9 }
 0x162   : > { %v7212_v13 = vpop.f32.mrf.mxu0 }
 0x163   : > { %v800_v14 = vadd.f32 %v799_v12, %v769_v11  ;;  %v732_v15 = vadd.f32 %v731_v10, %v7212_v13  ;;  %v770_v16 = vmul.f32 %v7212_v13, %v7212_v13 }
 0x164   : > { %v7217_v17 = vpop.f32.mrf.mxu0 }
 0x165   : > { %v801_v19 = vadd.f32 %v800_v14, %v770_v16  ;;  %v733_v20 = vadd.f32 %v7197_v1, %v732_v15  ;;  %v775_v37 = vmul.f32 %v7217_v17, %v7217_v17 }
 0x166   : > { %v7222_v21 = vpop.f32.mrf.mxu0 }
 0x167   : > { %v734_v23 = vadd.f32 %v7207_v9, %v733_v20  ;;  %v802_v24 = vadd.f32 %v801_v19, %v771_v18  ;;  %v773_v28 = vmul.f32 %v7222_v21, %v7222_v21 }
 0x168   : > { %v7227_v26 = vpop.f32.mrf.mxu0 }
 0x169   : > { %v735_v27 = vadd.f32 %v734_v23, %v7222_v21  ;;  %v803_v30 = vadd.f32 %v802_v24, %v772_v22  ;;  %v776_v41 = vmul.f32 %v7227_v26, %v7227_v26 }
 0x16a   : > { %v7232_v31 = vpop.f32.mrf.mxu0 }
 0x16b   : > { %v804_v32 = vadd.f32 %v803_v30, %v773_v28  ;;  %v736_v33 = vadd.f32 %v735_v27, %v7232_v31  ;;  %v774_v34 = vmul.f32 %v7232_v31, %v7232_v31 }
 0x16c   : > { %v7237_v35 = vpop.f32.mrf.mxu0 }
 0x16d   : > { %v805_v38 = vadd.f32 %v804_v32, %v774_v34  ;;  %v737_v39 = vadd.f32 %v7217_v17, %v736_v33  ;;  %v779_v60 = vmul.f32 %v7237_v35, %v7237_v35 }
 0x16e   : > { %v7242_v40 = vpop.f32.mrf.mxu0 }
 0x16f   : > { %v738_v46 = vadd.f32 %v7227_v26, %v737_v39  ;;  %v806_v47 = vadd.f32 %v805_v38, %v775_v37  ;;  %v777_v51 = vmul.f32 %v7242_v40, %v7242_v40 }
 0x170   : > { %v7247_v48 = vpop.f32.mrf.mxu0 }
 0x171   : > { %v739_v50 = vadd.f32 %v738_v46, %v7242_v40  ;;  %v807_v52 = vadd.f32 %v806_v47, %v776_v41  ;;  %v780_v2 = vmul.f32 %v7247_v48, %v7247_v48 }
 0x172   : > { %v7252_v54 = vpop.f32.mrf.mxu0 }
 0x173   : > { %v808_v55 = vadd.f32 %v807_v52, %v777_v51  ;;  %v740_v56 = vadd.f32 %v739_v50, %v7252_v54  ;;  %v778_v58 = vmul.f32 %v7252_v54, %v7252_v54 }
 0x174   : > { %v7257_v59 = vpop.f32.mrf.mxu0 }
 0x175   : > { %v809_v62 = vadd.f32 %v808_v55, %v778_v58  ;;  %v741_v63 = vadd.f32 %v7237_v35, %v740_v56  ;;  %v783_v18 = vmul.f32 %v7257_v59, %v7257_v59 }
 0x176   : > { %v7262_v0 = vpop.f32.mrf.mxu0 }
 0x177   : > { %v742_v3 = vadd.f32 %v7247_v48, %v741_v63  ;;  %v810_v4 = vadd.f32 %v809_v62, %v779_v60  ;;  %v781_v8 = vmul.f32 %v7262_v0, %v7262_v0 }
 0x178   : > { %v7267_v6 = vpop.f32.mrf.mxu0 }
 0x179   : > { %v743_v7 = vadd.f32 %v742_v3, %v7262_v0  ;;  %v811_v10 = vadd.f32 %v810_v4, %v780_v2  ;;  %v784_v23 = vmul.f32 %v7267_v6, %v7267_v6 }
 0x17a   : > { %v7272_v11 = vpop.f32.mrf.mxu0 }
 0x17b   : > { %v812_v12 = vadd.f32 %v811_v10, %v781_v8  ;;  %v744_v14 = vadd.f32 %v743_v7, %v7272_v11  ;;  %v782_v15 = vmul.f32 %v7272_v11, %v7272_v11 }
 0x17c   : > { %v7277_v16 = vpop.f32.mrf.mxu0 }
 0x17d   : > { %v813_v19 = vadd.f32 %v812_v12, %v782_v15  ;;  %v745_v20 = vadd.f32 %v7257_v59, %v744_v14  ;;  %v787_v46 = vmul.f32 %v7277_v16, %v7277_v16 }
 0x17e   : > { %v7282_v22 = vpop.f32.mrf.mxu0 }
 0x17f   : > { %v746_v24 = vadd.f32 %v7267_v6, %v745_v20  ;;  %v814_v27 = vadd.f32 %v813_v19, %v783_v18  ;;  %v785_v32 = vmul.f32 %v7282_v22, %v7282_v22 }
 0x180   : > { %v7287_v28 = vpop.f32.mrf.mxu0 }
 0x181   : > { %v747_v30 = vadd.f32 %v746_v24, %v7282_v22  ;;  %v815_v33 = vadd.f32 %v814_v27, %v784_v23  ;;  %v788_v52 = vmul.f32 %v7287_v28, %v7287_v28  ;;  %v830_v27 = vlaneseq }
 0x182   : > { %v7292_v34 = vpop.f32.mrf.mxu0 }
 0x183   : > { %v816_v37 = vadd.f32 %v815_v33, %v785_v32  ;;  %v748_v38 = vadd.f32 %v747_v30, %v7292_v34  ;;  %v786_v39 = vmul.f32 %v7292_v34, %v7292_v34 }
 0x184   : > { %v7297_v41 = vpop.f32.mrf.mxu0 }
 0x185   : > { %v817_v47 = vadd.f32 %v816_v37, %v786_v39  ;;  %v749_v50 = vadd.f32 %v7277_v16, %v748_v38  ;;  %v791_v8 = vmul.f32 %v7297_v41, %v7297_v41  ;;  %v7323_v38 = vshrl.u32 %v830_v27, 7  ;;  %v6260_v27 = vld [vmem:[#allocation9 + $0x58] sm:$0xff]  }
 0x186   : > { %v7302_v51 = vpop.f32.mrf.mxu0 }
 0x187   : > { %v750_v55 = vadd.f32 %v7287_v28, %v749_v50  ;;  %v818_v56 = vadd.f32 %v817_v47, %v787_v46  ;;  %v789_v62 = vmul.f32 %v7302_v51, %v7302_v51  ;;  %9444 = vst [vmem:[#allocation18_spill] sm:$0xff] %v7323_v38  ;;  %vm832_vm7 = vcmp.eq.s32.totalorder %v7323_v38, 0 }
 0x188   : > { %v7307_v58 = vpop.f32.mrf.mxu0 }
 0x189   : > { %v751_v60 = vadd.f32 %v750_v55, %v7302_v51  ;;  %v819_v63 = vadd.f32 %v818_v56, %v788_v52  ;;  %v792_v14 = vmul.f32 %v7307_v58, %v7307_v58  ;;  %v6250_v56 = vld [vmem:[#allocation9 + $0x78] sm:$0xff]  }
 0x18a   : > { %v7312_v2 = vpop.f32.mrf.mxu0  ;;  %5484 = vmatprep.subr.bf16.mxu1 %v6250_v56  ;;  %v6267_v56 = vld [vmem:[#allocation9 + $0xa8] sm:$0xff]  }
 0x18b   : > { %v820_v3 = vadd.f32 %v819_v63, %v789_v62  ;;  %v752_v4 = vadd.f32 %v751_v60, %v7312_v2  ;;  %v790_v7 = vmul.f32 %v7312_v2, %v7312_v2  ;;  %v6251_v60 = vld [vmem:[#allocation9 + $0x38] sm:$0xff]   ;;  %v6252_v62 = vld [vmem:[#allocation9 + $0x70] sm:$0xff]  }
 0x18c   : > { %v6253_v63 = vld [vmem:[#allocation9 + $0x30] sm:$0xff]  }
 0x18d   : > { %v753_v10 = vadd.f32 %v7297_v41, %v752_v4  ;;  %v821_v12 = vadd.f32 %v820_v3, %v790_v7  ;;  %v6254_v3 = vld [vmem:[#allocation9 + $0x68] sm:$0xff]  }
 0x18e   : > { %v6255_v7 = vld [vmem:[#allocation9 + $0x28] sm:$0xff]  }
 0x18f   : > { %v754_v15 = vadd.f32 %v7307_v58, %v753_v10  ;;  %v822_v18 = vadd.f32 %v821_v12, %v791_v8 }
 0x191   : > { %v755_v19 = vrot.slane %v754_v15, 4  ;;  %v823_v20 = vadd.f32 %v822_v18, %v792_v14  ;;  %v6256_v14 = vld [vmem:[#allocation9 + $0x60] sm:$0xff]  }
 0x193   : > { %v756_v23 = vadd.f32 %v755_v19, %v754_v15  ;;  %v824_v24 = vrot.slane %v823_v20, 4  ;;  %v6257_v15 = vld [vmem:[#allocation9 + $0x20] sm:$0xff]   ;;  %v6258_v19 = vld [vmem:[#allocation9 + $0xf8] sm:$0xff]  }
 0x194   : > { %5596 = vmatprep.subr.bf16.mxu0 %v6258_v19  ;;  %v6278_v19 = vld [vmem:[#allocation9 + $0x98] sm:$0xff]  }
 0x195   : > { %v757_v30 = vrot.slane %v756_v23, 2  ;;  %v825_v32 = vadd.f32 %v824_v24, %v823_v20  ;;  %v6259_v20 = vld [vmem:[#allocation9 + $0xb8] sm:$0xff]  }
 0x196   : > { %5597 = vmatpush3.bf16.msra.mxu0 %v6259_v20 }
 0x197   : > { %v758_v33 = vadd.f32 %v757_v30, %v756_v23  ;;  %v826_v37 = vrot.slane %v825_v32, 2  ;;  %v6724_v23 = vmov 0   ;;  %v6261_v30 = vld [vmem:[#allocation9 + $0x18] sm:$0xff]  }
 0x198   : > { %1040 = vst [vmem:[#allocation2] sm:$0xf] %v6724_v23  ;;  %1041 = vst [vmem:[#allocation2 + $0x24] sm:$0xf] %v6724_v23 }
 0x199   : > { %v759_v39 = vrot.slane %v758_v33, 1  ;;  %v827_v46 = vadd.f32 %v826_v37, %v825_v32  ;;  %1504 = vst [vmem:[#allocation2 + $0x4] sm:$0xf] %v6724_v23  ;;  %1505 = vst [vmem:[#allocation2 + $0x28] sm:$0xf] %v6724_v23  ;;  %v6263_v37 = vld [vmem:[#allocation9 + $0xb0] sm:$0xff]  }
 0x19a   : > { %1566 = vst [vmem:[#allocation2 + $0x8] sm:$0xf] %v6724_v23  ;;  %1567 = vst [vmem:[#allocation2 + $0x2c] sm:$0xf] %v6724_v23 }
 0x19b   : > { %v828_v47 = vrot.slane %v827_v46, 1  ;;  %v760_v50 = vadd.f32 %v759_v39, %v758_v33  ;;  %2141 = vst [vmem:[#allocation2 + $0x450] sm:$0xf] %v6724_v23  ;;  %2142 = vst [vmem:[#allocation2 + $0x474] sm:$0xf] %v6724_v23  ;;  %v6262_v33 = vld [vmem:[#allocation9 + $0xf0] sm:$0xff]  }
 0x19c   : > { %2251 = vst [vmem:[#allocation2 + $0x454] sm:$0xf] %v6724_v23  ;;  %2252 = vst [vmem:[#allocation2 + $0x478] sm:$0xf] %v6724_v23  ;;  %5598 = vmatprep.subr.bf16.mxu0 %v6262_v33  ;;  %v6264_v39 = vld [vmem:[#allocation9 + $0x50] sm:$0xff]  }
 0x19d   : > { %v829_v52 = vadd.f32 %v828_v47, %v827_v46  ;;  %2283 = vst [vmem:[#allocation2 + $0x458] sm:$0xf] %v6724_v23  ;;  %2284 = vst [vmem:[#allocation2 + $0x47c] sm:$0xf] %v6724_v23  ;;  %5599 = vmatpush3.bf16.msra.mxu0 %v6263_v37  ;;  %v6265_v46 = vld [vmem:[#allocation9 + $0x10] sm:$0xff]  }
 0x19e   : > { %v6725_v47 = vmov 1966171168   ;;  %v722_v37 = vld [vmem:[%s9328_s3] sm:$0x1] }
 0x19f   : > { %v833_v55 = vsel %vm832_vm7, %v760_v50, %v829_v52  ;;  %v930_v50 = vunpack.c.l.s4 %v6725_v47  ;;  %v6266_v52 = vld [vmem:[#allocation9 + $0xe8] sm:$0xff]  }
 0x1a0   : > { %6054 = vmatmul.mubr.f32.vlgmr.msra.gmra.mxu1 %v833_v55  ;;  %v1045_v55 = vld [vmem:[#allocation2] sm:$0x1]  ;;  %5600 = vmatprep.subr.bf16.mxu0 %v6266_v52  ;;  %v6284_v52 = vld [vmem:[#allocation9 + $0x88] sm:$0xff]  }
 0x1a1   : > { %5485 = vmatpush3.bf16.msra.mxu1 %v6251_v60  ;;  %v1046_v60 = vsel %vm6953_vm2, 0, %v1045_v55  ;;  %5601 = vmatpush3.bf16.msra.mxu0 %v6267_v56  ;;  %v1571_v33 = vld [vmem:[#allocation2 + $0x2c] sm:$0x8]  ;;  %v6281_v56 = vld [vmem:[#allocation9 + $0x178] sm:$0xff]  }
 0x1a2   : > { %5486 = vmatprep.subr.bf16.mxu1 %v6252_v62  ;;  %v6268_v62 = vld [vmem:[#allocation9 + $0x48] sm:$0xff]   ;;  %1047 = vst [vmem:[#allocation2] sm:$0x1] %v1046_v60  ;;  %v6283_v60 = vld [vmem:[#allocation9 + $0x138] sm:$0xff]  }
 0x1a5   : > { %5487 = vmatpush3.bf16.msra.mxu1 %v6253_v63  ;;  %v6269_v63 = vld [vmem:[#allocation9 + $0x8] sm:$0xff]  }
 0x1a6   : > { %5488 = vmatprep.subr.bf16.mxu1 %v6254_v3  ;;  %v931_v3 = vunpack.c.0.s8 %v930_v50  ;;  %v6282_v50 = vld [vmem:[#allocation9 + $0xc8] sm:$0xff]  }
 0x1a9   : > { %5489 = vmatpush3.bf16.msra.mxu1 %v6255_v7  ;;  %v6271_v7 = vld [vmem:[#allocation9 + $0xa0] sm:$0xff]  }
 0x1aa   : > { %5490 = vmatprep.subr.bf16.mxu1 %v6256_v14  ;;  %v7336_v14 = vsub.s32 %v931_v3, %v7323_v38  ;;  %v6275_v20 = vld [vmem:[#allocation2] ss:$36 sps:$4 sm:$0xff]  }
 0x1ab   : > { %v6286_v3 = vld [vmem:[#allocation9 + $0x80] sm:$0xff]  }
 0x1ac   : > { %9445 = vst [vmem:[#allocation19_spill] sm:$0xff] %v7336_v14 }
 0x1ad   : > { %5491 = vmatpush3.bf16.msra.mxu1 %v6257_v15  ;;  %v6274_v15 = vld [vmem:[#allocation9 + $0xd8] sm:$0xff]  }
 0x1ae   : > { %5492 = vmatprep.subr.bf16.mxu1 %v6260_v27  ;;  %v6279_v27 = vld [vmem:[#allocation9 + $0xd0] sm:$0xff]  }
 0x1b1   : > { %5493 = vmatpush3.bf16.msra.mxu1 %v6261_v30  ;;  %v6280_v30 = vld [vmem:[#allocation9 + $0x90] sm:$0xff]  }
 0x1b2   : > { %5494 = vmatprep.subr.bf16.mxu1 %v6264_v39  ;;  %v1572_v39 = vsel %vm6967_vm5, 0, %v1571_v33 }
 0x1b3   : > { %1573 = vst [vmem:[#allocation2 + $0x2c] sm:$0x8] %v1572_v39 }
 0x1b5   : > { %5495 = vmatpush3.bf16.msra.mxu1 %v6265_v46  ;;  %v7345_v46 = vsub.s32 0, %v7323_v38 }
 0x1b6   : > { %5496 = vmatprep.subr.bf16.mxu1 %v6268_v62  ;;  %v6285_v62 = vld [vmem:[#allocation9 + $0xc0] sm:$0xff]  }
 0x1b7   : > { %9446 = vst [vmem:[#allocation20_spill] sm:$0xff] %v7345_v46 }
 0x1b9   : > { %5497 = vmatpush3.bf16.msra.mxu1 %v6269_v63  ;;  %v723_v63 = vld [vmem:[%s9329_s4] sm:$0x1] }
 0x260   : > { %v916_v4 = vpop.f32.mrf.mxu1 }
 0x261   : > { %v7328_v8 = vmul.f32 0.00048828125, %v916_v4  ;;  %v6270_v4 = vld [vmem:[#allocation9 + $0xe0] sm:$0xff]  }
 0x262   : > { %v6055_v10 = vpop.f32.mrf.mxu1  ;;  %5602 = vmatprep.subr.bf16.mxu0 %v6270_v4  ;;  %v6297_v4 = vld [vmem:[#allocation9 + $0x170] sm:$0xff]  }
 0x263   : > { %v921_v12 = vmul.f32 %v7328_v8, %v7328_v8  ;;  %v6272_v10 = vld [vmem:[#allocation9 + $0x40] sm:$0xff]   ;;  %5603 = vmatpush3.bf16.msra.mxu0 %v6271_v7 }
 0x264   : > { %5498 = vmatprep.subr.bf16.mxu1 %v6272_v10  ;;  %5604 = vmatprep.subr.bf16.mxu0 %v6274_v15 }
 0x265   : > { %v923_v18 = vrot.slane %v921_v12, 7  ;;  %v6273_v12 = vld [vmem:[#allocation9] sm:$0xff]  }
 0x266   : > { %5499 = vmatpush3.bf16.msra.mxu1 %v6273_v12  ;;  %v6300_v12 = vld [vmem:[#allocation9 + $0x130] sm:$0xff]  }
 0x267   : > { %v925_v24 = vsub.f32 %v7328_v8, %v923_v18  ;;  %v6277_v18 = vld [vmem:[#allocation2 + $0x4] ss:$36 sps:$4 sm:$0xff]   ;;  %5605 = vmatpush3.bf16.msra.mxu0 %v6278_v19  ;;  %5708 = vmatprep.subr.bf16.mxu1 %v6281_v56 }
 0x268   : > { %3897 = vmatprep.mubr.bf16.mxu1 %v6277_v18  ;;  %5606 = vmatprep.subr.bf16.mxu0 %v6279_v27 }
 0x269   : > { %v926_v32 = vadd.f32 1e-05, %v925_v24  ;;  %3898 = vmatmul.mubr.bf16.vlgmr.msra.gmra.mxu1 %v6275_v20 }
 0x26a   : > { %5709 = vmatpush3.bf16.msra.mxu1 %v6283_v60 }
 0x26b   : > { %6530 = vrsqrt.f32 %v926_v32  ;;  %5607 = vmatpush3.bf16.msra.mxu0 %v6280_v30  ;;  %5710 = vmatprep.subr.bf16.mxu1 %v6297_v4 }
 0x26c   : > { %5608 = vmatprep.subr.bf16.mxu0 %v6282_v50 }
 0x26e   : > { %5711 = vmatpush3.bf16.msra.mxu1 %v6300_v12 }
 0x26f   : > { %5609 = vmatpush3.bf16.msra.mxu0 %v6284_v52 }
 0x270   : > { %5610 = vmatprep.subr.bf16.mxu0 %v6285_v62 }
 0x273   : > { %5611 = vmatpush3.bf16.msra.mxu0 %v6286_v3 }
 0x278   : > { %v6531_v23 = vpop.eup %6530 }
 0x279   : > { %v935_v24 = vrot.slane %v6531_v23, %v7336_v14 }
 0x27b   : > { %v936_v32 = vcombine.high %v935_v24, %v935_v24 }
 0x27d   : > { %v943_v47 = vrot.slane %v936_v32, %v7336_v14 }
 0x27f   : > { %v945_v55 = vmul.f32 %v943_v47, %v722_v37  ;;  %v6314_v47 = vld [vmem:[#allocation9 + $0x128] sm:$0xff]  }
 0x281   : > { %v946_v7 = vmul.f32 %v945_v55, %v7328_v8  ;;  %v952_v10 = vrot.slane %v945_v55, %v7345_v46 }
 0x283   : > { %v947_v15 = vsub.f32 %v723_v63, %v946_v7  ;;  %v954_v18 = vmul.f32 %v952_v10, %v7165_v43  ;;  %v955_v19 = vmul.f32 %v952_v10, %v7169_v45  ;;  %v956_v20 = vmul.f32 %v7163_v42, %v952_v10 }
 0x284   : > { %v957_v23 = vmul.f32 %v7167_v44, %v952_v10  ;;  %v958_v24 = vmul.f32 %v952_v10, %v7182_v53  ;;  %v959_v8 = vmul.f32 %v952_v10, %v7192_v61  ;;  %v960_v27 = vmul.f32 %v7177_v49, %v952_v10  ;;  %v6311_v49 = vld [vmem:[#allocation9 + $0x168] sm:$0xff]  }
 0x285   : > { %v7361_v30 = vrot.slane %v947_v15, %v7345_v46  ;;  %v961_v32 = vmul.f32 %v7187_v57, %v952_v10  ;;  %v962_v43 = vmul.f32 %v952_v10, %v7202_v5  ;;  %v963_v45 = vmul.f32 %v952_v10, %v7212_v13  ;;  %5712 = vmatprep.subr.bf16.mxu1 %v6311_v49 }
 0x286   : > { %v964_v42 = vmul.f32 %v7197_v1, %v952_v10  ;;  %v965_v44 = vmul.f32 %v7207_v9, %v952_v10  ;;  %v966_v53 = vmul.f32 %v952_v10, %v7222_v21  ;;  %v967_v61 = vmul.f32 %v952_v10, %v7232_v31  ;;  %5713 = vmatpush3.bf16.msra.mxu1 %v6314_v47 }
 0x287   : > { %v968_v33 = vmul.f32 %v7217_v17, %v952_v10  ;;  %v969_v37 = vmul.f32 %v7227_v26, %v952_v10  ;;  %v970_v57 = vmul.f32 %v952_v10, %v7242_v40  ;;  %v971_v5 = vmul.f32 %v952_v10, %v7252_v54 }
 0x288   : > { %v972_v13 = vmul.f32 %v7237_v35, %v952_v10  ;;  %v973_v1 = vmul.f32 %v7247_v48, %v952_v10  ;;  %v974_v9 = vmul.f32 %v952_v10, %v7262_v0  ;;  %v975_v21 = vmul.f32 %v952_v10, %v7272_v11 }
 0x289   : > { %v976_v31 = vmul.f32 %v7257_v59, %v952_v10  ;;  %v977_v39 = vmul.f32 %v7267_v6, %v952_v10  ;;  %v978_v17 = vmul.f32 %v952_v10, %v7282_v22  ;;  %v979_v26 = vmul.f32 %v952_v10, %v7292_v34 }
 0x28a   : > { %v980_v40 = vmul.f32 %v7277_v16, %v952_v10  ;;  %v981_v54 = vmul.f32 %v7287_v28, %v952_v10  ;;  %v982_v35 = vmul.f32 %v952_v10, %v7302_v51  ;;  %v983_v48 = vmul.f32 %v952_v10, %v7312_v2 }
 0x28b   : > { %v984_v0 = vmul.f32 %v7297_v41, %v952_v10  ;;  %v985_v11 = vmul.f32 %v7307_v58, %v952_v10  ;;  %v992_v59 = vadd.f32 %v7361_v30, %v954_v18  ;;  %v993_v6 = vadd.f32 %v7361_v30, %v955_v19 }
 0x28c   : > { %v994_v22 = vadd.f32 %v7361_v30, %v956_v20  ;;  %v995_v34 = vadd.f32 %v7361_v30, %v957_v23  ;;  %v996_v16 = vadd.f32 %v7361_v30, %v958_v24  ;;  %v997_v28 = vadd.f32 %v7361_v30, %v959_v8 }
 0x28d   : > { %v998_v51 = vadd.f32 %v7361_v30, %v960_v27  ;;  %v999_v2 = vadd.f32 %v7361_v30, %v961_v32  ;;  %v1000_v41 = vadd.f32 %v7361_v30, %v962_v43  ;;  %v1001_v58 = vadd.f32 %v7361_v30, %v963_v45 }
 0x28e   : > { %v1002_v50 = vadd.f32 %v7361_v30, %v964_v42  ;;  %v1003_v52 = vadd.f32 %v7361_v30, %v965_v44  ;;  %v1004_v55 = vadd.f32 %v7361_v30, %v966_v53  ;;  %v1005_v56 = vadd.f32 %v7361_v30, %v967_v61 }
 0x28f   : > { %v1006_v60 = vadd.f32 %v7361_v30, %v968_v33  ;;  %v1007_v62 = vadd.f32 %v7361_v30, %v969_v37  ;;  %v1008_v63 = vadd.f32 %v7361_v30, %v970_v57  ;;  %v1009_v3 = vadd.f32 %v7361_v30, %v971_v5 }
 0x290   : > { %v1010_v4 = vadd.f32 %v7361_v30, %v972_v13  ;;  %v1011_v7 = vadd.f32 %v7361_v30, %v973_v1  ;;  %v1012_v10 = vadd.f32 %v7361_v30, %v974_v9  ;;  %v1013_v12 = vadd.f32 %v7361_v30, %v975_v21  ;;  %v6325_v21 = vld [vmem:[#allocation9 + $0x160] sm:$0xff]  }
 0x291   : > { %v7411_v15 = vadd.f32 %v7361_v30, %v976_v31  ;;  %v7414_v18 = vadd.f32 %v7361_v30, %v977_v39  ;;  %v7417_v19 = vadd.f32 %v7361_v30, %v978_v17  ;;  %v7420_v20 = vadd.f32 %v7361_v30, %v979_v26  ;;  %5714 = vmatprep.subr.bf16.mxu1 %v6325_v21 }
 0x292   : > { %v7423_v23 = vadd.f32 %v7361_v30, %v980_v40  ;;  %v7426_v24 = vadd.f32 %v7361_v30, %v981_v54  ;;  %v7429_v8 = vadd.f32 %v7361_v30, %v982_v35  ;;  %v7432_v27 = vadd.f32 %v7361_v30, %v983_v48 }
 0x293   : > { %v7435_v32 = vadd.f32 %v7361_v30, %v984_v0  ;;  %v7438_v43 = vadd.f32 %v7361_v30, %v985_v11  ;;  %v7440_v45 = vpack.c.bf16 %v992_v59, %v992_v59  ;;  %v7442_v42 = vpack.c.bf16 %v993_v6, %v993_v6 }
 0x294   : > { %v7444_v44 = vpack.c.bf16 %v994_v22, %v994_v22  ;;  %v7446_v53 = vpack.c.bf16 %v995_v34, %v995_v34  ;;  %v7448_v61 = vpack.c.bf16 %v996_v16, %v996_v16  ;;  %v7450_v49 = vpack.c.bf16 %v997_v28, %v997_v28 }
 0x295   : > { %9447 = vst [vmem:[#allocation21_spill] sm:$0xff] %v7435_v32  ;;  %9448 = vst [vmem:[#allocation22_spill] sm:$0xff] %v7438_v43  ;;  %v7452_v33 = vpack.c.bf16 %v998_v51, %v998_v51  ;;  %v7454_v37 = vpack.c.bf16 %v999_v2, %v999_v2  ;;  %v7456_v57 = vpack.c.bf16 %v1000_v41, %v1000_v41  ;;  %v9371_v51 = vshrl.u32 %v7440_v45, 16  ;;  %v1480_v32 = vld [vmem:[#allocation2 + $0x2d0] sm:$0xf] }
 0x296   : > { %v7458_v30 = vpack.c.bf16 %v1001_v58, %v1001_v58  ;;  %1536 = vst [vmem:[#allocation2 + $0x4c] sm:$0xf] %v7440_v45  ;;  %1537 = vst [vmem:[#allocation2 + $0x70] sm:$0xf] %v7442_v42  ;;  %v7464_v5 = vpack.c.bf16 %v1002_v50, %v1002_v50  ;;  %v7466_v13 = vpack.c.bf16 %v1003_v52, %v1003_v52  ;;  %v9370_v2 = vshll.u32 %v7440_v45, 16 }
 0x297   : > { %1985 = vst [vmem:[#allocation2 + $0x10] sm:$0xf] %v7440_v45  ;;  %1986 = vst [vmem:[#allocation2 + $0x34] sm:$0xf] %v7442_v42  ;;  %v7468_v1 = vpack.c.bf16 %v1004_v55, %v1004_v55  ;;  %v7470_v9 = vpack.c.bf16 %v1005_v56, %v1005_v56  ;;  %v7484_v31 = vpack.c.bf16 %v1006_v60, %v1006_v60  ;;  %v9356_v41 = vshrl.u32 %v7442_v42, 16 }
 0x298   : > { %1538 = vst [vmem:[#allocation2 + $0x94] sm:$0xf] %v7444_v44  ;;  %1539 = vst [vmem:[#allocation2 + $0xb8] sm:$0xf] %v7446_v53  ;;  %v7486_v39 = vpack.c.bf16 %v1007_v62, %v1007_v62  ;;  %v7488_v17 = vpack.c.bf16 %v1008_v63, %v1008_v63  ;;  %v7490_v26 = vpack.c.bf16 %v1009_v3, %v1009_v3  ;;  %v9359_v58 = vshll.u32 %v7442_v42, 16  ;;  %v6328_v3 = vld [vmem:[#allocation9 + $0x120] sm:$0xff]  }
 0x299   : > { %1540 = vst [vmem:[#allocation2 + $0xdc] sm:$0xf] %v7448_v61  ;;  %1541 = vst [vmem:[#allocation2 + $0x100] sm:$0xf] %v7450_v49  ;;  %v7504_v40 = vpack.c.bf16 %v1010_v4, %v1010_v4  ;;  %v7506_v54 = vpack.c.bf16 %v1011_v7, %v1011_v7  ;;  %v7508_v35 = vpack.c.bf16 %v1012_v10, %v1012_v10  ;;  %v9353_v47 = vshrl.u32 %v7444_v44, 16 }
 0x29a   : > { %1987 = vst [vmem:[#allocation2 + $0x58] sm:$0xf] %v7444_v44  ;;  %1988 = vst [vmem:[#allocation2 + $0x7c] sm:$0xf] %v7446_v53  ;;  %v7510_v48 = vpack.c.bf16 %v1013_v12, %v1013_v12  ;;  %v7526_v0 = vpack.c.bf16 %v7411_v15, %v7411_v15  ;;  %v7530_v11 = vpack.c.bf16 %v7414_v18, %v7414_v18  ;;  %v9352_v50 = vshll.u32 %v7444_v44, 16 }
 0x29b   : > { %1989 = vst [vmem:[#allocation2 + $0xa0] sm:$0xf] %v7448_v61  ;;  %1990 = vst [vmem:[#allocation2 + $0xc4] sm:$0xf] %v7450_v49  ;;  %v7534_v59 = vpack.c.bf16 %v7417_v19, %v7417_v19  ;;  %v7538_v6 = vpack.c.bf16 %v7420_v20, %v7420_v20  ;;  %v7554_v22 = vpack.c.bf16 %v7423_v23, %v7423_v23  ;;  %v9347_v52 = vshrl.u32 %v7446_v53, 16 }
 0x29c   : > { %2253 = vst [vmem:[#allocation2 + $0x1c] sm:$0xf] %v7444_v44  ;;  %2254 = vst [vmem:[#allocation2 + $0x40] sm:$0xf] %v7446_v53  ;;  %v7558_v34 = vpack.c.bf16 %v7426_v24, %v7426_v24  ;;  %v7562_v16 = vpack.c.bf16 %v7429_v8, %v7429_v8  ;;  %v7566_v28 = vpack.c.bf16 %v7432_v27, %v7432_v27  ;;  %v9350_v55 = vshll.u32 %v7446_v53, 16 }
 0x29d   : > { %2255 = vst [vmem:[#allocation2 + $0x64] sm:$0xf] %v7448_v61  ;;  %2256 = vst [vmem:[#allocation2 + $0x88] sm:$0xf] %v7450_v49  ;;  %v1173_v56 = vrot.slane %v9371_v51, 7  ;;  %v1181_v60 = vrot.slane %v9356_v41, 7  ;;  %5715 = vmatpush3.bf16.msra.mxu1 %v6328_v3 }
 0x29e   : > { %1542 = vst [vmem:[#allocation2 + $0x124] sm:$0xf] %v7452_v33  ;;  %1543 = vst [vmem:[#allocation2 + $0x148] sm:$0xf] %v7454_v37  ;;  %v9342_v62 = vshrl.u32 %v7448_v61, 16  ;;  %v9344_v63 = vshll.u32 %v7448_v61, 16 }
 0x29f   : > { %1544 = vst [vmem:[#allocation2 + $0x16c] sm:$0xf] %v7456_v57  ;;  %1545 = vst [vmem:[#allocation2 + $0x190] sm:$0xf] %v7458_v30  ;;  %v1189_v7 = vrot.slane %v9353_v47, 7  ;;  %v1197_v10 = vrot.slane %v9347_v52, 7  ;;  %v7632_v18 = vor.u32 %v9370_v2, %v1173_v56  ;;  %v1184_v20 = vor.u32 %v9359_v58, %v1181_v60 }
 0x2a0   : > { %1991 = vst [vmem:[#allocation2 + $0xe8] sm:$0xf] %v7452_v33  ;;  %1992 = vst [vmem:[#allocation2 + $0x10c] sm:$0xf] %v7454_v37  ;;  %v9343_v12 = vshrl.u32 %v7450_v49, 16  ;;  %v9346_v15 = vshll.u32 %v7450_v49, 16 }
 0x2a1   : > { %1993 = vst [vmem:[#allocation2 + $0x130] sm:$0xf] %v7456_v57  ;;  %1994 = vst [vmem:[#allocation2 + $0x154] sm:$0xf] %v7458_v30  ;;  %v1177_v19 = vrot.slane %v1173_v56, 4  ;;  %v1205_v23 = vrot.slane %v9342_v62, 7  ;;  %v7640_v24 = vor.u32 %v9352_v50, %v1189_v7  ;;  %v1200_v27 = vor.u32 %v9350_v55, %v1197_v10 }
 0x2a2   : > { %2257 = vst [vmem:[#allocation2 + $0xac] sm:$0xf] %v7452_v33  ;;  %2258 = vst [vmem:[#allocation2 + $0xd0] sm:$0xf] %v7454_v37  ;;  %v1193_v8 = vrot.slane %v1189_v7, 4  ;;  %v1213_v21 = vrot.slane %v9343_v12, 7 }
 0x2a3   : > { %2259 = vst [vmem:[#allocation2 + $0xf4] sm:$0xf] %v7456_v57  ;;  %2260 = vst [vmem:[#allocation2 + $0x118] sm:$0xf] %v7458_v30  ;;  %v1185_v56 = vsel %vm7620_vm9, %v1177_v19, %v1184_v20  ;;  %v7650_v60 = vor.u32 %v9344_v63, %v1205_v23  ;;  %v1209_v29 = vrot.slane %v1205_v23, 4  ;;  %v9345_v3 = vshrl.u32 %v7452_v33, 16 }
 0x2a4   : > { %9449 = vst [vmem:[#allocation23_spill] sm:$0xff] %v7504_v40  ;;  %9450 = vst [vmem:[#allocation24_spill] sm:$0xff] %v7506_v54  ;;  %v1201_v62 = vsel %vm7620_vm9, %v1193_v8, %v1200_v27  ;;  %v1216_v7 = vor.u32 %v9346_v15, %v1213_v21  ;;  %v9349_v10 = vshll.u32 %v7452_v33, 16  ;;  %v9348_v12 = vshrl.u32 %v7454_v37, 16  ;;  %v6339_v55 = vld [vmem:[#allocation9 + $0x158] sm:$0xff]  }
 0x2a5   : > { %9451 = vst [vmem:[#allocation25_spill] sm:$0xff] %v7508_v35  ;;  %9452 = vst [vmem:[#allocation26_spill] sm:$0xff] %v7510_v48  ;;  %v1221_v19 = vrot.slane %v9345_v3, 7  ;;  %v9355_v20 = vshll.u32 %v7454_v37, 16  ;;  %v9351_v23 = vshrl.u32 %v7456_v57, 16  ;;  %v9358_v63 = vshll.u32 %v7456_v57, 16  ;;  %5716 = vmatprep.subr.bf16.mxu1 %v6339_v55 }
 0x2a6   : > { %1546 = vst [vmem:[#allocation2 + $0x1b4] sm:$0xf] %v7464_v5  ;;  %1547 = vst [vmem:[#allocation2 + $0x1d8] sm:$0xf] %v7466_v13  ;;  %v1217_v8 = vsel %vm7620_vm9, %v1209_v29, %v1216_v7  ;;  %v1229_v27 = vrot.slane %v9348_v12, 7  ;;  %v9354_v21 = vshrl.u32 %v7458_v30, 16 }
 0x2a7   : > { %1548 = vst [vmem:[#allocation2 + $0x1fc] sm:$0xf] %v7468_v1  ;;  %1549 = vst [vmem:[#allocation2 + $0x220] sm:$0xf] %v7470_v9  ;;  %v7672_v3 = vor.u32 %v9349_v10, %v1221_v19  ;;  %v1225_v15 = vrot.slane %v1221_v19, 4  ;;  %v1237_v52 = vrot.slane %v9351_v23, 7 }
 0x2a8   : > { %1995 = vst [vmem:[#allocation2 + $0x178] sm:$0xf] %v7464_v5  ;;  %1996 = vst [vmem:[#allocation2 + $0x19c] sm:$0xf] %v7466_v13  ;;  %v1232_v29 = vor.u32 %v9355_v20, %v1229_v27  ;;  %v1245_v7 = vrot.slane %v9354_v21, 7  ;;  %v9364_v12 = vshll.u32 %v7464_v5, 16 }
 0x2a9   : > { %1997 = vst [vmem:[#allocation2 + $0x1c0] sm:$0xf] %v7468_v1  ;;  %1998 = vst [vmem:[#allocation2 + $0x1e4] sm:$0xf] %v7470_v9  ;;  %v9360_v10 = vshrl.u32 %v7466_v13, 16  ;;  %v6340_v19 = vld [vmem:[#allocation9 + $0x1f8] sm:$0xff]   ;;  %v7685_v23 = vor.u32 %v9358_v63, %v1237_v52 }
 0x2aa   : > { %2261 = vst [vmem:[#allocation2 + $0x13c] sm:$0xf] %v7464_v5  ;;  %2262 = vst [vmem:[#allocation2 + $0x160] sm:$0xf] %v7466_v13  ;;  %v1241_v50 = vrot.slane %v1237_v52, 4  ;;  %v9363_v47 = vshll.u32 %v7466_v13, 16  ;;  %v1233_v27 = vsel %vm7620_vm9, %v1225_v15, %v1232_v29  ;;  %5820 = vmatprep.subr.bf16.mxu0 %v6340_v19 }
 0x2ab   : > { %2263 = vst [vmem:[#allocation2 + $0x184] sm:$0xf] %v7468_v1  ;;  %2264 = vst [vmem:[#allocation2 + $0x1a8] sm:$0xf] %v7470_v9  ;;  %v1261_v20 = vrot.slane %v9360_v10, 7  ;;  %v9361_v41 = vshrl.u32 %v7468_v1, 16 }
 0x2ac   : > { %9453 = vst [vmem:[#allocation27_spill] sm:$0xff] %v7526_v0  ;;  %9454 = vst [vmem:[#allocation28_spill] sm:$0xff] %v7530_v11  ;;  %v9365_v63 = vshll.u32 %v7468_v1, 16  ;;  %v9362_v58 = vshrl.u32 %v7470_v9, 16  ;;  %v9381_v10 = vshll.u32 %v7484_v31, 16  ;;  %v9460_v46 = vshll.u32 %v7526_v0, 16 }
 0x2ad   : > { %9455 = vst [vmem:[#allocation29_spill] sm:$0xff] %v7534_v59  ;;  %9456 = vst [vmem:[#allocation30_spill] sm:$0xff] %v7538_v6  ;;  %v1264_v29 = vor.u32 %v9363_v47, %v1261_v20  ;;  %v1269_v55 = vrot.slane %v9361_v41, 7  ;;  %v9375_v41 = vshll.u32 %v7486_v39, 16  ;;  %v9464_v25 = vshll.u32 %v7538_v6, 16 }
 0x2ae   : > { %1550 = vst [vmem:[#allocation2 + $0x244] sm:$0xf] %v7484_v31  ;;  %1551 = vst [vmem:[#allocation2 + $0x268] sm:$0xf] %v7486_v39  ;;  %v1277_v19 = vrot.slane %v9362_v58, 7 }
 0x2af   : > { %1552 = vst [vmem:[#allocation2 + $0x28c] sm:$0xf] %v7488_v17  ;;  %1553 = vst [vmem:[#allocation2 + $0x2b0] sm:$0xf] %v7490_v26  ;;  %v7719_v20 = vor.u32 %v9365_v63, %v1269_v55  ;;  %v9378_v63 = vshll.u32 %v7490_v26, 16 }
 0x2b0   : > { %1999 = vst [vmem:[#allocation2 + $0x208] sm:$0xf] %v7484_v31  ;;  %2000 = vst [vmem:[#allocation2 + $0x22c] sm:$0xf] %v7486_v39  ;;  %v8315_v4 = vld [vmem:[#allocation2 + $0x1c8] sm:$0xf] }
 0x2b1   : > { %2001 = vst [vmem:[#allocation2 + $0x250] sm:$0xf] %v7488_v17  ;;  %2002 = vst [vmem:[#allocation2 + $0x274] sm:$0xf] %v7490_v26 }
 0x2b2   : > { %2265 = vst [vmem:[#allocation2 + $0x1cc] sm:$0xf] %v7484_v31  ;;  %2266 = vst [vmem:[#allocation2 + $0x1f0] sm:$0xf] %v7486_v39 }
 0x2b3   : > { %2267 = vst [vmem:[#allocation2 + $0x214] sm:$0xf] %v7488_v17  ;;  %2268 = vst [vmem:[#allocation2 + $0x238] sm:$0xf] %v7490_v26 }
 0x2b4   : > { %1554 = vst [vmem:[#allocation2 + $0x2d4] sm:$0xf] %v7504_v40  ;;  %1555 = vst [vmem:[#allocation2 + $0x2f8] sm:$0xf] %v7506_v54 }
 0x2b5   : > { %1556 = vst [vmem:[#allocation2 + $0x31c] sm:$0xf] %v7508_v35  ;;  %1557 = vst [vmem:[#allocation2 + $0x340] sm:$0xf] %v7510_v48 }
 0x2b6   : > { %2003 = vst [vmem:[#allocation2 + $0x298] sm:$0xf] %v7504_v40  ;;  %2004 = vst [vmem:[#allocation2 + $0x2bc] sm:$0xf] %v7506_v54 }
 0x2b7   : > { %2005 = vst [vmem:[#allocation2 + $0x2e0] sm:$0xf] %v7508_v35  ;;  %2006 = vst [vmem:[#allocation2 + $0x304] sm:$0xf] %v7510_v48 }
 0x2b8   : > { %2269 = vst [vmem:[#allocation2 + $0x25c] sm:$0xf] %v7504_v40  ;;  %2270 = vst [vmem:[#allocation2 + $0x280] sm:$0xf] %v7506_v54 }
 0x2b9   : > { %2271 = vst [vmem:[#allocation2 + $0x2a4] sm:$0xf] %v7508_v35  ;;  %2272 = vst [vmem:[#allocation2 + $0x2c8] sm:$0xf] %v7510_v48 }
 0x2ba   : > { %1558 = vst [vmem:[#allocation2 + $0x364] sm:$0xf] %v7526_v0  ;;  %1559 = vst [vmem:[#allocation2 + $0x388] sm:$0xf] %v7530_v11 }
 0x2bb   : > { %1560 = vst [vmem:[#allocation2 + $0x3ac] sm:$0xf] %v7534_v59  ;;  %1561 = vst [vmem:[#allocation2 + $0x3d0] sm:$0xf] %v7538_v6 }
 0x2bc   : > { %2007 = vst [vmem:[#allocation2 + $0x328] sm:$0xf] %v7526_v0  ;;  %2008 = vst [vmem:[#allocation2 + $0x34c] sm:$0xf] %v7530_v11 }
 0x2bd   : > { %2009 = vst [vmem:[#allocation2 + $0x370] sm:$0xf] %v7534_v59  ;;  %2010 = vst [vmem:[#allocation2 + $0x394] sm:$0xf] %v7538_v6 }
 0x2be   : > { %2273 = vst [vmem:[#allocation2 + $0x2ec] sm:$0xf] %v7526_v0  ;;  %2274 = vst [vmem:[#allocation2 + $0x310] sm:$0xf] %v7530_v11 }
 0x2bf   : > { %2275 = vst [vmem:[#allocation2 + $0x334] sm:$0xf] %v7534_v59  ;;  %2276 = vst [vmem:[#allocation2 + $0x358] sm:$0xf] %v7538_v6 }
 0x2c0   : > { %1562 = vst [vmem:[#allocation2 + $0x3f4] sm:$0xf] %v7554_v22  ;;  %1563 = vst [vmem:[#allocation2 + $0x418] sm:$0xf] %v7558_v34 }
 0x2c1   : > { %1564 = vst [vmem:[#allocation2 + $0x43c] sm:$0xf] %v7562_v16  ;;  %1565 = vst [vmem:[#allocation2 + $0x460] sm:$0xf] %v7566_v28 }
 0x2c2   : > { %2011 = vst [vmem:[#allocation2 + $0x3b8] sm:$0xf] %v7554_v22  ;;  %2012 = vst [vmem:[#allocation2 + $0x3dc] sm:$0xf] %v7558_v34 }
 0x2c3   : > { %2013 = vst [vmem:[#allocation2 + $0x400] sm:$0xf] %v7562_v16  ;;  %2014 = vst [vmem:[#allocation2 + $0x424] sm:$0xf] %v7566_v28 }
 0x2c4   : > { %2277 = vst [vmem:[#allocation2 + $0x37c] sm:$0xf] %v7554_v22  ;;  %2278 = vst [vmem:[#allocation2 + $0x3a0] sm:$0xf] %v7558_v34 }
 0x2c5   : > { %2279 = vst [vmem:[#allocation2 + $0x3c4] sm:$0xf] %v7562_v16  ;;  %2280 = vst [vmem:[#allocation2 + $0x3e8] sm:$0xf] %v7566_v28 }
 0x2c6   : > { %9459 = vst [vmem:[#allocation31_spill] sm:$0xff] %v7640_v24  ;;  %1447 = vst [vmem:[#allocation2 + $0x6c] sm:$0xf] %v1185_v56 }
 0x2c7   : > { %1922 = vst [vmem:[#allocation2 + $0x30] sm:$0xf] %v1185_v56  ;;  %1451 = vst [vmem:[#allocation2 + $0xb4] sm:$0xf] %v1201_v62  ;;  %v9369_v56 = vshll.u32 %v7458_v30, 16 }
 0x2c8   : > { %1926 = vst [vmem:[#allocation2 + $0x78] sm:$0xf] %v1201_v62  ;;  %2194 = vst [vmem:[#allocation2 + $0x3c] sm:$0xf] %v1201_v62  ;;  %v9357_v62 = vshrl.u32 %v7464_v5, 16 }
 0x2c9   : > { %1455 = vst [vmem:[#allocation2 + $0xfc] sm:$0xf] %v1217_v8  ;;  %1930 = vst [vmem:[#allocation2 + $0xc0] sm:$0xf] %v1217_v8  ;;  %v1248_v21 = vor.u32 %v9369_v56, %v1245_v7  ;;  %v9368_v7 = vshll.u32 %v7470_v9, 16 }
 0x2ca   : > { %2198 = vst [vmem:[#allocation2 + $0x84] sm:$0xf] %v1217_v8  ;;  %v1253_v8 = vrot.slane %v9357_v62, 7  ;;  %1459 = vst [vmem:[#allocation2 + $0x144] sm:$0xf] %v1233_v27 }
 0x2cb   : > { %1934 = vst [vmem:[#allocation2 + $0x108] sm:$0xf] %v1233_v27  ;;  %2202 = vst [vmem:[#allocation2 + $0xcc] sm:$0xf] %v1233_v27  ;;  %v1249_v15 = vsel %vm7620_vm9, %v1241_v50, %v1248_v21  ;;  %v9367_v27 = vshrl.u32 %v7486_v39, 16  ;;  %v1273_v21 = vrot.slane %v1269_v55, 4  ;;  %v1280_v58 = vor.u32 %v9368_v7, %v1277_v19 }
 0x2cc   : > { %v7699_v52 = vor.u32 %v9364_v12, %v1253_v8  ;;  %v1257_v62 = vrot.slane %v1253_v8, 4  ;;  %v9366_v8 = vshrl.u32 %v7484_v31, 16  ;;  %1463 = vst [vmem:[#allocation2 + $0x18c] sm:$0xf] %v1249_v15  ;;  %1938 = vst [vmem:[#allocation2 + $0x150] sm:$0xf] %v1249_v15 }
 0x2cd   : > { %2206 = vst [vmem:[#allocation2 + $0x114] sm:$0xf] %v1249_v15  ;;  %v1293_v12 = vrot.slane %v9367_v27, 7  ;;  %v9374_v15 = vshrl.u32 %v7488_v17, 16  ;;  %v9372_v55 = vshrl.u32 %v7490_v26, 16  ;;  %v9373_v19 = vshrl.u32 %v7504_v40, 16 }
 0x2ce   : > { %v1265_v50 = vsel %vm7620_vm9, %v1257_v62, %v1264_v29  ;;  %v1285_v47 = vrot.slane %v9366_v8, 7  ;;  %v6343_v62 = vld [vmem:[#allocation9 + $0x118] sm:$0xff]   ;;  %v9376_v29 = vshll.u32 %v7488_v17, 16  ;;  %v1281_v8 = vsel %vm7620_vm9, %v1273_v21, %v1280_v58 }
 0x2cf   : > { %1467 = vst [vmem:[#allocation2 + $0x1d4] sm:$0xf] %v1265_v50  ;;  %1942 = vst [vmem:[#allocation2 + $0x198] sm:$0xf] %v1265_v50  ;;  %5717 = vmatpush3.bf16.msra.mxu1 %v6343_v62  ;;  %v1301_v56 = vrot.slane %v9374_v15, 7  ;;  %v1309_v2 = vrot.slane %v9372_v55, 7 }
 0x2d0   : > { %2210 = vst [vmem:[#allocation2 + $0x15c] sm:$0xf] %v1265_v50  ;;  %v7737_v27 = vor.u32 %v9381_v10, %v1285_v47  ;;  %v1289_v7 = vrot.slane %v1285_v47, 4  ;;  %v1296_v50 = vor.u32 %v9375_v41, %v1293_v12  ;;  %v1317_v51 = vrot.slane %v9373_v19, 7  ;;  %1471 = vst [vmem:[#allocation2 + $0x21c] sm:$0xf] %v1281_v8 }
 0x2d1   : > { %v9377_v58 = vshll.u32 %v7504_v40, 16  ;;  %1946 = vst [vmem:[#allocation2 + $0x1e0] sm:$0xf] %v1281_v8  ;;  %2214 = vst [vmem:[#allocation2 + $0x1a4] sm:$0xf] %v1281_v8  ;;  %v9379_v12 = vshrl.u32 %v7506_v54, 16  ;;  %v7755_v55 = vor.u32 %v9376_v29, %v1301_v56  ;;  %v1312_v15 = vor.u32 %v9378_v63, %v1309_v2 }
 0x2d2   : > { %v1297_v47 = vsel %vm7620_vm9, %v1289_v7, %v1296_v50  ;;  %v9382_v21 = vshll.u32 %v7506_v54, 16  ;;  %v9380_v62 = vshrl.u32 %v7508_v35, 16  ;;  %v1305_v19 = vrot.slane %v1301_v56, 4 }
 0x2d3   : > { %v7761_v8 = vor.u32 %v9377_v58, %v1317_v51  ;;  %1475 = vst [vmem:[#allocation2 + $0x264] sm:$0xf] %v1297_v47  ;;  %1950 = vst [vmem:[#allocation2 + $0x228] sm:$0xf] %v1297_v47  ;;  %v1321_v7 = vrot.slane %v1317_v51, 4  ;;  %v1325_v50 = vrot.slane %v9379_v12, 7 }
 0x2d4   : > { %2218 = vst [vmem:[#allocation2 + $0x1ec] sm:$0xf] %v1297_v47  ;;  %v1333_v41 = vrot.slane %v9380_v62, 7  ;;  %v9383_v29 = vshll.u32 %v7508_v35, 16  ;;  %v1313_v56 = vsel %vm7620_vm9, %v1305_v19, %v1312_v15  ;;  %v9384_v2 = vshrl.u32 %v7510_v48, 16 }
 0x2d5   : > { %v9390_v58 = vshll.u32 %v7510_v48, 16  ;;  %v9387_v63 = vshrl.u32 %v7526_v0, 16  ;;  %v1328_v51 = vor.u32 %v9382_v21, %v1325_v50  ;;  %1479 = vst [vmem:[#allocation2 + $0x2ac] sm:$0xf] %v1313_v56  ;;  %1954 = vst [vmem:[#allocation2 + $0x270] sm:$0xf] %v1313_v56 }
 0x2d6   : > { %v7777_v47 = vor.u32 %v9383_v29, %v1333_v41  ;;  %v1337_v12 = vrot.slane %v1333_v41, 4  ;;  %2222 = vst [vmem:[#allocation2 + $0x234] sm:$0xf] %v1313_v56  ;;  %v1341_v15 = vrot.slane %v9384_v2, 7  ;;  %v6355_v21 = vld [vmem:[#allocation9 + $0x150] sm:$0xff]   ;;  %v9392_v41 = vshrl.u32 %v7534_v59, 16 }
 0x2d7   : > { %v1349_v19 = vrot.slane %v9387_v63, 7  ;;  %v1329_v29 = vsel %vm7620_vm9, %v1321_v7, %v1328_v51  ;;  %v9393_v56 = vshrl.u32 %v7538_v6, 16  ;;  %v9461_v50 = vshrl.u32 %v7530_v11, 16  ;;  %5718 = vmatprep.subr.bf16.mxu1 %v6355_v21  ;;  %v1444_v62 = vld [vmem:[#allocation2 + $0x48] sm:$0xf] }
 0x2d8   : > { %v1344_v2 = vor.u32 %v9390_v58, %v1341_v15  ;;  %1483 = vst [vmem:[#allocation2 + $0x2f4] sm:$0xf] %v1329_v29  ;;  %1958 = vst [vmem:[#allocation2 + $0x2b8] sm:$0xf] %v1329_v29  ;;  %v1365_v7 = vrot.slane %v9392_v41, 7  ;;  %v9463_v15 = vshll.u32 %v7534_v59, 16 }
 0x2d9   : > { %v7795_v63 = vor.u32 %v9460_v46, %v1349_v19  ;;  %v1353_v10 = vrot.slane %v1349_v19, 4  ;;  %v1357_v14 = vrot.slane %v9461_v50, 7  ;;  %2226 = vst [vmem:[#allocation2 + $0x27c] sm:$0xf] %v1329_v29  ;;  %v1373_v51 = vrot.slane %v9393_v56, 7 }
 0x2da   : > { %v1448_v46 = vld [vmem:[#allocation2 + $0x90] sm:$0xf]  ;;  %v1345_v19 = vsel %vm7620_vm9, %v1337_v12, %v1344_v2  ;;  %v9462_v50 = vshll.u32 %v7530_v11, 16  ;;  %v1456_v41 = vld [vmem:[#allocation2 + $0x120] sm:$0xf]  ;;  %v7813_v36 = vor.u32 %v9463_v15, %v1365_v7  ;;  %v1369_v58 = vrot.slane %v1365_v7, 4 }
 0x2db   : > { %v1452_v56 = vld [vmem:[#allocation2 + $0xd8] sm:$0xf]  ;;  %v1376_v43 = vor.u32 %v9464_v25, %v1373_v51  ;;  %v9465_v12 = vshrl.u32 %v7554_v22, 16  ;;  %1487 = vst [vmem:[#allocation2 + $0x33c] sm:$0xf] %v1345_v19  ;;  %v9468_v25 = vshrl.u32 %v7558_v34, 16 }
 0x2dc   : > { %v1360_v38 = vor.u32 %v9462_v50, %v1357_v14  ;;  %1962 = vst [vmem:[#allocation2 + $0x300] sm:$0xf] %v1345_v19  ;;  %2230 = vst [vmem:[#allocation2 + $0x2c4] sm:$0xf] %v1345_v19  ;;  %v1464_v50 = vld [vmem:[#allocation2 + $0x1b0] sm:$0xf] }
 0x2dd   : > { %v1381_v2 = vrot.slane %v9465_v12, 7  ;;  %v1460_v29 = vld [vmem:[#allocation2 + $0x168] sm:$0xf]  ;;  %v1472_v15 = vld [vmem:[#allocation2 + $0x240] sm:$0xf]  ;;  %v1389_v51 = vrot.slane %v9468_v25, 7  ;;  %v1377_v59 = vsel %vm7620_vm9, %v1369_v58, %v1376_v43 }
 0x2de   : > { %v1468_v21 = vld [vmem:[#allocation2 + $0x1f8] sm:$0xf]  ;;  %v1361_v7 = vsel %vm7620_vm9, %v1353_v10, %v1360_v38  ;;  %v9412_v12 = vshll.u32 %v7558_v34, 16  ;;  %v1476_v6 = vld [vmem:[#allocation2 + $0x288] sm:$0xf]  ;;  %v9469_v11 = vshll.u32 %v7554_v22, 16 }
 0x2df   : > { %v1385_v48 = vrot.slane %v1381_v2, 4  ;;  %v1398_v35 = vshll.u32 %v7562_v16, 16  ;;  %1491 = vst [vmem:[#allocation2 + $0x384] sm:$0xf] %v1361_v7  ;;  %1966 = vst [vmem:[#allocation2 + $0x348] sm:$0xf] %v1361_v7 }
 0x2e0   : > { %v7835_v0 = vor.u32 %v9469_v11, %v1381_v2  ;;  %2234 = vst [vmem:[#allocation2 + $0x30c] sm:$0xf] %v1361_v7  ;;  %v6359_v38 = vld [vmem:[#allocation9 + $0x110] sm:$0xff]   ;;  %v1488_v10 = vld [vmem:[#allocation2 + $0x360] sm:$0xf]  ;;  %v1392_v19 = vor.u32 %v9412_v12, %v1389_v51  ;;  %v9471_v54 = vshrl.u32 %v7562_v16, 16  ;;  %v1445_v2 = vsel %vm7821_vm14, %v7632_v18, %v1444_v62 }
 0x2e1   : > { %v1484_v25 = vld [vmem:[#allocation2 + $0x318] sm:$0xf]  ;;  %1495 = vst [vmem:[#allocation2 + $0x3cc] sm:$0xf] %v1377_v59  ;;  %1970 = vst [vmem:[#allocation2 + $0x390] sm:$0xf] %v1377_v59  ;;  %v1449_v7 = vsel %vm7821_vm14, %v7640_v24, %v1448_v46  ;;  %v1457_v51 = vsel %vm7821_vm14, %v7672_v3, %v1456_v41  ;;  %5719 = vmatpush3.bf16.msra.mxu1 %v6359_v38  ;;  %v1461_v41 = vsel %vm7821_vm14, %v7685_v23, %v1460_v29 }
 0x2e2   : > { %9470 = vst [vmem:[#allocation32_spill] sm:$0xff] %v7835_v0  ;;  %v1397_v40 = vrot.slane %v9471_v54, 7  ;;  %2238 = vst [vmem:[#allocation2 + $0x354] sm:$0xf] %v1377_v59  ;;  %v1496_v58 = vld [vmem:[#allocation2 + $0x3f0] sm:$0xf]  ;;  %v1453_v54 = vsel %vm7821_vm14, %v7650_v60, %v1452_v56  ;;  %v1393_v11 = vsel %vm7620_vm9, %v1385_v48, %v1392_v19  ;;  %v1465_v48 = vsel %vm7821_vm14, %v7699_v52, %v1464_v50 }
 0x2e3   : > { %v1492_v12 = vld [vmem:[#allocation2 + $0x3a8] sm:$0xf]  ;;  %v1500_v59 = vld [vmem:[#allocation2 + $0x438] sm:$0xf]  ;;  %v9473_v46 = vshrl.u32 %v7566_v28, 16  ;;  %v1469_v56 = vsel %vm7821_vm14, %v7719_v20, %v1468_v21  ;;  %v9474_v19 = vshll.u32 %v7566_v28, 16  ;;  %v1477_v29 = vsel %vm7821_vm14, %v7755_v55, %v1476_v6 }
 0x2e4   : > { %v7860_v62 = vor.u32 %v1398_v35, %v1397_v40  ;;  %v1401_v43 = vrot.slane %v1397_v40, 4  ;;  %1446 = vst [vmem:[#allocation2 + $0x48] sm:$0xf] %v1445_v2  ;;  %1450 = vst [vmem:[#allocation2 + $0x90] sm:$0xf] %v1449_v7  ;;  %v1473_v40 = vsel %vm7821_vm14, %v7737_v27, %v1472_v15  ;;  %v1481_v21 = vsel %vm7821_vm14, %v7761_v8, %v1480_v32 }
 0x2e5   : > { %v1405_v24 = vrot.slane %v9473_v46, 7  ;;  %1454 = vst [vmem:[#allocation2 + $0xd8] sm:$0xf] %v1453_v54  ;;  %1458 = vst [vmem:[#allocation2 + $0x120] sm:$0xf] %v1457_v51  ;;  %v1485_v50 = vsel %vm7821_vm14, %v7777_v47, %v1484_v25  ;;  %v1493_v15 = vsel %vm7821_vm14, %v7813_v36, %v1492_v12  ;;  %v1497_v6 = vsel %vm7821_vm14, %v7835_v0, %v1496_v58 }
 0x2e6   : > { %9472 = vst [vmem:[#allocation33_spill] sm:$0xff] %v7860_v62  ;;  %1499 = vst [vmem:[#allocation2 + $0x414] sm:$0xf] %v1393_v11  ;;  %v1501_v32 = vsel %vm7821_vm14, %v7860_v62, %v1500_v59  ;;  %v9476_v12 = vshll.u32 %v7440_v45, 16  ;;  %v9477_v7 = vshll.u32 %v7442_v42, 16  ;;  %v9478_v54 = vshrl.u32 %v7442_v42, 16 }
 0x2e7   : > { %1974 = vst [vmem:[#allocation2 + $0x3d8] sm:$0xf] %v1393_v11  ;;  %2242 = vst [vmem:[#allocation2 + $0x39c] sm:$0xf] %v1393_v11  ;;  %v1408_v38 = vor.u32 %v9474_v19, %v1405_v24  ;;  %v1489_v24 = vsel %vm7821_vm14, %v7795_v63, %v1488_v10  ;;  %v9475_v10 = vshrl.u32 %v7440_v45, 16  ;;  %v9479_v59 = vshrl.u32 %v7444_v44, 16 }
 0x2e8   : > { %1462 = vst [vmem:[#allocation2 + $0x168] sm:$0xf] %v1461_v41  ;;  %1466 = vst [vmem:[#allocation2 + $0x1b0] sm:$0xf] %v1465_v48  ;;  %v1623_v2 = vrot.slane %v9476_v12, 5  ;;  %v1626_v58 = vrot.slane %v9477_v7, 5 }
 0x2e9   : > { %1470 = vst [vmem:[#allocation2 + $0x1f8] sm:$0xf] %v1469_v56  ;;  %1474 = vst [vmem:[#allocation2 + $0x240] sm:$0xf] %v1473_v40  ;;  %v1409_v25 = vsel %vm7620_vm9, %v1401_v43, %v1408_v38  ;;  %v1622_v11 = vrot.slane %v9475_v10, 4  ;;  %v1628_v51 = vrot.slane %v9478_v54, 4 }
 0x2ea   : > { %1478 = vst [vmem:[#allocation2 + $0x288] sm:$0xf] %v1477_v29  ;;  %1482 = vst [vmem:[#allocation2 + $0x2d0] sm:$0xf] %v1481_v21  ;;  %v1631_v43 = vrot.slane %v9479_v59, 4  ;;  %v9480_v46 = vshll.u32 %v7444_v44, 16 }
 0x2eb   : > { %1486 = vst [vmem:[#allocation2 + $0x318] sm:$0xf] %v1485_v50  ;;  %1490 = vst [vmem:[#allocation2 + $0x360] sm:$0xf] %v1489_v24  ;;  %v9481_v48 = vshll.u32 %v7446_v53, 16  ;;  %v1624_v40 = vor.u32 %v1623_v2, %v1622_v11  ;;  %v9484_v42 = vshrl.u32 %v7446_v53, 16  ;;  %v1629_v24 = vor.u32 %v1628_v51, %v1626_v58 }
 0x2ec   : > { %1494 = vst [vmem:[#allocation2 + $0x3a8] sm:$0xf] %v1493_v15  ;;  %1498 = vst [vmem:[#allocation2 + $0x3f0] sm:$0xf] %v1497_v6  ;;  %v1632_v41 = vrot.slane %v9480_v46, 5  ;;  %v9485_v38 = vshrl.u32 %v7448_v61, 16 }
 0x2ed   : > { %1502 = vst [vmem:[#allocation2 + $0x438] sm:$0xf] %v1501_v32  ;;  %1503 = vst [vmem:[#allocation2 + $0x45c] sm:$0xf] %v1409_v25  ;;  %v1635_v56 = vrot.slane %v9481_v48, 5  ;;  %v1637_v19 = vrot.slane %v9484_v42, 4 }
 0x2ee   : > { %1978 = vst [vmem:[#allocation2 + $0x420] sm:$0xf] %v1409_v25  ;;  %2246 = vst [vmem:[#allocation2 + $0x3e4] sm:$0xf] %v1409_v25  ;;  %v1640_v29 = vrot.slane %v9485_v38, 4  ;;  %v9486_v44 = vshll.u32 %v7448_v61, 16  ;;  %v1633_v15 = vor.u32 %v1632_v41, %v1631_v43 }
 0x2ef   : > { %v6371_v50 = vld [vmem:[#allocation9 + $0x148] sm:$0xff]   ;;  %v9487_v6 = vshll.u32 %v7450_v49, 16  ;;  %v9488_v25 = vshrl.u32 %v7450_v49, 16  ;;  %v1625_v11 = vrot.slane %v1624_v40, 4  ;;  %v1638_v2 = vor.u32 %v1637_v19, %v1635_v56  ;;  %v6293_v48 = vld [vmem:[#allocation2 + $0x94] ss:$36 sps:$4 sm:$0xff]  }
 0x2f0   : > { %v1641_v21 = vrot.slane %v9486_v44, 5  ;;  %v6287_v12 = vld [vmem:[#allocation2 + $0x4c] ss:$36 sps:$4 sm:$0xff]   ;;  %v9489_v7 = vshrl.u32 %v7452_v33, 16  ;;  %5720 = vmatprep.subr.bf16.mxu1 %v6371_v50  ;;  %v7933_v61 = vrot.slane %v1629_v24, 4  ;;  %v1634_v46 = vrot.slane %v1633_v15, 4 }
 0x2f1   : > { %v1644_v32 = vrot.slane %v9487_v6, 5  ;;  %v1646_v10 = vrot.slane %v9488_v25, 4  ;;  %v6292_v59 = vld [vmem:[#allocation2 + $0x48] ss:$36 sps:$4 sm:$0xff]   ;;  %v9490_v43 = vshll.u32 %v7452_v33, 16  ;;  %3905 = vmatprep.mubr.bf16.mxu1 %v6287_v12  ;;  %v1627_v49 = vsel %vm7917_vm15, %v1625_v11, %v1626_v58 }
 0x2f2   : > { %v1642_v53 = vor.u32 %v1641_v21, %v1640_v29  ;;  %v1649_v54 = vrot.slane %v9489_v7, 4  ;;  %v7939_v40 = vrot.slane %v1638_v2, 4  ;;  %v9492_v19 = vshll.u32 %v7454_v37, 16  ;;  %3906 = vmatmul.mubr.bf16.gmra.mxu1 %v6292_v59  ;;  %1787 = vst [vmem:[#allocation2 + $0x50] sm:$0xf] %v1627_v49 }
 0x2f3   : > { %v1647_v51 = vor.u32 %v1646_v10, %v1644_v32  ;;  %v1650_v41 = vrot.slane %v9490_v43, 5  ;;  %v1636_v29 = vsel %vm7917_vm15, %v1634_v46, %v1635_v56  ;;  %v9493_v33 = vshrl.u32 %v7454_v37, 16  ;;  %2076 = vst [vmem:[#allocation2 + $0x14] sm:$0xf] %v1627_v49  ;;  %3913 = vmatprep.mubr.bf16.mxu1 %v6293_v48  ;;  %v8391_v45 = vld [vmem:[#allocation2 + $0x1f4] sm:$0xf] }
 0x2f4   : > { %9491 = vst [vmem:[#allocation34_spill] sm:$0xff] %v7939_v40  ;;  %v1643_v42 = vrot.slane %v1642_v53, 4  ;;  %v1653_v38 = vrot.slane %v9492_v19, 5  ;;  %v9494_v24 = vshrl.u32 %v7456_v57, 16  ;;  %v9495_v6 = vshll.u32 %v7456_v57, 16 }
 0x2f5   : > { %v7945_v44 = vrot.slane %v1647_v51, 4  ;;  %v1651_v21 = vor.u32 %v1650_v41, %v1649_v54  ;;  %v1655_v50 = vrot.slane %v9493_v33, 4  ;;  %v9496_v56 = vshll.u32 %v7458_v30, 16  ;;  %1792 = vst [vmem:[#allocation2 + $0x98] sm:$0xf] %v1636_v29 }
 0x2f6   : > { %v1645_v58 = vsel %vm7917_vm15, %v1643_v42, %v1644_v32  ;;  %v1658_v15 = vrot.slane %v9494_v24, 4  ;;  %v1659_v25 = vrot.slane %v9495_v6, 5  ;;  %2080 = vst [vmem:[#allocation2 + $0x5c] sm:$0xf] %v1636_v29  ;;  %2333 = vst [vmem:[#allocation2 + $0x20] sm:$0xf] %v1636_v29 }
 0x2f7   : > { %v1662_v10 = vrot.slane %v9496_v56, 5  ;;  %v1652_v37 = vrot.slane %v1651_v21, 4  ;;  %v1656_v12 = vor.u32 %v1655_v50, %v1653_v38  ;;  %v9497_v11 = vshrl.u32 %v7458_v30, 16  ;;  %1796 = vst [vmem:[#allocation2 + $0xe0] sm:$0xf] %v1645_v58 }
 0x2f8   : > { %v9498_v53 = vshrl.u32 %v7464_v5, 16  ;;  %2084 = vst [vmem:[#allocation2 + $0xa4] sm:$0xf] %v1645_v58  ;;  %2337 = vst [vmem:[#allocation2 + $0x68] sm:$0xf] %v1645_v58  ;;  %v1660_v7 = vor.u32 %v1659_v25, %v1658_v15  ;;  %v9499_v57 = vshll.u32 %v7464_v5, 16 }
 0x2f9   : > { %v1664_v2 = vrot.slane %v9497_v11, 4  ;;  %v9500_v59 = vshll.u32 %v7466_v13, 16  ;;  %v9501_v51 = vshrl.u32 %v7466_v13, 16  ;;  %v1654_v30 = vsel %vm7917_vm15, %v1652_v37, %v1653_v38  ;;  %v6298_v13 = vld [vmem:[#allocation2 + $0x90] ss:$36 sps:$4 sm:$0xff]  }
 0x2fa   : > { %v1667_v32 = vrot.slane %v9498_v53, 4  ;;  %v1668_v54 = vrot.slane %v9499_v57, 5  ;;  %v7969_v41 = vrot.slane %v1656_v12, 4  ;;  %v9502_v49 = vshrl.u32 %v7468_v1, 16  ;;  %1800 = vst [vmem:[#allocation2 + $0x128] sm:$0xf] %v1654_v30  ;;  %3914 = vmatmul.mubr.bf16.gmra.mxu1 %v6298_v13 }
 0x2fb   : > { %v1671_v46 = vrot.slane %v9500_v59, 5  ;;  %v1673_v43 = vrot.slane %v9501_v51, 4  ;;  %v1665_v48 = vor.u32 %v1664_v2, %v1662_v10  ;;  %v1661_v19 = vrot.slane %v1660_v7, 4  ;;  %2088 = vst [vmem:[#allocation2 + $0xec] sm:$0xf] %v1654_v30 }
 0x2fc   : > { %v1676_v42 = vrot.slane %v9502_v49, 4  ;;  %v1669_v29 = vor.u32 %v1668_v54, %v1667_v32  ;;  %v9503_v5 = vshll.u32 %v7468_v1, 16  ;;  %2341 = vst [vmem:[#allocation2 + $0xb0] sm:$0xf] %v1654_v30  ;;  %v6301_v50 = vld [vmem:[#allocation2 + $0xdc] ss:$36 sps:$4 sm:$0xff]  }
 0x2fd   : > { %v1674_v21 = vor.u32 %v1673_v43, %v1671_v46  ;;  %v7975_v58 = vrot.slane %v1665_v48, 4  ;;  %v9504_v38 = vshll.u32 %v7470_v9, 16  ;;  %v9505_v15 = vshrl.u32 %v7470_v9, 16  ;;  %3921 = vmatprep.mubr.bf16.mxu1 %v6301_v50 }
 0x2fe   : > { %v1677_v33 = vrot.slane %v9503_v5, 5  ;;  %v9506_v25 = vshrl.u32 %v7484_v31, 16  ;;  %v1663_v1 = vsel %vm7917_vm15, %v1661_v19, %v1662_v10  ;;  %v1670_v37 = vrot.slane %v1669_v29, 4 }
 0x2ff   : > { %v1680_v24 = vrot.slane %v9504_v38, 5  ;;  %v1682_v6 = vrot.slane %v9505_v15, 4  ;;  %v7985_v12 = vrot.slane %v1674_v21, 4  ;;  %v9507_v53 = vshll.u32 %v7484_v31, 16  ;;  %1804 = vst [vmem:[#allocation2 + $0x170] sm:$0xf] %v1663_v1 }
 0x300   : > { %v1685_v56 = vrot.slane %v9506_v25, 4  ;;  %v1678_v11 = vor.u32 %v1677_v33, %v1676_v42  ;;  %v9508_v7 = vshll.u32 %v7486_v39, 16  ;;  %v9509_v9 = vshrl.u32 %v7486_v39, 16  ;;  %2092 = vst [vmem:[#allocation2 + $0x134] sm:$0xf] %v1663_v1  ;;  %v9514_v33 = vld [vmem:[#allocation23_spill] sm:$0xff] }
 0x301   : > { %v1683_v2 = vor.u32 %v1682_v6, %v1680_v24  ;;  %v1686_v32 = vrot.slane %v9507_v53, 5  ;;  %2345 = vst [vmem:[#allocation2 + $0xf8] sm:$0xf] %v1663_v1  ;;  %v1672_v10 = vsel %vm7917_vm15, %v1670_v37, %v1671_v46  ;;  %v9510_v51 = vshrl.u32 %v7488_v17, 16  ;;  %v9517_v25 = vld [vmem:[#allocation24_spill] sm:$0xff]  ;;  %v9520_v53 = vld [vmem:[#allocation25_spill] sm:$0xff] }
 0x302   : > { %v1689_v57 = vrot.slane %v9508_v7, 5  ;;  %v1691_v54 = vrot.slane %v9509_v9, 4  ;;  %v1679_v59 = vrot.slane %v1678_v11, 4  ;;  %v9511_v31 = vshll.u32 %v7488_v17, 16  ;;  %1808 = vst [vmem:[#allocation2 + $0x1b8] sm:$0xf] %v1672_v10 }
 0x303   : > { %v1694_v43 = vrot.slane %v9510_v51, 4  ;;  %v7999_v48 = vrot.slane %v1683_v2, 4  ;;  %v1687_v49 = vor.u32 %v1686_v32, %v1685_v56  ;;  %v9512_v39 = vshll.u32 %v7490_v26, 16  ;;  %2096 = vst [vmem:[#allocation2 + $0x17c] sm:$0xf] %v1672_v10 }
 0x304   : > { %v1695_v30 = vrot.slane %v9511_v31, 5  ;;  %v1692_v42 = vor.u32 %v1691_v54, %v1689_v57  ;;  %2349 = vst [vmem:[#allocation2 + $0x140] sm:$0xf] %v1672_v10  ;;  %v1681_v46 = vsel %vm7917_vm15, %v1679_v59, %v1680_v24  ;;  %v9513_v21 = vshrl.u32 %v7490_v26, 16  ;;  %v6375_v24 = vld [vmem:[#allocation9 + $0x108] sm:$0xff]  }
 0x305   : > { %v1698_v19 = vrot.slane %v9512_v39, 5  ;;  %v9515_v17 = vshrl.u32 %v9514_v33, 16  ;;  %v1688_v50 = vrot.slane %v1687_v49, 4  ;;  %v9516_v15 = vshll.u32 %v9514_v33, 16  ;;  %1812 = vst [vmem:[#allocation2 + $0x200] sm:$0xf] %v1681_v46  ;;  %5721 = vmatpush3.bf16.msra.mxu1 %v6375_v24 }
 0x306   : > { %v1696_v29 = vor.u32 %v1695_v30, %v1694_v43  ;;  %v1700_v5 = vrot.slane %v9513_v21, 4  ;;  %v8009_v38 = vrot.slane %v1692_v42, 4  ;;  %v9518_v56 = vshll.u32 %v9517_v25, 16  ;;  %2100 = vst [vmem:[#allocation2 + $0x1c4] sm:$0xf] %v1681_v46  ;;  %v9523_v43 = vld [vmem:[#allocation26_spill] sm:$0xff] }
 0x307   : > { %v1703_v13 = vrot.slane %v9515_v17, 4  ;;  %v1704_v6 = vrot.slane %v9516_v15, 5  ;;  %2353 = vst [vmem:[#allocation2 + $0x188] sm:$0xf] %v1681_v46  ;;  %v9519_v26 = vshrl.u32 %v9517_v25, 16  ;;  %v9521_v32 = vshrl.u32 %v9520_v53, 16 }
 0x308   : > { %v1707_v1 = vrot.slane %v9518_v56, 5  ;;  %v1697_v37 = vrot.slane %v1696_v29, 4  ;;  %v1701_v11 = vor.u32 %v1700_v5, %v1698_v19  ;;  %v6305_v9 = vld [vmem:[#allocation2 + $0xd8] ss:$36 sps:$4 sm:$0xff]   ;;  %v1690_v54 = vsel %vm7917_vm15, %v1688_v50, %v1689_v57  ;;  %v6307_v49 = vld [vmem:[#allocation2 + $0x124] ss:$36 sps:$4 sm:$0xff]  }
 0x309   : > { %v1709_v2 = vrot.slane %v9519_v26, 4  ;;  %v1712_v7 = vrot.slane %v9521_v32, 4  ;;  %v1705_v10 = vor.u32 %v1704_v6, %v1703_v13  ;;  %v9522_v59 = vshll.u32 %v9520_v53, 16  ;;  %1816 = vst [vmem:[#allocation2 + $0x248] sm:$0xf] %v1690_v54  ;;  %3922 = vmatmul.mubr.bf16.gmra.mxu1 %v6305_v9  ;;  %v9526_v33 = vld [vmem:[#allocation27_spill] sm:$0xff] }
 0x30a   : > { %v9524_v31 = vshll.u32 %v9523_v43, 16  ;;  %v1699_v42 = vsel %vm7917_vm15, %v1697_v37, %v1698_v19  ;;  %v8027_v39 = vrot.slane %v1701_v11, 4  ;;  %v9525_v29 = vshrl.u32 %v9523_v43, 16  ;;  %2104 = vst [vmem:[#allocation2 + $0x20c] sm:$0xf] %v1690_v54  ;;  %3929 = vmatprep.mubr.bf16.mxu1 %v6307_v49  ;;  %v9529_v25 = vld [vmem:[#allocation28_spill] sm:$0xff] }
 0x30b   : > { %v1713_v51 = vrot.slane %v9522_v59, 5  ;;  %v1710_v46 = vor.u32 %v1709_v2, %v1707_v1  ;;  %2357 = vst [vmem:[#allocation2 + $0x1d0] sm:$0xf] %v1690_v54  ;;  %v1706_v57 = vrot.slane %v1705_v10, 4  ;;  %v9527_v17 = vshrl.u32 %v9526_v33, 16  ;;  %v6387_v26 = vld [vmem:[#allocation9 + $0x140] sm:$0xff]  }
 0x30c   : > { %v1716_v30 = vrot.slane %v9524_v31, 5  ;;  %v1718_v21 = vrot.slane %v9525_v29, 4  ;;  %v9528_v50 = vshll.u32 %v9526_v33, 16  ;;  %1820 = vst [vmem:[#allocation2 + $0x290] sm:$0xf] %v1699_v42  ;;  %v9530_v56 = vshll.u32 %v9529_v25, 16  ;;  %5722 = vmatprep.subr.bf16.mxu1 %v6387_v26 }
 0x30d   : > { %v1714_v5 = vor.u32 %v1713_v51, %v1712_v7  ;;  %v1721_v13 = vrot.slane %v9527_v17, 4  ;;  %2108 = vst [vmem:[#allocation2 + $0x254] sm:$0xf] %v1699_v42  ;;  %2361 = vst [vmem:[#allocation2 + $0x218] sm:$0xf] %v1699_v42  ;;  %v8035_v19 = vrot.slane %v1710_v46, 4  ;;  %v1708_v2 = vsel %vm7917_vm15, %v1706_v57, %v1707_v1 }
 0x30e   : > { %v1722_v15 = vrot.slane %v9528_v50, 5  ;;  %v1719_v6 = vor.u32 %v1718_v21, %v1716_v30  ;;  %v1725_v24 = vrot.slane %v9530_v56, 5  ;;  %v9531_v37 = vshrl.u32 %v9529_v25, 16  ;;  %v9532_v7 = vld [vmem:[#allocation29_spill] sm:$0xff]  ;;  %v6391_v10 = vld [vmem:[#allocation9 + $0x100] sm:$0xff]   ;;  %v9535_v42 = vld [vmem:[#allocation30_spill] sm:$0xff] }
 0x30f   : > { %v1715_v53 = vrot.slane %v1714_v5, 4  ;;  %v9533_v9 = vshrl.u32 %v9532_v7, 16  ;;  %v1789_v59 = vld [vmem:[#allocation2 + $0x74] sm:$0xf]  ;;  %v9534_v31 = vshll.u32 %v9532_v7, 16  ;;  %v9536_v46 = vshll.u32 %v9535_v42, 16  ;;  %5723 = vmatpush3.bf16.msra.mxu1 %v6391_v10 }
 0x310   : > { %v1727_v11 = vrot.slane %v9531_v37, 4  ;;  %v1723_v32 = vor.u32 %v1722_v15, %v1721_v13  ;;  %v8045_v51 = vrot.slane %v1719_v6, 4  ;;  %1824 = vst [vmem:[#allocation2 + $0x2d8] sm:$0xf] %v1708_v2  ;;  %2112 = vst [vmem:[#allocation2 + $0x29c] sm:$0xf] %v1708_v2 }
 0x311   : > { %v1730_v54 = vrot.slane %v9533_v9, 4  ;;  %v1731_v49 = vrot.slane %v9534_v31, 5  ;;  %v1734_v29 = vrot.slane %v9536_v46, 5  ;;  %2365 = vst [vmem:[#allocation2 + $0x260] sm:$0xf] %v1708_v2  ;;  %v1717_v5 = vsel %vm7917_vm15, %v1715_v53, %v1716_v30  ;;  %v6406_v21 = vld [vmem:[#allocation9 + $0x1d0] sm:$0xff]  }
 0x312   : > { %v1728_v43 = vor.u32 %v1727_v11, %v1725_v24  ;;  %v6312_v1 = vld [vmem:[#allocation2 + $0x120] ss:$36 sps:$4 sm:$0xff]   ;;  %v1793_v57 = vld [vmem:[#allocation2 + $0xbc] sm:$0xf]  ;;  %v1724_v33 = vrot.slane %v1723_v32, 4  ;;  %v9539_v17 = vshrl.u32 %v9535_v42, 16 }
 0x313   : > { %v9540_v50 = vshrl.u32 %v7554_v22, 16  ;;  %v6315_v6 = vld [vmem:[#allocation2 + $0x16c] ss:$36 sps:$4 sm:$0xff]   ;;  %v1797_v56 = vld [vmem:[#allocation2 + $0x104] sm:$0xf]  ;;  %v1732_v11 = vor.u32 %v1731_v49, %v1730_v54  ;;  %v9541_v26 = vshll.u32 %v7554_v22, 16  ;;  %3930 = vmatmul.mubr.bf16.gmra.mxu1 %v6312_v1 }
 0x314   : > { %v1736_v13 = vrot.slane %v9539_v17, 4  ;;  %v1801_v25 = vld [vmem:[#allocation2 + $0x14c] sm:$0xf]  ;;  %v8063_v37 = vrot.slane %v1728_v43, 4  ;;  %v9542_v7 = vshll.u32 %v7558_v34, 16  ;;  %v1726_v9 = vsel %vm7917_vm15, %v1724_v33, %v1725_v24  ;;  %3937 = vmatprep.mubr.bf16.mxu1 %v6315_v6 }
 0x315   : > { %v1739_v15 = vrot.slane %v9540_v50, 4  ;;  %v1740_v2 = vrot.slane %v9541_v26, 5  ;;  %1828 = vst [vmem:[#allocation2 + $0x320] sm:$0xf] %v1717_v5  ;;  %2116 = vst [vmem:[#allocation2 + $0x2e4] sm:$0xf] %v1717_v5 }
 0x316   : > { %v1743_v30 = vrot.slane %v9542_v7, 5  ;;  %2369 = vst [vmem:[#allocation2 + $0x2a8] sm:$0xf] %v1717_v5  ;;  %v1809_v53 = vld [vmem:[#allocation2 + $0x1dc] sm:$0xf]  ;;  %v1737_v10 = vor.u32 %v1736_v13, %v1734_v29  ;;  %v9543_v31 = vshrl.u32 %v7558_v34, 16 }
 0x317   : > { %v1805_v32 = vld [vmem:[#allocation2 + $0x194] sm:$0xf]  ;;  %v9544_v54 = vshrl.u32 %v7562_v16, 16  ;;  %v8075_v22 = vld [vmem:[#allocation2 + $0x26c] sm:$0xf]  ;;  %v1733_v17 = vrot.slane %v1732_v11, 4  ;;  %v1741_v5 = vor.u32 %v1740_v2, %v1739_v15 }
 0x318   : > { %v1745_v43 = vrot.slane %v9543_v31, 4  ;;  %v8077_v42 = vld [vmem:[#allocation2 + $0x224] sm:$0xf]  ;;  %v8079_v46 = vld [vmem:[#allocation2 + $0x2b4] sm:$0xf]  ;;  %v1749_v50 = vrot.slane %v1398_v35, 5  ;;  %v1790_v35 = vsel %vm8053_vm0, %v7933_v61, %v1789_v59 }
 0x319   : > { %v1748_v49 = vrot.slane %v9544_v54, 4  ;;  %v9545_v24 = vshll.u32 %v7566_v28, 16  ;;  %1832 = vst [vmem:[#allocation2 + $0x368] sm:$0xf] %v1726_v9  ;;  %2120 = vst [vmem:[#allocation2 + $0x32c] sm:$0xf] %v1726_v9  ;;  %v1735_v15 = vsel %vm7917_vm15, %v1733_v17, %v1734_v29  ;;  %v1798_v29 = vsel %vm8053_vm0, %v7945_v44, %v1797_v56 }
 0x31a   : > { %2373 = vst [vmem:[#allocation2 + $0x2f0] sm:$0xf] %v1726_v9  ;;  %v1825_v34 = vld [vmem:[#allocation2 + $0x2fc] sm:$0xf]  ;;  %v1833_v13 = vld [vmem:[#allocation2 + $0x38c] sm:$0xf]  ;;  %v1746_v31 = vor.u32 %v1745_v43, %v1743_v30  ;;  %v1794_v9 = vsel %vm8053_vm0, %v7939_v40, %v1793_v57  ;;  %v1806_v56 = vsel %vm8053_vm0, %v7975_v58, %v1805_v32  ;;  %v1818_v32 = vsel %vm8053_vm0, %v8009_v38, %v8075_v22 }
 0x31b   : > { %v1752_v33 = vrot.slane %v9545_v24, 5  ;;  %v1829_v26 = vld [vmem:[#allocation2 + $0x344] sm:$0xf]  ;;  %v8085_v7 = vrot.slane %v1737_v10, 4  ;;  %v9546_v54 = vshrl.u32 %v7566_v28, 16  ;;  %v1742_v1 = vrot.slane %v1741_v5, 4 }
 0x31c   : > { %v8092_v16 = vld [vmem:[#allocation2 + $0x41c] sm:$0xf]  ;;  %v1750_v2 = vor.u32 %v1749_v50, %v1748_v49  ;;  %1791 = vst [vmem:[#allocation2 + $0x74] sm:$0xf] %v1790_v35  ;;  %v8099_v10 = vld [vmem:[#allocation2 + $0x54] sm:$0xf]  ;;  %v1802_v49 = vsel %vm8053_vm0, %v7969_v41, %v1801_v25  ;;  %v1810_v25 = vsel %vm8053_vm0, %v7985_v12, %v1809_v53  ;;  %v1822_v53 = vsel %vm8053_vm0, %v8027_v39, %v8079_v46 }
 0x31d   : > { %v1754_v11 = vrot.slane %v9546_v54, 4  ;;  %v8101_v28 = vld [vmem:[#allocation2 + $0xc] sm:$0xf]  ;;  %v8103_v43 = vld [vmem:[#allocation2 + $0x9c] sm:$0xf]  ;;  %v8105_v6 = vrot.slane %v1746_v31, 4  ;;  %v1744_v50 = vsel %vm7917_vm15, %v1742_v1, %v1743_v30  ;;  %v1814_v30 = vsel %vm8053_vm0, %v7999_v48, %v8077_v42 }
 0x31e   : > { %v1837_v59 = vld [vmem:[#allocation2 + $0x3d4] sm:$0xf]  ;;  %1795 = vst [vmem:[#allocation2 + $0xbc] sm:$0xf] %v1794_v9  ;;  %1836 = vst [vmem:[#allocation2 + $0x3b0] sm:$0xf] %v1735_v15  ;;  %v1826_v46 = vsel %vm8053_vm0, %v8035_v19, %v1825_v34 }
 0x31f   : > { %v1755_v24 = vor.u32 %v1754_v11, %v1752_v33  ;;  %2124 = vst [vmem:[#allocation2 + $0x374] sm:$0xf] %v1735_v15  ;;  %2377 = vst [vmem:[#allocation2 + $0x338] sm:$0xf] %v1735_v15  ;;  %v8113_v57 = vld [vmem:[#allocation2 + $0xe4] sm:$0xf]  ;;  %v1842_v34 = vsel %vm8053_vm0, %v8105_v6, %v8092_v16 }
 0x320   : > { %v8115_v17 = vld [vmem:[#allocation2 + $0x12c] sm:$0xf]  ;;  %v1845_v5 = vld [vmem:[#allocation2 + $0x464] sm:$0xf]  ;;  %v1751_v31 = vrot.slane %v1750_v2, 4  ;;  %v8143_v2 = vld [vmem:[#allocation9 + $0x238] sm:$0xff]  }
 0x321   : > { %1799 = vst [vmem:[#allocation2 + $0x104] sm:$0xf] %v1798_v29  ;;  %1803 = vst [vmem:[#allocation2 + $0x14c] sm:$0xf] %v1802_v49  ;;  %v6319_v54 = vld [vmem:[#allocation2 + $0x168] ss:$36 sps:$4 sm:$0xff]   ;;  %v1830_v29 = vsel %vm8053_vm0, %v8045_v51, %v1829_v26  ;;  %v1834_v49 = vsel %vm8053_vm0, %v8063_v37, %v1833_v13  ;;  %6056 = vmatprep.subr.bf16.mxu1 %v8143_v2 }
 0x322   : > { %v8125_v11 = vld [vmem:[#allocation2 + $0x174] sm:$0xf]  ;;  %v8127_v35 = vld [vmem:[#allocation2 + $0x1bc] sm:$0xf]  ;;  %v8129_v15 = vrot.slane %v1755_v24, 4  ;;  %9547 = vst [vmem:[#allocation23_spill] sm:$0xff] %v8143_v2  ;;  %v1753_v22 = vsel %vm7917_vm15, %v1751_v31, %v1752_v33  ;;  %v1838_v33 = vsel %vm8053_vm0, %v8085_v7, %v1837_v59  ;;  %3938 = vmatmul.mubr.bf16.gmra.mxu1 %v6319_v54 }
 0x323   : > { %1807 = vst [vmem:[#allocation2 + $0x194] sm:$0xf] %v1806_v56  ;;  %1811 = vst [vmem:[#allocation2 + $0x1dc] sm:$0xf] %v1810_v25  ;;  %v6321_v1 = vld [vmem:[#allocation2 + $0x1b4] ss:$36 sps:$4 sm:$0xff]  }
 0x324   : > { %1840 = vst [vmem:[#allocation2 + $0x3f8] sm:$0xf] %v1744_v50  ;;  %2128 = vst [vmem:[#allocation2 + $0x3bc] sm:$0xf] %v1744_v50  ;;  %v8145_v9 = vld [vmem:[#allocation2 + $0x204] sm:$0xf]  ;;  %v1846_v13 = vsel %vm8053_vm0, %v8129_v15, %v1845_v5  ;;  %v1920_v5 = vsel %vm7821_vm14, %v7632_v18, %v8101_v28  ;;  %v1932_v18 = vsel %vm7821_vm14, %v7672_v3, %v8113_v57  ;;  %3945 = vmatprep.mubr.bf16.mxu1 %v6321_v1 }
 0x325   : > { %2381 = vst [vmem:[#allocation2 + $0x380] sm:$0xf] %v1744_v50  ;;  %v8147_v24 = vld [vmem:[#allocation2 + $0x294] sm:$0xf]  ;;  %v8149_v42 = vld [vmem:[#allocation2 + $0x24c] sm:$0xf]  ;;  %v1940_v57 = vsel %vm7821_vm14, %v7699_v52, %v8125_v11  ;;  %v1948_v11 = vsel %vm7821_vm14, %v7737_v27, %v8145_v9 }
 0x326   : > { %1815 = vst [vmem:[#allocation2 + $0x224] sm:$0xf] %v1814_v30  ;;  %1819 = vst [vmem:[#allocation2 + $0x26c] sm:$0xf] %v1818_v32  ;;  %v8162_v50 = vld [vmem:[#allocation2 + $0x324] sm:$0xf] }
 0x327   : > { %1823 = vst [vmem:[#allocation2 + $0x2b4] sm:$0xf] %v1822_v53  ;;  %v8164_v56 = vld [vmem:[#allocation2 + $0x2dc] sm:$0xf]  ;;  %1827 = vst [vmem:[#allocation2 + $0x2fc] sm:$0xf] %v1826_v46 }
 0x328   : > { %1831 = vst [vmem:[#allocation2 + $0x344] sm:$0xf] %v1830_v29  ;;  %1835 = vst [vmem:[#allocation2 + $0x38c] sm:$0xf] %v1834_v49  ;;  %v9548_v26 = vld [vmem:[#allocation21_spill] sm:$0xff]  ;;  %v9549_v16 = vld [vmem:[#allocation22_spill] sm:$0xff]  ;;  %v1960_v9 = vsel %vm7821_vm14, %v7777_v47, %v8164_v56 }
 0x329   : > { %1844 = vst [vmem:[#allocation2 + $0x440] sm:$0xf] %v1753_v22  ;;  %v8178_v31 = vpack.c.bf16 %v9548_v26, %v9548_v26  ;;  %2132 = vst [vmem:[#allocation2 + $0x404] sm:$0xf] %v1753_v22  ;;  %v8181_v25 = vld [vmem:[#allocation2 + $0x3b4] sm:$0xf]  ;;  %v8185_v30 = vpack.c.bf16 %v9549_v16, %v9549_v16 }
 0x32a   : > { %2385 = vst [vmem:[#allocation2 + $0x3c8] sm:$0xf] %v1753_v22  ;;  %v1967_v59 = vld [vmem:[#allocation2 + $0x36c] sm:$0xf]  ;;  %1839 = vst [vmem:[#allocation2 + $0x3d4] sm:$0xf] %v1838_v33  ;;  %v1928_v22 = vsel %vm7821_vm14, %v7650_v60, %v8103_v43 }
 0x32b   : > { %1843 = vst [vmem:[#allocation2 + $0x41c] sm:$0xf] %v1842_v34  ;;  %1847 = vst [vmem:[#allocation2 + $0x464] sm:$0xf] %v1846_v13  ;;  %v9550_v32 = vld [vmem:[#allocation31_spill] sm:$0xff]  ;;  %v1902_v29 = vshrl.u32 %v8178_v31, 16 }
 0x32c   : > { %v1924_v53 = vsel %vm7821_vm14, %v9550_v32, %v8099_v10  ;;  %v1975_v46 = vld [vmem:[#allocation2 + $0x3fc] sm:$0xf]  ;;  %v1905_v49 = vshll.u32 %v8178_v31, 16  ;;  %1921 = vst [vmem:[#allocation2 + $0xc] sm:$0xf] %v1920_v5  ;;  %v1936_v10 = vsel %vm7821_vm14, %v7685_v23, %v8115_v17  ;;  %v1910_v54 = vshrl.u32 %v8185_v30, 16 }
 0x32d   : > { %1925 = vst [vmem:[#allocation2 + $0x54] sm:$0xf] %v1924_v53  ;;  %1929 = vst [vmem:[#allocation2 + $0x9c] sm:$0xf] %v1928_v22  ;;  %v8211_v28 = vld [vmem:[#allocation2 + $0x80] sm:$0xf]  ;;  %v1944_v17 = vsel %vm7821_vm14, %v7719_v20, %v8127_v35  ;;  %v1952_v35 = vsel %vm7821_vm14, %v7755_v55, %v8149_v42  ;;  %v1968_v42 = vsel %vm7821_vm14, %v7813_v36, %v1967_v59 }
 0x32e   : > { %2015 = vst [vmem:[#allocation2 + $0x448] sm:$0xf] %v8178_v31  ;;  %2281 = vst [vmem:[#allocation2 + $0x40c] sm:$0xf] %v8178_v31  ;;  %v2077_v43 = vld [vmem:[#allocation2 + $0x38] sm:$0xf]  ;;  %v1956_v31 = vsel %vm7821_vm14, %v7761_v8, %v8147_v24  ;;  %v1964_v24 = vsel %vm7821_vm14, %v7795_v63, %v8162_v50  ;;  %v1972_v50 = vsel %vm7821_vm14, %v7835_v0, %v8181_v25 }
 0x32f   : > { %v1913_v33 = vshll.u32 %v8185_v30, 16  ;;  %1933 = vst [vmem:[#allocation2 + $0xe4] sm:$0xf] %v1932_v18  ;;  %1937 = vst [vmem:[#allocation2 + $0x12c] sm:$0xf] %v1936_v10  ;;  %v1904_v26 = vrot.slane %v1902_v29, 7  ;;  %v1976_v56 = vsel %vm7821_vm14, %v7860_v62, %v1975_v46 }
 0x330   : > { %2016 = vst [vmem:[#allocation2 + $0x46c] sm:$0xf] %v8185_v30  ;;  %2282 = vst [vmem:[#allocation2 + $0x430] sm:$0xf] %v8185_v30  ;;  %v8225_v1 = vld [vmem:[#allocation2 + $0x110] sm:$0xf] }
 0x331   : > { %v8227_v34 = vld [vmem:[#allocation2 + $0xc8] sm:$0xf]  ;;  %v1979_v13 = vld [vmem:[#allocation2 + $0x444] sm:$0xf]  ;;  %1941 = vst [vmem:[#allocation2 + $0x174] sm:$0xf] %v1940_v57 }
 0x332   : > { %1945 = vst [vmem:[#allocation2 + $0x1bc] sm:$0xf] %v1944_v17  ;;  %v8241_v16 = vld [vmem:[#allocation2 + $0x1a0] sm:$0xf]  ;;  %v8243_v30 = vld [vmem:[#allocation2 + $0x158] sm:$0xf]  ;;  %v8264_v17 = vor.u32 %v1905_v49, %v1904_v26 }
 0x333   : > { %v8245_v5 = vld [vmem:[#allocation2 + $0x1e8] sm:$0xf]  ;;  %v1912_v53 = vrot.slane %v1910_v54, 7  ;;  %1949 = vst [vmem:[#allocation2 + $0x204] sm:$0xf] %v1948_v11  ;;  %v1908_v11 = vrot.slane %v1904_v26, 4 }
 0x334   : > { %1953 = vst [vmem:[#allocation2 + $0x24c] sm:$0xf] %v1952_v35  ;;  %1957 = vst [vmem:[#allocation2 + $0x294] sm:$0xf] %v1956_v31  ;;  %v6326_v22 = vld [vmem:[#allocation2 + $0x1b0] ss:$36 sps:$4 sm:$0xff]   ;;  %v1980_v46 = vsel %vm7821_vm14, %v8264_v17, %v1979_v13 }
 0x335   : > { %v8258_v18 = vld [vmem:[#allocation2 + $0x230] sm:$0xf]  ;;  %v8260_v10 = vld [vmem:[#allocation2 + $0x2c0] sm:$0xf]  ;;  %v8262_v57 = vld [vmem:[#allocation2 + $0x278] sm:$0xf]  ;;  %v1915_v2 = vor.u32 %v1913_v33, %v1912_v53  ;;  %v2078_v53 = vsel %vm8053_vm0, %v7933_v61, %v2077_v43  ;;  %v2086_v61 = vsel %vm8053_vm0, %v7945_v44, %v8227_v34  ;;  %3946 = vmatmul.mubr.bf16.gmra.mxu1 %v6326_v22  ;;  %v2098_v34 = vsel %vm8053_vm0, %v7985_v12, %v8241_v16 }
 0x336   : > { %9551 = vst [vmem:[#allocation24_spill] sm:$0xff] %v8264_v17  ;;  %1961 = vst [vmem:[#allocation2 + $0x2dc] sm:$0xf] %v1960_v9  ;;  %v8273_v59 = vld [vmem:[#allocation2 + $0x350] sm:$0xf]  ;;  %v2065_v26 = vrot.slane %v1902_v29, 4  ;;  %v2082_v29 = vsel %vm8053_vm0, %v7939_v40, %v8211_v28  ;;  %v2090_v28 = vsel %vm8053_vm0, %v7969_v41, %v8225_v1  ;;  %v2094_v1 = vsel %vm8053_vm0, %v7975_v58, %v8243_v30 }
 0x337   : > { %1965 = vst [vmem:[#allocation2 + $0x324] sm:$0xf] %v1964_v24  ;;  %1969 = vst [vmem:[#allocation2 + $0x36c] sm:$0xf] %v1968_v42  ;;  %v8275_v35 = vld [vmem:[#allocation2 + $0x308] sm:$0xf]  ;;  %v1916_v13 = vsel %vm7620_vm9, %v1908_v11, %v1915_v2  ;;  %v2102_v22 = vsel %vm8053_vm0, %v7999_v48, %v8245_v5  ;;  %v2106_v16 = vsel %vm8053_vm0, %v8009_v38, %v8258_v18 }
 0x338   : > { %v8277_v31 = vld [vmem:[#allocation2 + $0x398] sm:$0xf]  ;;  %1973 = vst [vmem:[#allocation2 + $0x3b4] sm:$0xf] %v1972_v50  ;;  %1977 = vst [vmem:[#allocation2 + $0x3fc] sm:$0xf] %v1976_v56  ;;  %v2110_v30 = vsel %vm8053_vm0, %v8027_v39, %v8262_v57  ;;  %v2114_v5 = vsel %vm8053_vm0, %v8035_v19, %v8260_v10  ;;  %v2118_v18 = vsel %vm8053_vm0, %v8045_v51, %v8275_v35 }
 0x339   : > { %v2066_v9 = vrot.slane %v1905_v49, 5  ;;  %v8279_v24 = vrot.slane %v1913_v33, 5  ;;  %v8281_v42 = vld [vmem:[#allocation2 + $0x18] sm:$0xf]  ;;  %v8283_v25 = vld [vmem:[#allocation2 + $0x3e0] sm:$0xf]  ;;  %v2126_v10 = vsel %vm8053_vm0, %v8085_v7, %v8277_v31 }
 0x33a   : > { %v8285_v0 = vld [vmem:[#allocation2 + $0x428] sm:$0xf]  ;;  %v2071_v62 = vrot.slane %v1910_v54, 4  ;;  %v6329_v49 = vld [vmem:[#allocation2 + $0x1fc] ss:$36 sps:$4 sm:$0xff]   ;;  %v2130_v31 = vsel %vm8053_vm0, %v8105_v6, %v8283_v25 }
 0x33b   : > { %v8297_v33 = vld [vmem:[#allocation2 + $0xa8] sm:$0xf]  ;;  %v8299_v50 = vld [vmem:[#allocation2 + $0x60] sm:$0xf]  ;;  %v8301_v56 = vld [vmem:[#allocation2 + $0xf0] sm:$0xf]  ;;  %v2067_v54 = vor.u32 %v2066_v9, %v2065_v26  ;;  %3953 = vmatprep.mubr.bf16.mxu1 %v6329_v49 }
 0x33c   : > { %1981 = vst [vmem:[#allocation2 + $0x444] sm:$0xf] %v1980_v46  ;;  %2079 = vst [vmem:[#allocation2 + $0x38] sm:$0xf] %v2078_v53  ;;  %v6289_v43 = vld [vmem:[#allocation2 + $0x8] ss:$36 sps:$4 sm:$0xff]   ;;  %v2072_v26 = vor.u32 %v2071_v62, %v8279_v24 }
 0x33d   : > { %2083 = vst [vmem:[#allocation2 + $0x80] sm:$0xf] %v2082_v29  ;;  %v6291_v40 = vld [vmem:[#allocation2 + $0xc] ss:$36 sps:$4 sm:$0xff]   ;;  %v8313_v17 = vld [vmem:[#allocation2 + $0x138] sm:$0xf] }
 0x33e   : > { %v8317_v2 = vld [vmem:[#allocation2 + $0x180] sm:$0xf]  ;;  %v8319_v11 = vld [vmem:[#allocation2 + $0x210] sm:$0xf]  ;;  %1982 = vst [vmem:[#allocation2 + $0x468] sm:$0xf] %v1916_v13  ;;  %4058 = vmatprep.mubr.bf16.mxu0 %v6291_v40  ;;  %v2122_v40 = vsel %vm8053_vm0, %v8063_v37, %v8273_v59 }
 0x33f   : > { %2087 = vst [vmem:[#allocation2 + $0xc8] sm:$0xf] %v2086_v61  ;;  %2091 = vst [vmem:[#allocation2 + $0x110] sm:$0xf] %v2090_v28  ;;  %v6295_v9 = vld [vmem:[#allocation2 + $0x54] ss:$36 sps:$4 sm:$0xff]   ;;  %4059 = vmatmul.mubr.bf16.vlgmr.msra.gmra.mxu0 %v6289_v43  ;;  %v2134_v43 = vsel %vm8053_vm0, %v8129_v15, %v8285_v0 }
 0x340   : > { %2250 = vst [vmem:[#allocation2 + $0x42c] sm:$0xf] %v1916_v13  ;;  %v6344_v62 = vld [vmem:[#allocation9 + $0x1b8] sm:$0xff]   ;;  %v2137_v53 = vld [vmem:[#allocation2 + $0x470] sm:$0xf]  ;;  %v2068_v29 = vrot.slane %v2067_v54, 4  ;;  %4066 = vmatprep.mubr.bf16.mxu0 %v6295_v9  ;;  %v2204_v9 = vsel %vm7821_vm14, %v7685_v23, %v8301_v56  ;;  %v2216_v23 = vsel %vm7821_vm14, %v7737_v27, %v8315_v4 }
 0x341   : > { %v8334_v46 = vld [vmem:[#allocation2 + $0x258] sm:$0xf]  ;;  %2095 = vst [vmem:[#allocation2 + $0x158] sm:$0xf] %v2094_v1  ;;  %2099 = vst [vmem:[#allocation2 + $0x1a0] sm:$0xf] %v2098_v34  ;;  %5821 = vmatpush3.bf16.msra.mxu0 %v6344_v62 }
 0x342   : > { %2103 = vst [vmem:[#allocation2 + $0x1e8] sm:$0xf] %v2102_v22  ;;  %v6356_v49 = vld [vmem:[#allocation9 + $0x1f0] sm:$0xff]   ;;  %v8348_v13 = vld [vmem:[#allocation2 + $0x44] sm:$0xf]  ;;  %v8354_v28 = vrot.slane %v2072_v26, 4  ;;  %v2070_v59 = vsel %vm7917_vm15, %v2068_v29, %v8279_v24 }
 0x343   : > { %v8350_v54 = vld [vmem:[#allocation2 + $0x2e8] sm:$0xf]  ;;  %v8352_v61 = vld [vmem:[#allocation2 + $0x2a0] sm:$0xf]  ;;  %2107 = vst [vmem:[#allocation2 + $0x230] sm:$0xf] %v2106_v16  ;;  %v2192_v16 = vsel %vm7821_vm14, %v9550_v32, %v8281_v42  ;;  %v2196_v32 = vsel %vm7821_vm14, %v7650_v60, %v8299_v50  ;;  %v2200_v42 = vsel %vm7821_vm14, %v7672_v3, %v8297_v33  ;;  %v2208_v60 = vsel %vm7821_vm14, %v7699_v52, %v8313_v17 }
 0x344   : > { %2111 = vst [vmem:[#allocation2 + $0x278] sm:$0xf] %v2110_v30  ;;  %2115 = vst [vmem:[#allocation2 + $0x2c0] sm:$0xf] %v2114_v5  ;;  %v8368_v57 = vld [vmem:[#allocation2 + $0xd4] sm:$0xf]  ;;  %v2138_v0 = vsel %vm8053_vm0, %v8354_v28, %v2137_v53  ;;  %v2212_v3 = vsel %vm7821_vm14, %v7719_v20, %v8317_v2  ;;  %v2220_v33 = vsel %vm7821_vm14, %v7755_v55, %v8319_v11  ;;  %5822 = vmatprep.subr.bf16.mxu0 %v6356_v49 }
 0x345   : > { %v8370_v26 = vld [vmem:[#allocation2 + $0x8c] sm:$0xf]  ;;  %v8372_v1 = vld [vmem:[#allocation2 + $0x164] sm:$0xf]  ;;  %v8374_v34 = vld [vmem:[#allocation2 + $0x11c] sm:$0xf]  ;;  %v2224_v52 = vsel %vm7821_vm14, %v7761_v8, %v8334_v46  ;;  %v2228_v27 = vsel %vm7821_vm14, %v7777_v47, %v8352_v61  ;;  %v2232_v20 = vsel %vm7821_vm14, %v7795_v63, %v8350_v54  ;;  %v2343_v14 = vsel %vm8053_vm0, %v7969_v41, %v8368_v57 }
 0x346   : > { %v2239_v35 = vld [vmem:[#allocation2 + $0x378] sm:$0xf]  ;;  %v2235_v22 = vld [vmem:[#allocation2 + $0x330] sm:$0xf]  ;;  %2119 = vst [vmem:[#allocation2 + $0x308] sm:$0xf] %v2118_v18  ;;  %v2359_v41 = vsel %vm8053_vm0, %v8009_v38, %v8391_v45 }
 0x347   : > { %2123 = vst [vmem:[#allocation2 + $0x350] sm:$0xf] %v2122_v40  ;;  %2127 = vst [vmem:[#allocation2 + $0x398] sm:$0xf] %v2126_v10  ;;  %v8393_v24 = vld [vmem:[#allocation2 + $0x1ac] sm:$0xf]  ;;  %v2236_v55 = vsel %vm7821_vm14, %v7813_v36, %v2235_v22  ;;  %v2339_v10 = vsel %vm8053_vm0, %v7945_v44, %v8370_v26 }
 0x348   : > { %v8395_v29 = vld [vmem:[#allocation2 + $0x284] sm:$0xf]  ;;  %v8397_v30 = vld [vmem:[#allocation2 + $0x23c] sm:$0xf]  ;;  %v2247_v25 = vld [vmem:[#allocation2 + $0x408] sm:$0xf]  ;;  %v2355_v44 = vsel %vm8053_vm0, %v7999_v48, %v8393_v24 }
 0x349   : > { %v2243_v5 = vld [vmem:[#allocation2 + $0x3c0] sm:$0xf]  ;;  %2131 = vst [vmem:[#allocation2 + $0x3e0] sm:$0xf] %v2130_v31  ;;  %2135 = vst [vmem:[#allocation2 + $0x428] sm:$0xf] %v2134_v43 }
 0x34a   : > { %2136 = vst [vmem:[#allocation2 + $0x44c] sm:$0xf] %v2070_v59  ;;  %2193 = vst [vmem:[#allocation2 + $0x18] sm:$0xf] %v2192_v16  ;;  %v8414_v18 = vld [vmem:[#allocation2 + $0x314] sm:$0xf] }
 0x34b   : > { %2389 = vst [vmem:[#allocation2 + $0x410] sm:$0xf] %v2070_v59  ;;  %v8416_v53 = vld [vmem:[#allocation2 + $0x2cc] sm:$0xf]  ;;  %v8418_v40 = vld [vmem:[#allocation2 + $0x3a4] sm:$0xf]  ;;  %v2375_v38 = vsel %vm8053_vm0, %v8063_v37, %v8414_v18 }
 0x34c   : > { %2139 = vst [vmem:[#allocation2 + $0x470] sm:$0xf] %v2138_v0  ;;  %2197 = vst [vmem:[#allocation2 + $0x60] sm:$0xf] %v2196_v32  ;;  %v6333_v50 = vld [vmem:[#allocation2 + $0x1f8] ss:$36 sps:$4 sm:$0xff]   ;;  %v2371_v48 = vsel %vm8053_vm0, %v8045_v51, %v8416_v53 }
 0x34d   : > { %2201 = vst [vmem:[#allocation2 + $0xa8] sm:$0xf] %v2200_v42  ;;  %2205 = vst [vmem:[#allocation2 + $0xf0] sm:$0xf] %v2204_v9  ;;  %v6360_v56 = vld [vmem:[#allocation9 + $0x1b0] sm:$0xff]   ;;  %v9552_v8 = vld [vmem:[#allocation32_spill] sm:$0xff]  ;;  %3954 = vmatmul.mubr.bf16.gmra.mxu1 %v6333_v50 }
 0x34e   : > { %v2378_v62 = vld [vmem:[#allocation2 + $0x35c] sm:$0xf]  ;;  %2209 = vst [vmem:[#allocation2 + $0x138] sm:$0xf] %v2208_v60  ;;  %2213 = vst [vmem:[#allocation2 + $0x180] sm:$0xf] %v2212_v3  ;;  %v2240_v2 = vsel %vm7821_vm14, %v9552_v8, %v2239_v35  ;;  %v2351_v35 = vsel %vm8053_vm0, %v7985_v12, %v8372_v1  ;;  %v2367_v12 = vsel %vm8053_vm0, %v8035_v19, %v8395_v29  ;;  %5823 = vmatpush3.bf16.msra.mxu0 %v6360_v56 }
 0x34f   : > { %2217 = vst [vmem:[#allocation2 + $0x1c8] sm:$0xf] %v2216_v23  ;;  %2221 = vst [vmem:[#allocation2 + $0x210] sm:$0xf] %v2220_v33  ;;  %v6335_v17 = vld [vmem:[#allocation2 + $0x244] ss:$36 sps:$4 sm:$0xff]   ;;  %v2383_v19 = vsel %vm8053_vm0, %v8105_v6, %v8418_v40 }
 0x350   : > { %v2390_v4 = vld [vmem:[#allocation2 + $0x434] sm:$0xf]  ;;  %2225 = vst [vmem:[#allocation2 + $0x258] sm:$0xf] %v2224_v52  ;;  %2229 = vst [vmem:[#allocation2 + $0x2a0] sm:$0xf] %v2228_v27  ;;  %3961 = vmatprep.mubr.bf16.mxu1 %v6335_v17 }
 0x351   : > { %2233 = vst [vmem:[#allocation2 + $0x2e8] sm:$0xf] %v2232_v20  ;;  %2237 = vst [vmem:[#allocation2 + $0x330] sm:$0xf] %v2236_v55  ;;  %v9553_v47 = vld [vmem:[#allocation33_spill] sm:$0xff]  ;;  %v9554_v46 = vld [vmem:[#allocation24_spill] sm:$0xff]  ;;  %v2391_v37 = vsel %vm8053_vm0, %v8354_v28, %v2390_v4 }
 0x352   : > { %v2244_v11 = vsel %vm7821_vm14, %v9553_v47, %v2243_v5  ;;  %v2248_v63 = vsel %vm7821_vm14, %v9554_v46, %v2247_v25  ;;  %v9555_v36 = vld [vmem:[#allocation34_spill] sm:$0xff]  ;;  %v6372_v54 = vld [vmem:[#allocation9 + $0x1e8] sm:$0xff]   ;;  %2241 = vst [vmem:[#allocation2 + $0x378] sm:$0xf] %v2240_v2  ;;  %2340 = vst [vmem:[#allocation2 + $0x8c] sm:$0xf] %v2339_v10  ;;  %v5500_v46 = vpop.f32.mrf.mxu1 }
 0x353   : > { %v2335_v49 = vsel %vm8053_vm0, %v9555_v36, %v8348_v13  ;;  %v2386_v61 = vld [vmem:[#allocation2 + $0x3ec] sm:$0xf]  ;;  %2245 = vst [vmem:[#allocation2 + $0x3c0] sm:$0xf] %v2244_v11  ;;  %2249 = vst [vmem:[#allocation2 + $0x408] sm:$0xf] %v2248_v63  ;;  %v2347_v13 = vsel %vm8053_vm0, %v7975_v58, %v8374_v34  ;;  %v2363_v58 = vsel %vm8053_vm0, %v8027_v39, %v8397_v30  ;;  %5824 = vmatprep.subr.bf16.mxu0 %v6372_v54 }
 0x354   : > { %2336 = vst [vmem:[#allocation2 + $0x44] sm:$0xf] %v2335_v49  ;;  %v6299_v22 = vld [vmem:[#allocation2 + $0x50] ss:$36 sps:$4 sm:$0xff]   ;;  %2344 = vst [vmem:[#allocation2 + $0xd4] sm:$0xf] %v2343_v14  ;;  %v2379_v39 = vsel %vm8053_vm0, %v8085_v7, %v2378_v62  ;;  %v2387_v51 = vsel %vm8053_vm0, %v8129_v15, %v2386_v61  ;;  %v5501_v36 = vpop.f32.mrf.mxu1 }
 0x355   : > { %2348 = vst [vmem:[#allocation2 + $0x11c] sm:$0xf] %v2347_v13  ;;  %2352 = vst [vmem:[#allocation2 + $0x164] sm:$0xf] %v2351_v35  ;;  %v6303_v57 = vld [vmem:[#allocation2 + $0x9c] ss:$36 sps:$4 sm:$0xff]   ;;  %4067 = vmatmul.mubr.bf16.gmra.mxu0 %v6299_v22  ;;  %v8518_v54 = vadd.f32 %v5501_v36, %v5500_v46 }
 0x356   : > { %v6376_v26 = vld [vmem:[#allocation9 + $0x1a8] sm:$0xff]   ;;  %2356 = vst [vmem:[#allocation2 + $0x1ac] sm:$0xf] %v2355_v44  ;;  %2360 = vst [vmem:[#allocation2 + $0x1f4] sm:$0xf] %v2359_v41  ;;  %v6388_v1 = vld [vmem:[#allocation9 + $0x1e0] sm:$0xff]   ;;  %4074 = vmatprep.mubr.bf16.mxu0 %v6303_v57 }
 0x357   : > { %2364 = vst [vmem:[#allocation2 + $0x23c] sm:$0xf] %v2363_v58  ;;  %2368 = vst [vmem:[#allocation2 + $0x284] sm:$0xf] %v2367_v12  ;;  %v6341_v7 = vld [vmem:[#allocation2 + $0x240] ss:$36 sps:$4 sm:$0xff]   ;;  %5825 = vmatpush3.bf16.msra.mxu0 %v6376_v26 }
 0x358   : > { %2372 = vst [vmem:[#allocation2 + $0x2cc] sm:$0xf] %v2371_v48  ;;  %2376 = vst [vmem:[#allocation2 + $0x314] sm:$0xf] %v2375_v38  ;;  %v6345_v6 = vld [vmem:[#allocation2 + $0x28c] ss:$36 sps:$4 sm:$0xff]   ;;  %5826 = vmatprep.subr.bf16.mxu0 %v6388_v1  ;;  %3962 = vmatmul.mubr.bf16.gmra.mxu1 %v6341_v7 }
 0x359   : > { %2380 = vst [vmem:[#allocation2 + $0x35c] sm:$0xf] %v2379_v39  ;;  %2384 = vst [vmem:[#allocation2 + $0x3a4] sm:$0xf] %v2383_v19  ;;  %v6392_v34 = vld [vmem:[#allocation9 + $0x1a0] sm:$0xff]   ;;  %v6399_v59 = vld [vmem:[#allocation9 + $0x1d8] sm:$0xff]   ;;  %3969 = vmatprep.mubr.bf16.mxu1 %v6345_v6 }
 0x35a   : > { %2388 = vst [vmem:[#allocation2 + $0x3ec] sm:$0xf] %v2387_v51  ;;  %2392 = vst [vmem:[#allocation2 + $0x434] sm:$0xf] %v2391_v37  ;;  %v6306_v31 = vld [vmem:[#allocation2 + $0x98] ss:$36 sps:$4 sm:$0xff]  }
 0x35b   : > { %v6309_v43 = vld [vmem:[#allocation2 + $0xe4] ss:$36 sps:$4 sm:$0xff]   ;;  %5827 = vmatpush3.bf16.msra.mxu0 %v6392_v34  ;;  %v6405_v15 = vld [vmem:[#allocation9 + $0x198] sm:$0xff]   ;;  %v6407_v16 = vld [vmem:[#allocation9 + $0x190] sm:$0xff]   ;;  %v9556_v53 = vmov 0.0  }
 0x35c   : > { %5828 = vmatprep.subr.bf16.mxu0 %v6399_v59  ;;  %v6349_v28 = vld [vmem:[#allocation2 + $0x288] ss:$36 sps:$4 sm:$0xff]   ;;  %v6351_v45 = vld [vmem:[#allocation2 + $0x2d4] ss:$36 sps:$4 sm:$0xff]   ;;  %v6313_v29 = vld [vmem:[#allocation2 + $0xe0] ss:$36 sps:$4 sm:$0xff]  }
 0x35d   : > { %4075 = vmatmul.mubr.bf16.gmra.mxu0 %v6306_v31  ;;  %v6410_v24 = vld [vmem:[#allocation9 + $0x1c8] sm:$0xff]   ;;  %v6417_v5 = vld [vmem:[#allocation9 + $0x1c0] sm:$0xff]   ;;  %v6357_v0 = vld [vmem:[#allocation2 + $0x2d0] ss:$36 sps:$4 sm:$0xff]  }
 0x35e   : > { %4082 = vmatprep.mubr.bf16.mxu0 %v6309_v43  ;;  %v6317_v30 = vld [vmem:[#allocation2 + $0x12c] ss:$36 sps:$4 sm:$0xff]   ;;  %v6418_v32 = vld [vmem:[#allocation9 + $0x180] sm:$0xff]   ;;  %v6323_v18 = vld [vmem:[#allocation2 + $0x174] ss:$36 sps:$4 sm:$0xff]  }
 0x35f   : > { %5829 = vmatpush3.bf16.msra.mxu0 %v6405_v15  ;;  %v6413_v25 = vld [vmem:[#allocation9 + $0x188] sm:$0xff]   ;;  %v6361_v42 = vld [vmem:[#allocation2 + $0x31c] ss:$36 sps:$4 sm:$0xff]   ;;  %v6327_v3 = vld [vmem:[#allocation2 + $0x170] ss:$36 sps:$4 sm:$0xff]  }
 0x360   : > { %5830 = vmatprep.subr.bf16.mxu0 %v6406_v21  ;;  %3970 = vmatmul.mubr.bf16.gmra.mxu1 %v6349_v28  ;;  %v6320_v9 = vld [vmem:[#allocation2 + $0x128] ss:$36 sps:$4 sm:$0xff]   ;;  %v6365_v40 = vld [vmem:[#allocation2 + $0x318] ss:$36 sps:$4 sm:$0xff]   ;;  %v6373_v33 = vld [vmem:[#allocation2 + $0x360] ss:$36 sps:$4 sm:$0xff]  }
 0x361   : > { %3977 = vmatprep.mubr.bf16.mxu1 %v6351_v45  ;;  %v6367_v60 = vld [vmem:[#allocation2 + $0x364] ss:$36 sps:$4 sm:$0xff]   ;;  %v6331_v23 = vld [vmem:[#allocation2 + $0x1bc] ss:$36 sps:$4 sm:$0xff]   ;;  %v6377_v50 = vld [vmem:[#allocation2 + $0x3ac] ss:$36 sps:$4 sm:$0xff]  }
 0x362   : > { %v6334_v56 = vld [vmem:[#allocation2 + $0x1b8] ss:$36 sps:$4 sm:$0xff]   ;;  %v6337_v62 = vld [vmem:[#allocation2 + $0x204] ss:$36 sps:$4 sm:$0xff]   ;;  %v6347_v55 = vld [vmem:[#allocation2 + $0x24c] ss:$36 sps:$4 sm:$0xff]  }
 0x363   : > { %5831 = vmatpush3.bf16.msra.mxu0 %v6407_v16  ;;  %v6381_v52 = vld [vmem:[#allocation2 + $0x3a8] ss:$36 sps:$4 sm:$0xff]   ;;  %v6383_v27 = vld [vmem:[#allocation2 + $0x3f4] ss:$36 sps:$4 sm:$0xff]   ;;  %v6342_v20 = vld [vmem:[#allocation2 + $0x200] ss:$36 sps:$4 sm:$0xff]  }
 0x364   : > { %5832 = vmatprep.subr.bf16.mxu0 %v6410_v24  ;;  %v6389_v17 = vld [vmem:[#allocation2 + $0x3f0] ss:$36 sps:$4 sm:$0xff]   ;;  %v6393_v4 = vld [vmem:[#allocation2 + $0x43c] ss:$36 sps:$4 sm:$0xff]   ;;  %v6350_v8 = vld [vmem:[#allocation2 + $0x248] ss:$36 sps:$4 sm:$0xff]  }
 0x365   : > { %4083 = vmatmul.mubr.bf16.gmra.mxu0 %v6313_v29  ;;  %v6353_v2 = vld [vmem:[#allocation2 + $0x294] ss:$36 sps:$4 sm:$0xff]   ;;  %v6363_v49 = vld [vmem:[#allocation2 + $0x2dc] ss:$36 sps:$4 sm:$0xff]   ;;  %v6369_v22 = vld [vmem:[#allocation2 + $0x324] ss:$36 sps:$4 sm:$0xff]  }
 0x366   : > { %4090 = vmatprep.mubr.bf16.mxu0 %v6317_v30  ;;  %v6397_v47 = vld [vmem:[#allocation2 + $0x438] ss:$36 sps:$4 sm:$0xff]   ;;  %v6358_v63 = vld [vmem:[#allocation2 + $0x290] ss:$36 sps:$4 sm:$0xff]   ;;  %v6437_v44 = vld [vmem:[#allocation9 + $0x228] sm:$0xff]  }
 0x367   : > { %5833 = vmatpush3.bf16.msra.mxu0 %v6413_v25  ;;  %v6404_v11 = vld [vmem:[#allocation2 + $0x14] ss:$36 sps:$4 sm:$0xff]   ;;  %v6411_v14 = vld [vmem:[#allocation2 + $0x5c] ss:$36 sps:$4 sm:$0xff]   ;;  %v6420_v12 = vld [vmem:[#allocation2 + $0xa4] ss:$36 sps:$4 sm:$0xff]  }
 0x368   : > { %5834 = vmatprep.subr.bf16.mxu0 %v6417_v5  ;;  %3978 = vmatmul.mubr.bf16.gmra.mxu1 %v6357_v0  ;;  %v6402_v61 = vld [vmem:[#allocation2 + $0x10] ss:$36 sps:$4 sm:$0xff]   ;;  %v6366_v13 = vld [vmem:[#allocation2 + $0x2d8] ss:$36 sps:$4 sm:$0xff]   ;;  %v6451_v58 = vld [vmem:[#allocation9 + $0x220] sm:$0xff]  }
 0x369   : > { %3985 = vmatprep.mubr.bf16.mxu1 %v6361_v42  ;;  %v6424_v10 = vld [vmem:[#allocation9 + $0x230] sm:$0xff]   ;;  %v9557_v35 = vld [vmem:[#allocation23_spill] sm:$0xff]  ;;  %v6374_v57 = vld [vmem:[#allocation2 + $0x320] ss:$36 sps:$4 sm:$0xff]  }
 0x36a   : > { %v6419_v41 = vld [vmem:[#allocation2 + $0x58] ss:$36 sps:$4 sm:$0xff]   ;;  %v6379_v26 = vld [vmem:[#allocation2 + $0x36c] ss:$36 sps:$4 sm:$0xff]   ;;  %v6425_v38 = vld [vmem:[#allocation2 + $0xa0] ss:$36 sps:$4 sm:$0xff]  }
 0x36b   : > { %5835 = vmatpush3.bf16.msra.mxu0 %v6418_v32  ;;  %v6464_v48 = vld [vmem:[#allocation9 + $0x218] sm:$0xff]   ;;  %v6477_v39 = vld [vmem:[#allocation9 + $0x210] sm:$0xff]   ;;  %v6382_v1 = vld [vmem:[#allocation2 + $0x368] ss:$36 sps:$4 sm:$0xff]  }
 0x36c   : > { %6104 = vmatprep.subr.mxu0 %v9556_v53  ;;  %v6427_v19 = vld [vmem:[#allocation2 + $0xec] ss:$36 sps:$4 sm:$0xff]   ;;  %v6385_v51 = vld [vmem:[#allocation2 + $0x3b4] ss:$36 sps:$4 sm:$0xff]   ;;  %v6395_v59 = vld [vmem:[#allocation2 + $0x3fc] ss:$36 sps:$4 sm:$0xff]  }
 0x36d   : > { %4091 = vmatmul.mubr.bf16.gmra.mxu0 %v6320_v9  ;;  %v6491_v37 = vld [vmem:[#allocation9 + $0x208] sm:$0xff]   ;;  %v6433_v6 = vld [vmem:[#allocation2 + $0x134] ss:$36 sps:$4 sm:$0xff]   ;;  %v6504_v31 = vld [vmem:[#allocation9 + $0x200] sm:$0xff]  }
 0x36e   : > { %4098 = vmatprep.mubr.bf16.mxu0 %v6323_v18  ;;  %v6431_v7 = vld [vmem:[#allocation2 + $0xe8] ss:$36 sps:$4 sm:$0xff]   ;;  %v6390_v34 = vld [vmem:[#allocation2 + $0x3b0] ss:$36 sps:$4 sm:$0xff]   ;;  %v6440_v15 = vld [vmem:[#allocation2 + $0x17c] ss:$36 sps:$4 sm:$0xff]  }
 0x36f   : > { %v6438_v43 = vld [vmem:[#allocation2 + $0x130] ss:$36 sps:$4 sm:$0xff]   ;;  %v6398_v21 = vld [vmem:[#allocation2 + $0x3f8] ss:$36 sps:$4 sm:$0xff]   ;;  %v6400_v28 = vld [vmem:[#allocation2 + $0x444] ss:$36 sps:$4 sm:$0xff]  }
 0x370   : > { %3986 = vmatmul.mubr.bf16.gmra.mxu1 %v6365_v40  ;;  %v6445_v16 = vld [vmem:[#allocation2 + $0x178] ss:$36 sps:$4 sm:$0xff]   ;;  %v6446_v45 = vld [vmem:[#allocation2 + $0x1c4] ss:$36 sps:$4 sm:$0xff]   ;;  %v2188_v30 = vld [vmem:[#allocation2 + $0x450] sm:$0x1] }
 0x371   : > { %3993 = vmatprep.mubr.bf16.mxu1 %v6367_v60  ;;  %v6409_v24 = vld [vmem:[#allocation2 + $0x440] ss:$36 sps:$4 sm:$0xff]   ;;  %v2189_v5 = vsel %vm6953_vm2, 0, %v2188_v30  ;;  %v6453_v32 = vld [vmem:[#allocation2 + $0x20c] ss:$36 sps:$4 sm:$0xff]  }
 0x372   : > { %v6416_v29 = vld [vmem:[#allocation2 + $0x1c] ss:$36 sps:$4 sm:$0xff]   ;;  %2190 = vst [vmem:[#allocation2 + $0x450] sm:$0x1] %v2189_v5  ;;  %v6422_v9 = vld [vmem:[#allocation2 + $0x64] ss:$36 sps:$4 sm:$0xff]  }
 0x373   : > { %v6452_v0 = vld [vmem:[#allocation2 + $0x1c0] ss:$36 sps:$4 sm:$0xff]   ;;  %v6414_v42 = vld [vmem:[#allocation2 + $0x18] ss:$36 sps:$4 sm:$0xff]   ;;  %v6458_v18 = vld [vmem:[#allocation2 + $0x208] ss:$36 sps:$4 sm:$0xff]  }
 0x374   : > { %v6459_v40 = vld [vmem:[#allocation2 + $0x254] ss:$36 sps:$4 sm:$0xff]   ;;  %v6426_v60 = vld [vmem:[#allocation2 + $0x60] ss:$36 sps:$4 sm:$0xff]   ;;  %v6481_v36 = vld [vmem:[#allocation2 + $0x32c] ss:$36 sps:$4 sm:$0xff]  }
 0x375   : > { %4099 = vmatmul.mubr.bf16.gmra.mxu0 %v6327_v3  ;;  %v6429_v3 = vld [vmem:[#allocation2 + $0xac] ss:$36 sps:$4 sm:$0xff]   ;;  %v6478_v46 = vld [vmem:[#allocation2 + $0x2e0] ss:$36 sps:$4 sm:$0xff]  }
 0x376   : > { %4106 = vmatprep.mubr.bf16.mxu0 %v6331_v23  ;;  %v6465_v23 = vld [vmem:[#allocation2 + $0x250] ss:$36 sps:$4 sm:$0xff]   ;;  %v6470_v5 = vld [vmem:[#allocation2 + $0x25c] ss:$36 sps:$4 sm:$0xff]  }
 0x377   : > { %v6461_v25 = vld [vmem:[#allocation2 + $0x210] ss:$36 sps:$4 sm:$0xff]  }
 0x378   : > { %3994 = vmatmul.mubr.bf16.gmra.mxu1 %v6373_v33  ;;  %v6466_v33 = vld [vmem:[#allocation2 + $0x29c] ss:$36 sps:$4 sm:$0xff]  }
 0x379   : > { %4001 = vmatprep.mubr.bf16.mxu1 %v6377_v50  ;;  %v6432_v50 = vld [vmem:[#allocation2 + $0xa8] ss:$36 sps:$4 sm:$0xff]  }
 0x37d   : > { %4107 = vmatmul.mubr.bf16.gmra.mxu0 %v6334_v56  ;;  %v6435_v56 = vld [vmem:[#allocation2 + $0xf4] ss:$36 sps:$4 sm:$0xff]  }
 0x37e   : > { %4114 = vmatprep.mubr.bf16.mxu0 %v6337_v62  ;;  %v8523_v62 = vpop.f32.mrf.mxu1 }
 0x380   : > { %4002 = vmatmul.mubr.bf16.gmra.mxu1 %v6381_v52  ;;  %v8525_v52 = vpop.f32.mrf.mxu1 }
 0x381   : > { %4009 = vmatprep.mubr.bf16.mxu1 %v6383_v27  ;;  %v6471_v27 = vld [vmem:[#allocation2 + $0x298] ss:$36 sps:$4 sm:$0xff]  }
 0x385   : > { %4115 = vmatmul.mubr.bf16.gmra.mxu0 %v6342_v20  ;;  %v6472_v20 = vld [vmem:[#allocation2 + $0x2e4] ss:$36 sps:$4 sm:$0xff]  }
 0x386   : > { %4122 = vmatprep.mubr.bf16.mxu0 %v6347_v55 }
 0x388   : > { %4010 = vmatmul.mubr.bf16.gmra.mxu1 %v6389_v17  ;;  %v6439_v17 = vld [vmem:[#allocation2 + $0xf0] ss:$36 sps:$4 sm:$0xff]  }
 0x389   : > { %4017 = vmatprep.mubr.bf16.mxu1 %v6393_v4  ;;  %v6444_v4 = vld [vmem:[#allocation2 + $0x13c] ss:$36 sps:$4 sm:$0xff]  }
 0x38d   : > { %4123 = vmatmul.mubr.bf16.gmra.mxu0 %v6350_v8 }
 0x38e   : > { %4130 = vmatprep.mubr.bf16.mxu0 %v6353_v2 }
 0x390   : > { %4018 = vmatmul.mubr.bf16.gmra.mxu1 %v6397_v47 }
 0x391   : > { %4219 = vmatprep.mubr.bf16.mxu1 %v6404_v11 }
 0x395   : > { %4131 = vmatmul.mubr.bf16.gmra.mxu0 %v6358_v63 }
 0x396   : > { %4138 = vmatprep.mubr.bf16.mxu0 %v6363_v49 }
 0x398   : > { %4220 = vmatmul.mubr.bf16.vlgmr.msra.gmra.mxu1 %v6402_v61  ;;  %v6442_v61 = vld [vmem:[#allocation2 + $0x138] ss:$36 sps:$4 sm:$0xff]  }
 0x399   : > { %6057 = vmatpush3.bf16.msra.mxu1 %v9557_v35  ;;  %4227 = vmatprep.mubr.bf16.mxu1 %v6411_v14 }
 0x39a   : > { %6058 = vmatprep.subr.bf16.mxu1 %v6424_v10 }
 0x39d   : > { %4139 = vmatmul.mubr.bf16.gmra.mxu0 %v6366_v13  ;;  %6059 = vmatpush3.bf16.msra.mxu1 %v6424_v10  ;;  %v6450_v10 = vld [vmem:[#allocation2 + $0x184] ss:$36 sps:$4 sm:$0xff]  }
 0x39e   : > { %4146 = vmatprep.mubr.bf16.mxu0 %v6369_v22  ;;  %6060 = vmatprep.subr.bf16.mxu1 %v6437_v44  ;;  %v6479_v22 = vld [vmem:[#allocation2 + $0x328] ss:$36 sps:$4 sm:$0xff]  }
 0x3a0   : > { %4228 = vmatmul.mubr.bf16.gmra.mxu1 %v6419_v41 }
 0x3a1   : > { %4235 = vmatprep.mubr.bf16.mxu1 %v6420_v12  ;;  %6061 = vmatpush3.bf16.msra.mxu1 %v6437_v44 }
 0x3a2   : > { %6062 = vmatprep.subr.bf16.mxu1 %v6451_v58 }
 0x3a5   : > { %4147 = vmatmul.mubr.bf16.gmra.mxu0 %v6374_v57  ;;  %6063 = vmatpush3.bf16.msra.mxu1 %v6451_v58  ;;  %v6487_v58 = vld [vmem:[#allocation2 + $0x374] ss:$36 sps:$4 sm:$0xff]   ;;  %v6448_v57 = vld [vmem:[#allocation2 + $0x180] ss:$36 sps:$4 sm:$0xff]  }
 0x3a6   : > { %4154 = vmatprep.mubr.bf16.mxu0 %v6379_v26  ;;  %6064 = vmatprep.subr.bf16.mxu1 %v6464_v48  ;;  %v6457_v26 = vld [vmem:[#allocation2 + $0x1cc] ss:$36 sps:$4 sm:$0xff]  }
 0x3a8   : > { %4236 = vmatmul.mubr.bf16.gmra.mxu1 %v6425_v38 }
 0x3a9   : > { %4243 = vmatprep.mubr.bf16.mxu1 %v6427_v19  ;;  %6065 = vmatpush3.bf16.msra.mxu1 %v6464_v48  ;;  %v6485_v19 = vld [vmem:[#allocation2 + $0x370] ss:$36 sps:$4 sm:$0xff]  }
 0x3aa   : > { %6066 = vmatprep.subr.bf16.mxu1 %v6477_v39 }
 0x3ad   : > { %4155 = vmatmul.mubr.bf16.gmra.mxu0 %v6382_v1  ;;  %6067 = vmatpush3.bf16.msra.mxu1 %v6477_v39 }
 0x3ae   : > { %4162 = vmatprep.mubr.bf16.mxu0 %v6385_v51  ;;  %6068 = vmatprep.subr.bf16.mxu1 %v6491_v37 }
 0x3b0   : > { %4244 = vmatmul.mubr.bf16.gmra.mxu1 %v6431_v7 }
 0x3b1   : > { %4251 = vmatprep.mubr.bf16.mxu1 %v6433_v6  ;;  %6069 = vmatpush3.bf16.msra.mxu1 %v6491_v37  ;;  %v6494_v37 = vld [vmem:[#allocation2 + $0x3bc] ss:$36 sps:$4 sm:$0xff]   ;;  %v6455_v6 = vld [vmem:[#allocation2 + $0x1c8] ss:$36 sps:$4 sm:$0xff]  }
 0x3b2   : > { %6070 = vmatprep.subr.bf16.mxu1 %v6504_v31  ;;  %v5506_v55 = vpop.f32.mrf.mxu1 }
 0x3b4   : > { %v5507_v8 = vpop.f32.mrf.mxu1 }
 0x3b5   : > { %4163 = vmatmul.mubr.bf16.gmra.mxu0 %v6390_v34  ;;  %6071 = vmatpush3.bf16.msra.mxu1 %v6504_v31  ;;  %v8527_v2 = vadd.f32 %v5507_v8, %v5506_v55  ;;  %v6463_v34 = vld [vmem:[#allocation2 + $0x214] ss:$36 sps:$4 sm:$0xff]  }
 0x3b6   : > { %4170 = vmatprep.mubr.bf16.mxu0 %v6395_v59  ;;  %v5509_v47 = vpop.f32.mrf.mxu1 }
 0x3b8   : > { %4252 = vmatmul.mubr.bf16.gmra.mxu1 %v6438_v43  ;;  %v5510_v11 = vpop.f32.mrf.mxu1 }
 0x3b9   : > { %4259 = vmatprep.mubr.bf16.mxu1 %v6440_v15  ;;  %v8529_v63 = vadd.f32 %v5510_v11, %v5509_v47  ;;  %v2330_v15 = vld [vmem:[#allocation2 + $0x47c] sm:$0x8] }
 0x3ba   : > { %v5512_v49 = vpop.f32.mrf.mxu1 }
 0x3bc   : > { %v5513_v14 = vpop.f32.mrf.mxu1 }
 0x3bd   : > { %4171 = vmatmul.mubr.bf16.gmra.mxu0 %v6398_v21  ;;  %v8531_v13 = vadd.f32 %v5513_v14, %v5512_v49  ;;  %v5505_v14 = vadd.f32 %v8525_v52, %v8523_v62 }
 0x3be   : > { %4178 = vmatprep.mubr.bf16.mxu0 %v6400_v28  ;;  %v5515_v35 = vpop.f32.mrf.mxu1  ;;  %v2331_v28 = vsel %vm6967_vm5, 0, %v2330_v15 }
 0x3bf   : > { %2332 = vst [vmem:[#allocation2 + $0x47c] sm:$0x8] %v2331_v28 }
 0x3c0   : > { %4260 = vmatmul.mubr.bf16.gmra.mxu1 %v6445_v16  ;;  %v5516_v44 = vpop.f32.mrf.mxu1  ;;  %v6492_v16 = vld [vmem:[#allocation2 + $0x3b8] ss:$36 sps:$4 sm:$0xff]  }
 0x3c1   : > { %4267 = vmatprep.mubr.bf16.mxu1 %v6446_v45  ;;  %v8533_v41 = vadd.f32 %v5516_v44, %v5515_v35 }
 0x3c5   : > { %4179 = vmatmul.mubr.bf16.gmra.mxu0 %v6409_v24 }
 0x3c6   : > { %4380 = vmatprep.mubr.bf16.mxu0 %v6416_v29  ;;  %v6500_v29 = vld [vmem:[#allocation2 + $0x404] ss:$36 sps:$4 sm:$0xff]  }
 0x3c8   : > { %4268 = vmatmul.mubr.bf16.gmra.mxu1 %v6452_v0 }
 0x3c9   : > { %4275 = vmatprep.mubr.bf16.mxu1 %v6453_v32  ;;  %v5518_v12 = vpop.f32.mrf.mxu1 }
 0x3cb   : > { %v5519_v48 = vpop.f32.mrf.mxu1 }
 0x3cc   : > { %v8535_v38 = vadd.f32 %v5519_v48, %v5518_v12 }
 0x3cd   : > { %4381 = vmatmul.mubr.bf16.vlgmr.msra.gmra.mxu0 %v6414_v42  ;;  %v5521_v39 = vpop.f32.mrf.mxu1 }
 0x3ce   : > { %4388 = vmatprep.mubr.bf16.mxu0 %v6422_v9  ;;  %v6498_v9 = vld [vmem:[#allocation2 + $0x400] ss:$36 sps:$4 sm:$0xff]  }
 0x3cf   : > { %v5522_v1 = vpop.f32.mrf.mxu1 }
 0x3d0   : > { %4276 = vmatmul.mubr.bf16.gmra.mxu1 %v6458_v18  ;;  %v8537_v51 = vadd.f32 %v5522_v1, %v5521_v39 }
 0x3d1   : > { %4283 = vmatprep.mubr.bf16.mxu1 %v6459_v40 }
 0x3d3   : > { %v5524_v7 = vpop.f32.mrf.mxu1 }
 0x3d5   : > { %4389 = vmatmul.mubr.bf16.gmra.mxu0 %v6426_v60  ;;  %v5525_v59 = vpop.f32.mrf.mxu1  ;;  %v6507_v60 = vld [vmem:[#allocation2 + $0x44c] ss:$36 sps:$4 sm:$0xff]  }
 0x3d6   : > { %4396 = vmatprep.mubr.bf16.mxu0 %v6429_v3  ;;  %v8539_v31 = vadd.f32 %v5525_v59, %v5524_v7  ;;  %v6516_v7 = vld [vmem:[#allocation2 + $0xb0] ss:$36 sps:$4 sm:$0xff]  }
 0x3d7   : > { %v5527_v43 = vpop.f32.mrf.mxu1 }
 0x3d8   : > { %4284 = vmatmul.mubr.bf16.gmra.mxu1 %v6465_v23  ;;  %v6468_v23 = vld [vmem:[#allocation2 + $0x258] ss:$36 sps:$4 sm:$0xff]  }
 0x3d9   : > { %4291 = vmatprep.mubr.bf16.mxu1 %v6466_v33  ;;  %v5528_v45 = vpop.f32.mrf.mxu1  ;;  %v6476_v33 = vld [vmem:[#allocation2 + $0x2a4] ss:$36 sps:$4 sm:$0xff]  }
 0x3da   : > { %v8543_v24 = vadd.f32 %v5528_v45, %v5527_v43  ;;  %v6490_v43 = vld [vmem:[#allocation2 + $0x334] ss:$36 sps:$4 sm:$0xff]  }
 0x3dd   : > { %4397 = vmatmul.mubr.bf16.gmra.mxu0 %v6432_v50 }
 0x3de   : > { %4404 = vmatprep.mubr.bf16.mxu0 %v6435_v56 }
 0x3e0   : > { %4292 = vmatmul.mubr.bf16.gmra.mxu1 %v6471_v27 }
 0x3e1   : > { %4299 = vmatprep.mubr.bf16.mxu1 %v6472_v20 }
 0x3e2   : > { %v5530_v30 = vpop.f32.mrf.mxu1 }
 0x3e4   : > { %v5531_v0 = vpop.f32.mrf.mxu1 }
 0x3e5   : > { %4405 = vmatmul.mubr.bf16.gmra.mxu0 %v6439_v17  ;;  %v8545_v32 = vadd.f32 %v5531_v0, %v5530_v30 }
 0x3e6   : > { %4412 = vmatprep.mubr.bf16.mxu0 %v6444_v4  ;;  %v5533_v42 = vpop.f32.mrf.mxu1  ;;  %v6505_v4 = vld [vmem:[#allocation2 + $0x448] ss:$36 sps:$4 sm:$0xff]  }
 0x3e8   : > { %4300 = vmatmul.mubr.bf16.gmra.mxu1 %v6478_v46  ;;  %v5534_v18 = vpop.f32.mrf.mxu1  ;;  %v6511_v46 = vld [vmem:[#allocation2 + $0x20] ss:$36 sps:$4 sm:$0xff]  }
 0x3e9   : > { %4307 = vmatprep.mubr.bf16.mxu1 %v6481_v36  ;;  %v8547_v40 = vadd.f32 %v5534_v18, %v5533_v42  ;;  %v6518_v42 = vld [vmem:[#allocation2 + $0x140] ss:$36 sps:$4 sm:$0xff]  }
 0x3ed   : > { %4413 = vmatmul.mubr.bf16.gmra.mxu0 %v6442_v61  ;;  %v6474_v61 = vld [vmem:[#allocation2 + $0x2a0] ss:$36 sps:$4 sm:$0xff]  }
 0x3ee   : > { %4420 = vmatprep.mubr.bf16.mxu0 %v6450_v10 }
 0x3f0   : > { %4308 = vmatmul.mubr.bf16.gmra.mxu1 %v6479_v22  ;;  %v6484_v22 = vld [vmem:[#allocation2 + $0x2ec] ss:$36 sps:$4 sm:$0xff]  }
 0x3f1   : > { %4315 = vmatprep.mubr.bf16.mxu1 %v6487_v58 }
 0x3f5   : > { %4421 = vmatmul.mubr.bf16.gmra.mxu0 %v6448_v57  ;;  %v5536_v3 = vpop.f32.mrf.mxu1 }
 0x3f6   : > { %4428 = vmatprep.mubr.bf16.mxu0 %v6457_v26 }
 0x3f7   : > { %v5537_v50 = vpop.f32.mrf.mxu1 }
 0x3f8   : > { %4316 = vmatmul.mubr.bf16.gmra.mxu1 %v6485_v19  ;;  %v8549_v27 = vadd.f32 %v5537_v50, %v5536_v3  ;;  %v6515_v19 = vld [vmem:[#allocation2 + $0x68] ss:$36 sps:$4 sm:$0xff]  }
 0x3f9   : > { %4323 = vmatprep.mubr.bf16.mxu1 %v6494_v37  ;;  %v5539_v20 = vpop.f32.mrf.mxu1 }
 0x3fb   : > { %v5540_v8 = vpop.f32.mrf.mxu1 }
 0x3fc   : > { %v8551_v11 = vadd.f32 %v5540_v8, %v5539_v20  ;;  %v6519_v8 = vld [vmem:[#allocation2 + $0x188] ss:$36 sps:$4 sm:$0xff]  }
 0x3fd   : > { %4429 = vmatmul.mubr.bf16.gmra.mxu0 %v6455_v6  ;;  %v6482_v6 = vld [vmem:[#allocation2 + $0x2e8] ss:$36 sps:$4 sm:$0xff]  }
 0x3fe   : > { %4436 = vmatprep.mubr.bf16.mxu0 %v6463_v34 }
 0x3ff   : > { %v5612_v56 = vpop.f32.mrf.mxu0 }
 0x400   : > { %4324 = vmatmul.mubr.bf16.gmra.mxu1 %v6492_v16 }
 0x401   : > { %4331 = vmatprep.mubr.bf16.mxu1 %v6500_v29  ;;  %v5613_v55 = vpop.f32.mrf.mxu0 }
 0x402   : > { %v5614_v17 = vadd.f32 %v5613_v55, %v5612_v56 }
 0x403   : > { %v5615_v47 = vpop.f32.mrf.mxu0 }
 0x404   : > { %v8554_v36 = vadd.f32 %v5614_v17, %v8518_v54 }
 0x405   : > { %4437 = vmatmul.mubr.bf16.gmra.mxu0 %v6461_v25  ;;  %v5616_v10 = vpop.f32.mrf.mxu0  ;;  %v6517_v25 = vld [vmem:[#allocation2 + $0xf8] ss:$36 sps:$4 sm:$0xff]  }
 0x406   : > { %4444 = vmatprep.mubr.bf16.mxu0 %v6470_v5  ;;  %v5617_v35 = vadd.f32 %v5616_v10, %v5615_v47 }
 0x408   : > { %4332 = vmatmul.mubr.bf16.gmra.mxu1 %v6498_v9  ;;  %v8560_v57 = vadd.f32 %v5617_v35, %v5505_v14  ;;  %v6495_v14 = vld [vmem:[#allocation2 + $0x378] ss:$36 sps:$4 sm:$0xff]  }
 0x409   : > { %4339 = vmatprep.mubr.bf16.mxu1 %v6507_v60  ;;  %v6488_v60 = vld [vmem:[#allocation2 + $0x330] ss:$36 sps:$4 sm:$0xff]  }
 0x40d   : > { %4445 = vmatmul.mubr.bf16.gmra.mxu0 %v6468_v23  ;;  %v5542_v49 = vpop.f32.mrf.mxu1  ;;  %v6497_v23 = vld [vmem:[#allocation2 + $0x37c] ss:$36 sps:$4 sm:$0xff]  }
 0x40e   : > { %4452 = vmatprep.mubr.bf16.mxu0 %v6476_v33 }
 0x40f   : > { %v5543_v44 = vpop.f32.mrf.mxu1 }
 0x410   : > { %4340 = vmatmul.mubr.bf16.gmra.mxu1 %v6505_v4  ;;  %v8558_v12 = vadd.f32 %v5543_v44, %v5542_v49  ;;  %v6520_v49 = vld [vmem:[#allocation2 + $0x1d0] ss:$36 sps:$4 sm:$0xff]  }
 0x411   : > { %6072 = vmatprep.mubr.bf16.mxu1 %v6511_v46  ;;  %v5545_v54 = vpop.f32.mrf.mxu1 }
 0x413   : > { %v5546_v39 = vpop.f32.mrf.mxu1 }
 0x414   : > { %v8562_v37 = vadd.f32 %v5546_v39, %v5545_v54 }
 0x415   : > { %v5618_v58 = vpop.f32.mrf.mxu0  ;;  %4453 = vmatmul.mubr.bf16.gmra.mxu0 %v6474_v61 }
 0x416   : > { %4460 = vmatprep.mubr.bf16.mxu0 %v6484_v22  ;;  %v6503_v22 = vld [vmem:[#allocation2 + $0x3c4] ss:$36 sps:$4 sm:$0xff]  }
 0x417   : > { %v5619_v26 = vpop.f32.mrf.mxu0 }
 0x418   : > { %v5620_v48 = vadd.f32 %v5619_v26, %v5618_v58  ;;  %v5548_v52 = vpop.f32.mrf.mxu1  ;;  %6073 = vmatmul.mubr.bf16.vlgmr.msra.gmra.mxu1 %v6515_v19 }
 0x419   : > { %v5621_v1 = vpop.f32.mrf.mxu0  ;;  %6076 = vmatprep.mubr.bf16.mxu1 %v6516_v7 }
 0x41a   : > { %v8565_v62 = vadd.f32 %v5620_v48, %v8527_v2  ;;  %v5549_v15 = vpop.f32.mrf.mxu1 }
 0x41b   : > { %v5622_v34 = vpop.f32.mrf.mxu0  ;;  %v8567_v28 = vadd.f32 %v5549_v15, %v5548_v52 }
 0x41c   : > { %v5623_v59 = vadd.f32 %v5622_v34, %v5621_v1  ;;  %v5551_v45 = vpop.f32.mrf.mxu1  ;;  %v6521_v1 = vld [vmem:[#allocation2 + $0x218] ss:$36 sps:$4 sm:$0xff]  }
 0x41d   : > { %v5624_v21 = vpop.f32.mrf.mxu0  ;;  %4461 = vmatmul.mubr.bf16.gmra.mxu0 %v6482_v6  ;;  %v6522_v6 = vld [vmem:[#allocation2 + $0x260] ss:$36 sps:$4 sm:$0xff]  }
 0x41e   : > { %v8570_v16 = vadd.f32 %v5623_v59, %v8529_v63  ;;  %4468 = vmatprep.mubr.bf16.mxu0 %v6490_v43  ;;  %v5552_v30 = vpop.f32.mrf.mxu1  ;;  %v6501_v43 = vld [vmem:[#allocation2 + $0x3c0] ss:$36 sps:$4 sm:$0xff]  }
 0x41f   : > { %v5625_v29 = vpop.f32.mrf.mxu0  ;;  %v8572_v0 = vadd.f32 %v5552_v30, %v5551_v45 }
 0x420   : > { %v5626_v2 = vadd.f32 %v5625_v29, %v5624_v21  ;;  %v5554_v18 = vpop.f32.mrf.mxu1  ;;  %6077 = vmatmul.mubr.bf16.gmra.mxu1 %v6517_v25  ;;  %v6510_v21 = vld [vmem:[#allocation2 + $0x40c] ss:$36 sps:$4 sm:$0xff]  }
 0x421   : > { %v5627_v5 = vpop.f32.mrf.mxu0  ;;  %6080 = vmatprep.mubr.bf16.mxu1 %v6518_v42 }
 0x422   : > { %v8575_v9 = vadd.f32 %v5626_v2, %v8531_v13  ;;  %v5555_v33 = vpop.f32.mrf.mxu1 }
 0x423   : > { %v5628_v3 = vpop.f32.mrf.mxu0  ;;  %v8577_v56 = vadd.f32 %v5555_v33, %v5554_v18  ;;  %v6523_v18 = vld [vmem:[#allocation2 + $0x2a8] ss:$36 sps:$4 sm:$0xff]   ;;  %v6514_v33 = vld [vmem:[#allocation2 + $0x454] ss:$36 sps:$4 sm:$0xff]  }
 0x424   : > { %v5629_v63 = vadd.f32 %v5628_v3, %v5627_v5  ;;  %v5557_v55 = vpop.f32.mrf.mxu1 }
 0x425   : > { %v5630_v50 = vpop.f32.mrf.mxu0  ;;  %4469 = vmatmul.mubr.bf16.gmra.mxu0 %v6488_v60 }
 0x426   : > { %v8580_v20 = vadd.f32 %v5629_v63, %v8533_v41  ;;  %4476 = vmatprep.mubr.bf16.mxu0 %v6497_v23  ;;  %v5558_v4 = vpop.f32.mrf.mxu1  ;;  %v6524_v63 = vld [vmem:[#allocation2 + $0x2f0] ss:$36 sps:$4 sm:$0xff]  }
 0x427   : > { %v5631_v17 = vpop.f32.mrf.mxu0  ;;  %v8582_v46 = vadd.f32 %v5558_v4, %v5557_v55  ;;  %v6508_v55 = vld [vmem:[#allocation2 + $0x408] ss:$36 sps:$4 sm:$0xff]  }
 0x428   : > { %v5632_v13 = vadd.f32 %v5631_v17, %v5630_v50  ;;  %v5560_v10 = vpop.f32.mrf.mxu1  ;;  %6081 = vmatmul.mubr.bf16.gmra.mxu1 %v6519_v8 }
 0x429   : > { %v5633_v47 = vpop.f32.mrf.mxu0  ;;  %6084 = vmatprep.mubr.bf16.mxu1 %v6520_v49 }
 0x42a   : > { %v8585_v61 = vadd.f32 %v5632_v13, %v8535_v38  ;;  %v5561_v44 = vpop.f32.mrf.mxu1 }
 0x42b   : > { %v5634_v35 = vpop.f32.mrf.mxu0  ;;  %v8587_v54 = vadd.f32 %v5561_v44, %v5560_v10 }
 0x42c   : > { %v5635_v41 = vadd.f32 %v5634_v35, %v5633_v47  ;;  %v5563_v48 = vpop.f32.mrf.mxu1  ;;  %v6525_v35 = vld [vmem:[#allocation2 + $0x338] ss:$36 sps:$4 sm:$0xff]  }
 0x42d   : > { %v5636_v58 = vpop.f32.mrf.mxu0  ;;  %4477 = vmatmul.mubr.bf16.gmra.mxu0 %v6495_v14 }
 0x42e   : > { %v8590_v26 = vadd.f32 %v5635_v41, %v8537_v51  ;;  %4484 = vmatprep.mubr.bf16.mxu0 %v6503_v22  ;;  %v5564_v19 = vpop.f32.mrf.mxu1  ;;  %v6512_v22 = vld [vmem:[#allocation2 + $0x450] ss:$36 sps:$4 sm:$0xff]  }
 0x42f   : > { %v5637_v39 = vpop.f32.mrf.mxu0  ;;  %v8592_v52 = vadd.f32 %v5564_v19, %v5563_v48 }
 0x430   : > { %v5638_v38 = vadd.f32 %v5637_v39, %v5636_v58  ;;  %v5566_v59 = vpop.f32.mrf.mxu1  ;;  %6085 = vmatmul.mubr.bf16.gmra.mxu1 %v6521_v1  ;;  %v6526_v58 = vld [vmem:[#allocation2 + $0x380] ss:$36 sps:$4 sm:$0xff]  }
 0x431   : > { %v5639_v7 = vpop.f32.mrf.mxu0  ;;  %6088 = vmatprep.mubr.bf16.mxu1 %v6522_v6 }
 0x432   : > { %v8595_v34 = vadd.f32 %v5638_v38, %v8539_v31  ;;  %v5567_v45 = vpop.f32.mrf.mxu1 }
 0x433   : > { %v5640_v15 = vpop.f32.mrf.mxu0  ;;  %v8597_v2 = vadd.f32 %v5567_v45, %v5566_v59 }
 0x434   : > { %v5641_v51 = vadd.f32 %v5640_v15, %v5639_v7  ;;  %v5569_v25 = vpop.f32.mrf.mxu1 }
 0x435   : > { %v5642_v29 = vpop.f32.mrf.mxu0  ;;  %4485 = vmatmul.mubr.bf16.gmra.mxu0 %v6501_v43 }
 0x436   : > { %v8600_v30 = vadd.f32 %v5641_v51, %v8543_v24  ;;  %4492 = vmatprep.mubr.bf16.mxu0 %v6510_v21  ;;  %v5570_v42 = vpop.f32.mrf.mxu1  ;;  %v6527_v51 = vld [vmem:[#allocation2 + $0x3c8] ss:$36 sps:$4 sm:$0xff]  }
 0x437   : > { %v5643_v5 = vpop.f32.mrf.mxu0  ;;  %v8602_v3 = vadd.f32 %v5570_v42, %v5569_v25 }
 0x438   : > { %v5644_v31 = vadd.f32 %v5643_v5, %v5642_v29  ;;  %v5572_v50 = vpop.f32.mrf.mxu1  ;;  %6089 = vmatmul.mubr.bf16.gmra.mxu1 %v6523_v18  ;;  %v6528_v29 = vld [vmem:[#allocation2 + $0x410] ss:$36 sps:$4 sm:$0xff]  }
 0x439   : > { %v5645_v60 = vpop.f32.mrf.mxu0  ;;  %6092 = vmatprep.mubr.bf16.mxu1 %v6524_v63 }
 0x43a   : > { %v8605_v23 = vadd.f32 %v5644_v31, %v8545_v32  ;;  %v5573_v13 = vpop.f32.mrf.mxu1 }
 0x43b   : > { %v5646_v17 = vpop.f32.mrf.mxu0  ;;  %v8607_v8 = vadd.f32 %v5573_v13, %v5572_v50  ;;  %v6529_v50 = vld [vmem:[#allocation2 + $0x458] ss:$36 sps:$4 sm:$0xff]  }
 0x43c   : > { %v5647_v24 = vadd.f32 %v5646_v17, %v5645_v60  ;;  %v5575_v49 = vpop.f32.mrf.mxu1 }
 0x43d   : > { %v5648_v4 = vpop.f32.mrf.mxu0  ;;  %4493 = vmatmul.mubr.bf16.gmra.mxu0 %v6508_v55 }
 0x43e   : > { %v8610_v47 = vadd.f32 %v5647_v24, %v8547_v40  ;;  %4500 = vmatprep.mubr.bf16.mxu0 %v6514_v33  ;;  %v5576_v14 = vpop.f32.mrf.mxu1 }
 0x43f   : > { %v5649_v10 = vpop.f32.mrf.mxu0  ;;  %v8612_v44 = vadd.f32 %v5576_v14, %v5575_v49 }
 0x440   : > { %v5650_v32 = vadd.f32 %v5649_v10, %v5648_v4  ;;  %v5578_v39 = vpop.f32.mrf.mxu1  ;;  %6093 = vmatmul.mubr.bf16.gmra.mxu1 %v6525_v35 }
 0x441   : > { %v5651_v41 = vpop.f32.mrf.mxu0  ;;  %6096 = vmatprep.mubr.bf16.mxu1 %v6526_v58 }
 0x442   : > { %v8615_v48 = vadd.f32 %v5650_v32, %v8549_v27  ;;  %v5579_v19 = vpop.f32.mrf.mxu1 }
 0x443   : > { %v5652_v38 = vpop.f32.mrf.mxu0  ;;  %v8617_v7 = vadd.f32 %v5579_v19, %v5578_v39 }
 0x444   : > { %v5653_v40 = vadd.f32 %v5652_v38, %v5651_v41  ;;  %v5581_v59 = vpop.f32.mrf.mxu1 }
 0x445   : > { %v5654_v1 = vpop.f32.mrf.mxu0  ;;  %4501 = vmatmul.mubr.bf16.gmra.mxu0 %v6512_v22 }
 0x446   : > { %v8620_v6 = vadd.f32 %v5653_v40, %v8551_v11  ;;  %6136 = vmatprep.mubr.msk.f32.mxu0 %vm6723_vm6, %v9556_v53  ;;  %v5582_v15 = vpop.f32.mrf.mxu1 }
 0x447   : > { %v5655_v43 = vpop.f32.mrf.mxu0  ;;  %v8624_v45 = vadd.f32 %v5582_v15, %v5581_v59  ;;  %v4794_v15 = vld [vmem:[#allocation8 + $0x78] sm:$0xff] }
 0x448   : > { %v5656_v27 = vadd.f32 %v5655_v43, %v5654_v1  ;;  %v5584_v5 = vpop.f32.mrf.mxu1  ;;  %6097 = vmatmul.mubr.bf16.gmra.mxu1 %v6527_v51  ;;  %6105 = vmatpush3.msra.mxu0 %v4794_v15 }
 0x449   : > { %v5657_v21 = vpop.f32.mrf.mxu0  ;;  %6100 = vmatprep.mubr.bf16.mxu1 %v6528_v29  ;;  %6106 = vmatprep.subr.mxu0 %v9556_v53 }
 0x44a   : > { %v8627_v25 = vadd.f32 %v5656_v27, %v8558_v12  ;;  %v5585_v42 = vpop.f32.mrf.mxu1 }
 0x44b   : > { %v5658_v31 = vpop.f32.mrf.mxu0  ;;  %v8629_v60 = vadd.f32 %v5585_v42, %v5584_v5 }
 0x44c   : > { %v5659_v11 = vadd.f32 %v5658_v31, %v5657_v21  ;;  %v5587_v33 = vpop.f32.mrf.mxu1 }
 0x44d   : > { %v5660_v18 = vpop.f32.mrf.mxu0 }
 0x44e   : > { %v8632_v63 = vadd.f32 %v5659_v11, %v8562_v37  ;;  %v5588_v24 = vpop.f32.mrf.mxu1 }
 0x44f   : > { %v5661_v55 = vpop.f32.mrf.mxu0  ;;  %v8634_v12 = vadd.f32 %v5588_v24, %v5587_v33 }
 0x450   : > { %v5662_v17 = vadd.f32 %v5661_v55, %v5660_v18  ;;  %v5590_v49 = vpop.f32.mrf.mxu1  ;;  %6101 = vmatmul.mubr.bf16.gmra.mxu1 %v6529_v50 }
 0x451   : > { %v5663_v13 = vpop.f32.mrf.mxu0 }
 0x452   : > { %v8637_v4 = vadd.f32 %v5662_v17, %v8567_v28  ;;  %v5591_v14 = vpop.f32.mrf.mxu1 }
 0x453   : > { %v5664_v10 = vpop.f32.mrf.mxu0  ;;  %v8639_v41 = vadd.f32 %v5591_v14, %v5590_v49 }
 0x454   : > { %v5665_v32 = vadd.f32 %v5664_v10, %v5663_v13  ;;  %v5593_v22 = vpop.f32.mrf.mxu1  ;;  %v4793_v13 = vld [vmem:[#allocation8 + $0x70] sm:$0xff] }
 0x455   : > { %v5666_v35 = vpop.f32.mrf.mxu0  ;;  %6107 = vmatpush3.msra.mxu0 %v4793_v13 }
 0x456   : > { %v8642_v37 = vadd.f32 %v5665_v32, %v8572_v0  ;;  %v5594_v38 = vpop.f32.mrf.mxu1  ;;  %6108 = vmatprep.subr.mxu0 %v9556_v53 }
 0x457   : > { %v5667_v58 = vpop.f32.mrf.mxu0  ;;  %v8644_v19 = vadd.f32 %v5594_v38, %v5593_v22 }
 0x458   : > { %v5668_v39 = vadd.f32 %v5667_v58, %v5666_v35  ;;  %v5724_v1 = vpop.f32.mrf.mxu1 }
 0x459   : > { %v5669_v40 = vpop.f32.mrf.mxu0 }
 0x45a   : > { %v8647_v28 = vadd.f32 %v5668_v39, %v8577_v56  ;;  %v5725_v27 = vpop.f32.mrf.mxu1 }
 0x45b   : > { %v5670_v59 = vpop.f32.mrf.mxu0  ;;  %v5726_v21 = vadd.f32 %v5725_v27, %v5724_v1 }
 0x45c   : > { %v5671_v43 = vadd.f32 %v5670_v59, %v5669_v40  ;;  %v5727_v29 = vpop.f32.mrf.mxu1 }
 0x45d   : > { %v5672_v51 = vpop.f32.mrf.mxu0  ;;  %v8654_v31 = vadd.f32 %v5726_v21, %v8554_v36 }
 0x45e   : > { %v8650_v0 = vadd.f32 %v5671_v43, %v8582_v46  ;;  %v5728_v11 = vpop.f32.mrf.mxu1  ;;  %v4792_v43 = vld [vmem:[#allocation8 + $0x68] sm:$0xff] }
 0x45f   : > { %v5673_v5 = vpop.f32.mrf.mxu0  ;;  %v5729_v18 = vadd.f32 %v5728_v11, %v5727_v29  ;;  %6109 = vmatpush3.msra.mxu0 %v4792_v43 }
 0x460   : > { %v5674_v56 = vadd.f32 %v5673_v5, %v5672_v51  ;;  %v5730_v50 = vpop.f32.mrf.mxu1  ;;  %6110 = vmatprep.subr.mxu0 %v9556_v53 }
 0x461   : > { %v5675_v42 = vpop.f32.mrf.mxu0  ;;  %v8660_v17 = vadd.f32 %v5729_v18, %v8560_v57 }
 0x462   : > { %v8657_v33 = vadd.f32 %v5674_v56, %v8587_v54  ;;  %v5731_v24 = vpop.f32.mrf.mxu1 }
 0x463   : > { %v5676_v55 = vpop.f32.mrf.mxu0  ;;  %v5732_v10 = vadd.f32 %v5731_v24, %v5730_v50 }
 0x464   : > { %v5677_v46 = vadd.f32 %v5676_v55, %v5675_v42  ;;  %v5733_v32 = vpop.f32.mrf.mxu1 }
 0x465   : > { %v5678_v49 = vpop.f32.mrf.mxu0  ;;  %v8667_v54 = vadd.f32 %v5732_v10, %v8565_v62 }
 0x466   : > { %v8663_v36 = vadd.f32 %v5677_v46, %v8592_v52  ;;  %v5734_v22 = vpop.f32.mrf.mxu1  ;;  %v4791_v46 = vld [vmem:[#allocation8 + $0x60] sm:$0xff] }
 0x467   : > { %v5679_v14 = vpop.f32.mrf.mxu0  ;;  %v5735_v58 = vadd.f32 %v5734_v22, %v5733_v32  ;;  %6111 = vmatpush3.msra.mxu0 %v4791_v46 }
 0x468   : > { %v5680_v35 = vadd.f32 %v5679_v14, %v5678_v49  ;;  %v5736_v38 = vpop.f32.mrf.mxu1  ;;  %6112 = vmatprep.subr.mxu0 %v9556_v53 }
 0x469   : > { %v5681_v57 = vpop.f32.mrf.mxu0  ;;  %v8673_v1 = vadd.f32 %v5735_v58, %v8570_v16 }
 0x46a   : > { %v8670_v39 = vadd.f32 %v5680_v35, %v8597_v2  ;;  %v5737_v59 = vpop.f32.mrf.mxu1 }
 0x46b   : > { %v5682_v40 = vpop.f32.mrf.mxu0  ;;  %v5738_v15 = vadd.f32 %v5737_v59, %v5736_v38 }
 0x46c   : > { %v5683_v52 = vadd.f32 %v5682_v40, %v5681_v57  ;;  %v5739_v51 = vpop.f32.mrf.mxu1 }
 0x46d   : > { %v5684_v27 = vpop.f32.mrf.mxu0  ;;  %v8680_v2 = vadd.f32 %v5738_v15, %v8575_v9 }
 0x46e   : > { %v8676_v62 = vadd.f32 %v5683_v52, %v8602_v3  ;;  %v5740_v5 = vpop.f32.mrf.mxu1  ;;  %v4790_v52 = vld [vmem:[#allocation8 + $0x58] sm:$0xff] }
 0x46f   : > { %v5685_v21 = vpop.f32.mrf.mxu0  ;;  %v5741_v56 = vadd.f32 %v5740_v5, %v5739_v51  ;;  %6113 = vmatpush3.msra.mxu0 %v4790_v52 }
 0x470   : > { %v5686_v29 = vadd.f32 %v5685_v21, %v5684_v27  ;;  %v5742_v42 = vpop.f32.mrf.mxu1  ;;  %6114 = vmatprep.subr.mxu0 %v9556_v53 }
 0x471   : > { %v5687_v16 = vpop.f32.mrf.mxu0  ;;  %v8686_v50 = vadd.f32 %v5741_v56, %v8580_v20 }
 0x472   : > { %v8683_v11 = vadd.f32 %v5686_v29, %v8607_v8  ;;  %v5743_v55 = vpop.f32.mrf.mxu1 }
 0x473   : > { %v5688_v18 = vpop.f32.mrf.mxu0  ;;  %v5744_v13 = vadd.f32 %v5743_v55, %v5742_v42 }
 0x474   : > { %v5689_v3 = vadd.f32 %v5688_v18, %v5687_v16  ;;  %v5745_v49 = vpop.f32.mrf.mxu1 }
 0x475   : > { %v5690_v24 = vpop.f32.mrf.mxu0  ;;  %v8693_v8 = vadd.f32 %v5744_v13, %v8585_v61 }
 0x476   : > { %v8689_v9 = vadd.f32 %v5689_v3, %v8612_v44  ;;  %v5746_v14 = vpop.f32.mrf.mxu1  ;;  %v4789_v3 = vld [vmem:[#allocation8 + $0x50] sm:$0xff] }
 0x477   : > { %v5691_v10 = vpop.f32.mrf.mxu0  ;;  %v5747_v35 = vadd.f32 %v5746_v14, %v5745_v49  ;;  %6115 = vmatpush3.msra.mxu0 %v4789_v3  ;;  %v4783_v3 = vld [vmem:[#allocation8 + $0x20] sm:$0xff] }
 0x478   : > { %v5692_v32 = vadd.f32 %v5691_v10, %v5690_v24  ;;  %v5748_v57 = vpop.f32.mrf.mxu1  ;;  %6116 = vmatprep.subr.mxu0 %v9556_v53 }
 0x479   : > { %v5693_v20 = vpop.f32.mrf.mxu0  ;;  %v8699_v38 = vadd.f32 %v5747_v35, %v8590_v26 }
 0x47a   : > { %v8696_v22 = vadd.f32 %v5692_v32, %v8617_v7  ;;  %v5749_v40 = vpop.f32.mrf.mxu1 }
 0x47b   : > { %v5694_v58 = vpop.f32.mrf.mxu0  ;;  %v5750_v43 = vadd.f32 %v5749_v40, %v5748_v57  ;;  %v4787_v40 = vld [vmem:[#allocation8 + $0x40] sm:$0xff] }
 0x47c   : > { %v5695_v44 = vadd.f32 %v5694_v58, %v5693_v20  ;;  %v5751_v27 = vpop.f32.mrf.mxu1 }
 0x47d   : > { %v5696_v59 = vpop.f32.mrf.mxu0  ;;  %v8706_v7 = vadd.f32 %v5750_v43, %v8595_v34 }
 0x47e   : > { %v8702_v61 = vadd.f32 %v5695_v44, %v8624_v45  ;;  %v5752_v21 = vpop.f32.mrf.mxu1  ;;  %v4788_v44 = vld [vmem:[#allocation8 + $0x48] sm:$0xff] }
 0x47f   : > { %v5697_v15 = vpop.f32.mrf.mxu0  ;;  %v5753_v29 = vadd.f32 %v5752_v21, %v5751_v27  ;;  %6117 = vmatpush3.msra.mxu0 %v4788_v44  ;;  %v4785_v21 = vld [vmem:[#allocation8 + $0x30] sm:$0xff] }
 0x480   : > { %v5698_v51 = vadd.f32 %v5697_v15, %v5696_v59  ;;  %v5754_v16 = vpop.f32.mrf.mxu1  ;;  %6118 = vmatprep.subr.mxu0 %v9556_v53 }
 0x481   : > { %v5699_v26 = vpop.f32.mrf.mxu0  ;;  %v8712_v42 = vadd.f32 %v5753_v29, %v8600_v30  ;;  %6119 = vmatpush3.msra.mxu0 %v4787_v40 }
 0x482   : > { %v8709_v5 = vadd.f32 %v5698_v51, %v8629_v60  ;;  %v5755_v18 = vpop.f32.mrf.mxu1  ;;  %6120 = vmatprep.subr.mxu0 %v9556_v53 }
 0x483   : > { %v5700_v56 = vpop.f32.mrf.mxu0  ;;  %v5756_v46 = vadd.f32 %v5755_v18, %v5754_v16 }
 0x484   : > { %v5701_v45 = vadd.f32 %v5700_v56, %v5699_v26  ;;  %v5757_v24 = vpop.f32.mrf.mxu1  ;;  %v4784_v56 = vld [vmem:[#allocation8 + $0x28] sm:$0xff] }
 0x485   : > { %v5702_v55 = vpop.f32.mrf.mxu0  ;;  %v8719_v60 = vadd.f32 %v5756_v46, %v8605_v23 }
 0x486   : > { %v8715_v34 = vadd.f32 %v5701_v45, %v8634_v12  ;;  %v5758_v10 = vpop.f32.mrf.mxu1 }
 0x487   : > { %v5703_v13 = vpop.f32.mrf.mxu0  ;;  %v5759_v32 = vadd.f32 %v5758_v10, %v5757_v24 }
 0x488   : > { %v5704_v49 = vadd.f32 %v5703_v13, %v5702_v55  ;;  %v5760_v20 = vpop.f32.mrf.mxu1 }
 0x489   : > { %v5705_v30 = vpop.f32.mrf.mxu0  ;;  %v8725_v57 = vadd.f32 %v5759_v32, %v8610_v47 }
 0x48a   : > { %v8722_v14 = vadd.f32 %v5704_v49, %v8639_v41  ;;  %v5761_v58 = vpop.f32.mrf.mxu1  ;;  %v4786_v41 = vld [vmem:[#allocation8 + $0x38] sm:$0xff] }
 0x48b   : > { %v5706_v35 = vpop.f32.mrf.mxu0  ;;  %v5762_v59 = vadd.f32 %v5761_v58, %v5760_v20  ;;  %6121 = vmatpush3.msra.mxu0 %v4786_v41 }
 0x48c   : > { %v5707_v12 = vadd.f32 %v5706_v35, %v5705_v30  ;;  %v5763_v43 = vpop.f32.mrf.mxu1  ;;  %6122 = vmatprep.subr.mxu0 %v9556_v53 }
 0x48d   : > { %v5836_v52 = vpop.f32.mrf.mxu0  ;;  %v8732_v15 = vadd.f32 %v5762_v59, %v8615_v48  ;;  %6123 = vmatpush3.msra.mxu0 %v4785_v21 }
 0x48e   : > { %v8728_v23 = vadd.f32 %v5707_v12, %v8644_v19  ;;  %v5764_v51 = vpop.f32.mrf.mxu1  ;;  %6124 = vmatprep.subr.mxu0 %v9556_v53 }
 0x48f   : > { %v5837_v27 = vpop.f32.mrf.mxu0  ;;  %v5765_v29 = vadd.f32 %v5764_v51, %v5763_v43  ;;  %6125 = vmatpush3.msra.mxu0 %v4784_v56 }
 0x490   : > { %v5838_v47 = vadd.f32 %v5837_v27, %v5836_v52  ;;  %v5766_v19 = vpop.f32.mrf.mxu1  ;;  %6126 = vmatprep.subr.mxu0 %v9556_v53 }
 0x491   : > { %v8735_v26 = vpop.f32.mrf.mxu0  ;;  %v8744_v48 = vadd.f32 %v5765_v29, %v8620_v6  ;;  %6127 = vmatpush3.msra.mxu0 %v4783_v3  ;;  %v4782_v6 = vld [vmem:[#allocation8 + $0x18] sm:$0xff]  ;;  %v4780_v3 = vld [vmem:[#allocation8 + $0x8] sm:$0xff] }
 0x492   : > { %v8738_v16 = vadd.f32 %v5838_v47, %v8654_v31  ;;  %v5767_v18 = vpop.f32.mrf.mxu1  ;;  %6128 = vmatprep.subr.mxu0 %v9556_v53 }
 0x493   : > { %v8741_v45 = vpop.f32.mrf.mxu0  ;;  %9560 = vst [vmem:[#allocation25_spill] sm:$0xff] %v8744_v48  ;;  %v5768_v46 = vadd.f32 %v5767_v18, %v5766_v19  ;;  %6129 = vmatpush3.msra.mxu0 %v4782_v6  ;;  %v4781_v18 = vld [vmem:[#allocation8 + $0x10] sm:$0xff] }
 0x494   : > { %v5769_v24 = vpop.f32.mrf.mxu1  ;;  %6130 = vmatprep.subr.mxu0 %v9556_v53 }
 0x495   : > { %v8747_v55 = vpop.f32.mrf.mxu0  ;;  %v8753_v13 = vadd.f32 %v5768_v46, %v8627_v25  ;;  %6131 = vmatpush3.msra.mxu0 %v4781_v18 }
 0x496   : > { %v5770_v49 = vpop.f32.mrf.mxu1  ;;  %6132 = vmatprep.subr.mxu0 %v9556_v53 }
 0x497   : > { %v8750_v31 = vpop.f32.mrf.mxu0  ;;  %v5771_v30 = vadd.f32 %v5770_v49, %v5769_v24  ;;  %6133 = vmatpush3.msra.mxu0 %v4780_v3 }
 0x498   : > { %v5772_v32 = vpop.f32.mrf.mxu1  ;;  %6134 = vmatprep.subr.mxu0 %v9556_v53 }
 0x499   : > { %v8756_v10 = vpop.f32.mrf.mxu0  ;;  %v8762_v35 = vadd.f32 %v5771_v30, %v8632_v63 }
 0x49a   : > { %v5773_v12 = vpop.f32.mrf.mxu1 }
 0x49b   : > { %v8759_v20 = vpop.f32.mrf.mxu0  ;;  %9561 = vst [vmem:[#allocation26_spill] sm:$0xff] %v8762_v35  ;;  %v5774_v58 = vadd.f32 %v5773_v12, %v5772_v32 }
 0x49c   : > { %v5775_v44 = vpop.f32.mrf.mxu1 }
 0x49d   : > { %v8764_v25 = vpop.f32.mrf.mxu0  ;;  %v8769_v52 = vadd.f32 %v5774_v58, %v8637_v4 }
 0x49e   : > { %v5776_v59 = vpop.f32.mrf.mxu1 }
 0x49f   : > { %v8766_v40 = vpop.f32.mrf.mxu0  ;;  %9562 = vst [vmem:[#allocation27_spill] sm:$0xff] %v8769_v52  ;;  %v5777_v41 = vadd.f32 %v5776_v59, %v5775_v44 }
 0x4a0   : > { %v5778_v27 = vpop.f32.mrf.mxu1 }
 0x4a1   : > { %v8771_v43 = vpop.f32.mrf.mxu0  ;;  %v8776_v63 = vadd.f32 %v5777_v41, %v8642_v37  ;;  %v4779_v37 = vld [vmem:[#allocation8] sm:$0xff] }
 0x4a2   : > { %v5779_v51 = vpop.f32.mrf.mxu1  ;;  %6135 = vmatpush3.msra.mxu0 %v4779_v37 }
 0x4a3   : > { %v8773_v47 = vpop.f32.mrf.mxu0  ;;  %9563 = vst [vmem:[#allocation28_spill] sm:$0xff] %v8776_v63  ;;  %v5780_v29 = vadd.f32 %v5779_v51, %v5778_v27 }
 0x4a4   : > { %v5781_v19 = vpop.f32.mrf.mxu1 }
 0x4a5   : > { %v8778_v21 = vpop.f32.mrf.mxu0  ;;  %v8783_v4 = vadd.f32 %v5780_v29, %v8647_v28 }
 0x4a6   : > { %v5782_v46 = vpop.f32.mrf.mxu1 }
 0x4a7   : > { %v8780_v56 = vpop.f32.mrf.mxu0  ;;  %9564 = vst [vmem:[#allocation29_spill] sm:$0xff] %v8783_v4  ;;  %v5783_v6 = vadd.f32 %v5782_v46, %v5781_v19 }
 0x4a8   : > { %v5784_v49 = vpop.f32.mrf.mxu1 }
 0x4a9   : > { %v8785_v24 = vpop.f32.mrf.mxu0  ;;  %v8791_v32 = vadd.f32 %v5783_v6, %v8650_v0 }
 0x4aa   : > { %v5785_v28 = vpop.f32.mrf.mxu1 }
 0x4ab   : > { %v8788_v30 = vpop.f32.mrf.mxu0  ;;  %9565 = vst [vmem:[#allocation30_spill] sm:$0xff] %v8791_v32  ;;  %v5786_v58 = vadd.f32 %v5785_v28, %v5784_v49 }
 0x4ac   : > { %v5787_v44 = vpop.f32.mrf.mxu1 }
 0x4ad   : > { %v8794_v12 = vpop.f32.mrf.mxu0  ;;  %v8799_v41 = vadd.f32 %v5786_v58, %v8657_v33 }
 0x4ae   : > { %v5788_v27 = vpop.f32.mrf.mxu1 }
 0x4af   : > { %v8796_v59 = vpop.f32.mrf.mxu0  ;;  %9566 = vst [vmem:[#allocation21_spill] sm:$0xff] %v8799_v41  ;;  %v5789_v29 = vadd.f32 %v5788_v27, %v5787_v44 }
 0x4b0   : > { %v5790_v19 = vpop.f32.mrf.mxu1 }
 0x4b1   : > { %v8801_v51 = vpop.f32.mrf.mxu0  ;;  %v8806_v53 = vadd.f32 %v5789_v29, %v8663_v36 }
 0x4b2   : > { %v5791_v18 = vpop.f32.mrf.mxu1 }
 0x4b3   : > { %v8803_v0 = vpop.f32.mrf.mxu0  ;;  %9567 = vst [vmem:[#allocation22_spill] sm:$0xff] %v8806_v53  ;;  %v5792_v46 = vadd.f32 %v5791_v18, %v5790_v19 }
 0x4b4   : > { %v5793_v6 = vpop.f32.mrf.mxu1 }
 0x4b5   : > { %v8808_v3 = vpop.f32.mrf.mxu0  ;;  %v8813_v33 = vadd.f32 %v5792_v46, %v8670_v39 }
 0x4b6   : > { %v5794_v49 = vpop.f32.mrf.mxu1 }
 0x4b7   : > { %v8810_v37 = vpop.f32.mrf.mxu0  ;;  %9568 = vst [vmem:[#allocation31_spill] sm:$0xff] %v8813_v33  ;;  %v5795_v58 = vadd.f32 %v5794_v49, %v5793_v6 }
 0x4b8   : > { %v5796_v44 = vpop.f32.mrf.mxu1 }
 0x4b9   : > { %v8815_v28 = vpop.f32.mrf.mxu0  ;;  %v8820_v36 = vadd.f32 %v5795_v58, %v8676_v62 }
 0x4ba   : > { %v5797_v29 = vpop.f32.mrf.mxu1 }
 0x4bb   : > { %v8817_v27 = vpop.f32.mrf.mxu0  ;;  %9569 = vst [vmem:[#allocation32_spill] sm:$0xff] %v8820_v36  ;;  %v5798_v19 = vadd.f32 %v5797_v29, %v5796_v44 }
 0x4bc   : > { %v5799_v18 = vpop.f32.mrf.mxu1 }
 0x4bd   : > { %v8822_v53 = vpop.f32.mrf.mxu0  ;;  %v8827_v39 = vadd.f32 %v5798_v19, %v8683_v11 }
 0x4be   : > { %v5800_v46 = vpop.f32.mrf.mxu1 }
 0x4bf   : > { %v8824_v41 = vpop.f32.mrf.mxu0  ;;  %9570 = vst [vmem:[#allocation33_spill] sm:$0xff] %v8827_v39  ;;  %v5801_v6 = vadd.f32 %v5800_v46, %v5799_v18 }
 0x4c0   : > { %v5802_v49 = vpop.f32.mrf.mxu1 }
 0x4c1   : > { %v8829_v33 = vpop.f32.mrf.mxu0  ;;  %v8834_v62 = vadd.f32 %v5801_v6, %v8689_v9 }
 0x4c2   : > { %v5803_v58 = vpop.f32.mrf.mxu1 }
 0x4c3   : > { %v8831_v32 = vpop.f32.mrf.mxu0  ;;  %9571 = vst [vmem:[#allocation24_spill] sm:$0xff] %v8834_v62  ;;  %v5804_v44 = vadd.f32 %v5803_v58, %v5802_v49 }
 0x4c4   : > { %v5805_v29 = vpop.f32.mrf.mxu1 }
 0x4c5   : > { %v8836_v36 = vpop.f32.mrf.mxu0  ;;  %v8841_v11 = vadd.f32 %v5804_v44, %v8696_v22 }
 0x4c6   : > { %v5806_v19 = vpop.f32.mrf.mxu1 }
 0x4c7   : > { %v8838_v63 = vpop.f32.mrf.mxu0  ;;  %9572 = vst [vmem:[#allocation34_spill] sm:$0xff] %v8841_v11  ;;  %v5807_v18 = vadd.f32 %v5806_v19, %v5805_v29 }
 0x4c8   : > { %v5808_v46 = vpop.f32.mrf.mxu1 }
 0x4c9   : > { %v8843_v39 = vpop.f32.mrf.mxu0  ;;  %v8848_v9 = vadd.f32 %v5807_v18, %v8702_v61 }
 0x4ca   : > { %v5809_v6 = vpop.f32.mrf.mxu1 }
 0x4cb   : > { %v8845_v4 = vpop.f32.mrf.mxu0  ;;  %9573 = vst [vmem:[#allocation23_spill] sm:$0xff] %v8848_v9  ;;  %v5810_v49 = vadd.f32 %v5809_v6, %v5808_v46 }
 0x4cc   : > { %v5811_v58 = vpop.f32.mrf.mxu1 }
 0x4cd   : > { %v8850_v62 = vpop.f32.mrf.mxu0  ;;  %v8855_v22 = vadd.f32 %v5810_v49, %v8709_v5 }
 0x4ce   : > { %v5812_v44 = vpop.f32.mrf.mxu1 }
 0x4cf   : > { %v8852_v52 = vpop.f32.mrf.mxu0  ;;  %9574 = vst [vmem:[#allocation16_spill] sm:$0xff] %v8855_v22  ;;  %v5813_v29 = vadd.f32 %v5812_v44, %v5811_v58 }
 0x4d0   : > { %v5814_v19 = vpop.f32.mrf.mxu1 }
 0x4d1   : > { %v8857_v11 = vpop.f32.mrf.mxu0  ;;  %v8862_v61 = vadd.f32 %v5813_v29, %v8715_v34  ;;  %v5844_v34 = vadd.f32 %v8750_v31, %v8747_v55 }
 0x4d2   : > { %v5815_v18 = vpop.f32.mrf.mxu1 }
 0x4d3   : > { %v8859_v35 = vpop.f32.mrf.mxu0  ;;  %9576 = vst [vmem:[#allocation35_spill] sm:$0xff] %v8862_v61  ;;  %v5816_v46 = vadd.f32 %v5815_v18, %v5814_v19 }
 0x4d4   : > { %9575 = vst [vmem:[#allocation17_spill] sm:$0xff] %v8859_v35  ;;  %v5817_v6 = vpop.f32.mrf.mxu1  ;;  %v5841_v35 = vadd.f32 %v8741_v45, %v8735_v26  ;;  %v4391_v26 = vadd.f32 %v5844_v34, %v8667_v54  ;;  %v5856_v54 = vadd.f32 %v8780_v56, %v8778_v21 }
 0x4d5   : > { %v8864_v9 = vpop.f32.mrf.mxu0  ;;  %v8869_v5 = vadd.f32 %v5816_v46, %v8722_v14  ;;  %v5847_v14 = vadd.f32 %v8759_v20, %v8756_v10 }
 0x4d6   : > { %v5818_v49 = vpop.f32.mrf.mxu1 }
 0x4d7   : > { %v8866_v48 = vpop.f32.mrf.mxu0  ;;  %v5819_v58 = vadd.f32 %v5818_v49, %v5817_v6  ;;  %v5850_v6 = vadd.f32 %v8766_v40, %v8764_v25  ;;  %v4394_v10 = vadd.f32 %v5847_v14, %v8673_v1  ;;  %v5853_v25 = vadd.f32 %v8773_v47, %v8771_v43 }
 0x4d8   : > { %v6074_v44 = vpop.f32.mrf.mxu1  ;;  %v5859_v43 = vadd.f32 %v8788_v30, %v8785_v24 }
 0x4d9   : > { %v8871_v22 = vpop.f32.mrf.mxu0  ;;  %v8880_v19 = vadd.f32 %v5819_v58, %v8728_v23  ;;  %v4386_v23 = vadd.f32 %v5841_v35, %v8660_v17  ;;  %v8897_v58 = vadd.f32 %v6074_v44, %v4391_v26 }
 0x4da   : > { %v4543_v18 = vpop.f32.mrf.mxu1 }
 0x4db   : > { %v8877_v29 = vpop.f32.mrf.mxu0  ;;  %v8892_v45 = vadd.f32 %v4543_v18, %v8738_v16  ;;  %v4399_v16 = vadd.f32 %v5850_v6, %v8680_v2  ;;  %v4711_v2 = vmul.f32 %v8897_v58, %v8897_v58  ;;  %v5862_v6 = vadd.f32 %v8796_v59, %v8794_v12 }
 0x4dc   : > { %v6075_v49 = vpop.f32.mrf.mxu1 }
 0x4dd   : > { %v8884_v46 = vpop.f32.mrf.mxu0  ;;  %v4709_v17 = vmul.f32 %v8892_v45, %v8892_v45  ;;  %v8911_v35 = vadd.f32 %v6075_v49, %v4394_v10  ;;  %v4407_v49 = vadd.f32 %v5856_v54, %v8693_v8  ;;  %v4402_v10 = vadd.f32 %v5853_v25, %v8686_v50 }
 0x4de   : > { %v4546_v55 = vpop.f32.mrf.mxu1  ;;  %v5868_v50 = vadd.f32 %v8810_v37, %v8808_v3 }
 0x4df   : > { %v8888_v61 = vpop.f32.mrf.mxu0  ;;  %v8900_v20 = vadd.f32 %v4546_v55, %v4386_v23  ;;  %v4712_v24 = vmul.f32 %v8911_v35, %v8911_v35 }
 0x4e0   : > { %v6078_v40 = vpop.f32.mrf.mxu1 }
 0x4e1   : > { %v8895_v31 = vpop.f32.mrf.mxu0  ;;  %v4672_v1 = vadd.f32 %v8900_v20, %v8892_v45  ;;  %v4710_v44 = vmul.f32 %v8900_v20, %v8900_v20 }
 0x4e2   : > { %v4559_v47 = vpop.f32.mrf.mxu1 }
 0x4e3   : > { %v8907_v34 = vpop.f32.mrf.mxu0  ;;  %v4673_v56 = vadd.f32 %v4672_v1, %v8897_v58  ;;  %v4741_v18 = vadd.f32 %v4710_v44, %v4709_v17  ;;  %v8924_v14 = vadd.f32 %v4559_v47, %v4399_v16  ;;  %v8935_v1 = vadd.f32 %v6078_v40, %v4407_v49 }
 0x4e4   : > { %v6079_v26 = vpop.f32.mrf.mxu1  ;;  %v4410_v16 = vadd.f32 %v5859_v43, %v8699_v38  ;;  %v5865_v47 = vadd.f32 %v8803_v0, %v8801_v51  ;;  %v4415_v38 = vadd.f32 %v5862_v6, %v8706_v7  ;;  %v5871_v49 = vadd.f32 %v8817_v27, %v8815_v28 }
 0x4e5   : > { %v8919_v21 = vpop.f32.mrf.mxu0  ;;  %v4742_v30 = vadd.f32 %v4741_v18, %v4711_v2  ;;  %v4674_v55 = vadd.f32 %v4673_v56, %v8911_v35  ;;  %v4713_v12 = vmul.f32 %v8924_v14, %v8924_v14  ;;  %v4715_v3 = vmul.f32 %v8935_v1, %v8935_v1 }
 0x4e6   : > { %v4562_v17 = vpop.f32.mrf.mxu1  ;;  %v8952_v2 = vadd.f32 %v6079_v26, %v4410_v16  ;;  %v5874_v26 = vadd.f32 %v8824_v41, %v8822_v53  ;;  %v4418_v16 = vadd.f32 %v5865_v47, %v8712_v42  ;;  %v5880_v42 = vadd.f32 %v8838_v63, %v8836_v36 }
 0x4e7   : > { %v8929_v23 = vpop.f32.mrf.mxu0  ;;  %v4675_v8 = vadd.f32 %v4674_v55, %v8924_v14  ;;  %v4743_v59 = vadd.f32 %v4742_v30, %v4712_v24  ;;  %v8943_v54 = vadd.f32 %v4562_v17, %v4402_v10  ;;  %v4423_v24 = vadd.f32 %v5868_v50, %v8719_v60 }
 0x4e8   : > { %v6082_v25 = vpop.f32.mrf.mxu1  ;;  %v4716_v28 = vmul.f32 %v8952_v2, %v8952_v2 }
 0x4e9   : > { %v8938_v44 = vpop.f32.mrf.mxu0  ;;  %v4744_v43 = vadd.f32 %v4743_v59, %v4713_v12  ;;  %v4676_v56 = vadd.f32 %v4675_v8, %v8943_v54  ;;  %v4714_v18 = vmul.f32 %v8943_v54, %v8943_v54  ;;  %v8975_v17 = vadd.f32 %v6082_v25, %v4423_v24 }
 0x4ea   : > { %v4575_v51 = vpop.f32.mrf.mxu1  ;;  %v4426_v8 = vadd.f32 %v5871_v49, %v8725_v57  ;;  %v4431_v57 = vadd.f32 %v5874_v26, %v8732_v15 }
 0x4eb   : > { %v8950_v40 = vpop.f32.mrf.mxu0  ;;  %v4677_v7 = vadd.f32 %v4676_v56, %v8935_v1  ;;  %v4745_v37 = vadd.f32 %v4744_v43, %v4714_v18  ;;  %v8964_v6 = vadd.f32 %v4575_v51, %v4415_v38  ;;  %v5877_v38 = vadd.f32 %v8831_v32, %v8829_v33 }
 0x4ec   : > { %v6083_v30 = vpop.f32.mrf.mxu1  ;;  %v5883_v51 = vadd.f32 %v8845_v4, %v8843_v39  ;;  %v4719_v63 = vmul.f32 %v8975_v17, %v8975_v17 }
 0x4ed   : > { %v8959_v0 = vpop.f32.mrf.mxu0  ;;  %v4746_v27 = vadd.f32 %v4745_v37, %v4715_v3  ;;  %v4678_v10 = vadd.f32 %v4677_v7, %v8952_v2  ;;  %v4717_v41 = vmul.f32 %v8964_v6, %v8964_v6  ;;  %v8992_v56 = vadd.f32 %v6083_v30, %v4426_v8 }
 0x4ee   : > { %v4578_v12 = vpop.f32.mrf.mxu1  ;;  %v5886_v7 = vadd.f32 %v8852_v52, %v8850_v62  ;;  %v4439_v37 = vadd.f32 %v5880_v42, %v8753_v13 }
 0x4ef   : > { %v8969_v55 = vpop.f32.mrf.mxu0  ;;  %v4679_v60 = vadd.f32 %v4678_v10, %v8964_v6  ;;  %v4747_v53 = vadd.f32 %v4746_v27, %v4716_v28  ;;  %v8983_v50 = vadd.f32 %v4578_v12, %v4418_v16  ;;  %v4720_v4 = vmul.f32 %v8992_v56, %v8992_v56  ;;  %v9577_v28 = vld [vmem:[#allocation25_spill] sm:$0xff]  ;;  %v9578_v16 = vld [vmem:[#allocation26_spill] sm:$0xff] }
 0x4f0   : > { %v6086_v47 = vpop.f32.mrf.mxu1  ;;  %v4434_v27 = vadd.f32 %v5877_v38, %v9577_v28  ;;  %v4442_v8 = vadd.f32 %v5883_v51, %v9578_v16  ;;  %v5892_v38 = vadd.f32 %v8866_v48, %v8864_v9  ;;  %v9582_v16 = vld [vmem:[#allocation28_spill] sm:$0xff] }
 0x4f1   : > { %v8978_v59 = vpop.f32.mrf.mxu0  ;;  %v4748_v43 = vadd.f32 %v4747_v53, %v4717_v41  ;;  %v4680_v18 = vadd.f32 %v4679_v60, %v8983_v50  ;;  %v4718_v49 = vmul.f32 %v8983_v50, %v8983_v50  ;;  %v9015_v10 = vadd.f32 %v6086_v47, %v4439_v37  ;;  %v9579_v53 = vld [vmem:[#allocation17_spill] sm:$0xff] }
 0x4f2   : > { %v4591_v32 = vpop.f32.mrf.mxu1  ;;  %v5889_v42 = vadd.f32 %v9579_v53, %v8857_v11 }
 0x4f3   : > { %v8990_v25 = vpop.f32.mrf.mxu0  ;;  %v4681_v15 = vadd.f32 %v4680_v18, %v8975_v17  ;;  %v4749_v36 = vadd.f32 %v4748_v43, %v4718_v49  ;;  %v9004_v3 = vadd.f32 %v4591_v32, %v4431_v57  ;;  %v9580_v57 = vld [vmem:[#allocation27_spill] sm:$0xff]  ;;  %v4723_v48 = vmul.f32 %v9015_v10, %v9015_v10 }
 0x4f4   : > { %v6087_v26 = vpop.f32.mrf.mxu1  ;;  %v4447_v43 = vadd.f32 %v5886_v7, %v9580_v57 }
 0x4f5   : > { %v8999_v33 = vpop.f32.mrf.mxu0  ;;  %v4750_v39 = vadd.f32 %v4749_v36, %v4719_v63  ;;  %v4682_v30 = vadd.f32 %v4681_v15, %v8992_v56  ;;  %v4721_v52 = vmul.f32 %v9004_v3, %v9004_v3  ;;  %v9032_v51 = vadd.f32 %v6087_v26, %v4442_v8 }
 0x4f6   : > { %v4594_v12 = vpop.f32.mrf.mxu1  ;;  %v5895_v15 = vadd.f32 %v8877_v29, %v8871_v22  ;;  %v5898_v26 = vadd.f32 %v8888_v61, %v8884_v46  ;;  %v4450_v8 = vadd.f32 %v5889_v42, %v9582_v16  ;;  %v5904_v42 = vadd.f32 %v8929_v23, %v8919_v21  ;;  %v9586_v16 = vld [vmem:[#allocation22_spill] sm:$0xff] }
 0x4f7   : > { %v9009_v24 = vpop.f32.mrf.mxu0  ;;  %v4683_v13 = vadd.f32 %v4682_v30, %v9004_v3  ;;  %v4751_v62 = vadd.f32 %v4750_v39, %v4720_v4  ;;  %v9023_v41 = vadd.f32 %v4594_v12, %v4434_v27  ;;  %v9581_v4 = vld [vmem:[#allocation29_spill] sm:$0xff]  ;;  %v4724_v22 = vmul.f32 %v9032_v51, %v9032_v51 }
 0x4f8   : > { %v6090_v47 = vpop.f32.mrf.mxu1  ;;  %v4455_v39 = vadd.f32 %v5892_v38, %v9581_v4 }
 0x4f9   : > { %v9018_v60 = vpop.f32.mrf.mxu0  ;;  %v4752_v49 = vadd.f32 %v4751_v62, %v4721_v52  ;;  %v4684_v32 = vadd.f32 %v4683_v13, %v9023_v41  ;;  %v4722_v63 = vmul.f32 %v9023_v41, %v9023_v41  ;;  %v9583_v13 = vld [vmem:[#allocation30_spill] sm:$0xff] }
 0x4fa   : > { %v4607_v11 = vpop.f32.mrf.mxu1  ;;  %v9053_v12 = vadd.f32 %v6090_v47, %v4455_v39  ;;  %v4458_v52 = vadd.f32 %v5895_v15, %v9583_v13  ;;  %v5910_v39 = vadd.f32 %v8969_v55, %v8959_v0 }
 0x4fb   : > { %v9030_v18 = vpop.f32.mrf.mxu0  ;;  %v4685_v9 = vadd.f32 %v4684_v32, %v9015_v10  ;;  %v4753_v7 = vadd.f32 %v4752_v49, %v4722_v63  ;;  %v9044_v37 = vadd.f32 %v4607_v11, %v4447_v43  ;;  %v5901_v43 = vadd.f32 %v8907_v34, %v8895_v31  ;;  %v9584_v49 = vld [vmem:[#allocation21_spill] sm:$0xff] }
 0x4fc   : > { %v6091_v30 = vpop.f32.mrf.mxu1  ;;  %v4463_v32 = vadd.f32 %v5898_v26, %v9584_v49  ;;  %v4727_v34 = vmul.f32 %v9053_v12, %v9053_v12  ;;  %v5913_v49 = vadd.f32 %v8990_v25, %v8978_v59 }
 0x4fd   : > { %v9039_v36 = vpop.f32.mrf.mxu0  ;;  %v4754_v29 = vadd.f32 %v4753_v7, %v4723_v48  ;;  %v4686_v27 = vadd.f32 %v4685_v9, %v9032_v51  ;;  %v4725_v46 = vmul.f32 %v9044_v37, %v9044_v37  ;;  %v9068_v11 = vadd.f32 %v6091_v30, %v4458_v52  ;;  %v9585_v30 = vld [vmem:[#allocation31_spill] sm:$0xff]  ;;  %v9587_v52 = vld [vmem:[#allocation32_spill] sm:$0xff] }
 0x4fe   : > { %v4610_v62 = vpop.f32.mrf.mxu1  ;;  %v5907_v7 = vadd.f32 %v8950_v40, %v8938_v44 }
 0x4ff   : > { %v5921_v28 = vpop.f32.mrf.mxu0  ;;  %v4687_v61 = vadd.f32 %v4686_v27, %v9044_v37  ;;  %v4755_v38 = vadd.f32 %v4754_v29, %v4724_v22  ;;  %v9061_v57 = vadd.f32 %v4610_v62, %v4450_v8  ;;  %v4471_v22 = vadd.f32 %v5904_v42, %v9585_v30  ;;  %v9589_v30 = vld [vmem:[#allocation34_spill] sm:$0xff] }
 0x500   : > { %v6094_v47 = vpop.f32.mrf.mxu1  ;;  %v4728_v27 = vmul.f32 %v9068_v11, %v9068_v11  ;;  %v4466_v8 = vadd.f32 %v5901_v43, %v9586_v16  ;;  %v4474_v62 = vadd.f32 %v5907_v7, %v9587_v52  ;;  %v5916_v43 = vadd.f32 %v9009_v24, %v8999_v33 }
 0x501   : > { %v9056_v53 = vpop.f32.mrf.mxu0  ;;  %v4756_v15 = vadd.f32 %v4755_v38, %v4725_v46  ;;  %v4688_v48 = vadd.f32 %v4687_v61, %v9061_v57  ;;  %v4726_v9 = vmul.f32 %v9061_v57, %v9061_v57  ;;  %v9087_v13 = vadd.f32 %v6094_v47, %v4471_v22 }
 0x502   : > { %v4623_v4 = vpop.f32.mrf.mxu1  ;;  %v4487_v22 = vadd.f32 %v5916_v43, %v9589_v30 }
 0x503   : > { %v5924_v63 = vpop.f32.mrf.mxu0  ;;  %v4689_v21 = vadd.f32 %v4688_v48, %v9053_v12  ;;  %v4757_v23 = vadd.f32 %v4756_v15, %v4726_v9  ;;  %v9078_v26 = vadd.f32 %v4623_v4, %v4463_v32  ;;  %v9588_v32 = vld [vmem:[#allocation33_spill] sm:$0xff]  ;;  %v4731_v59 = vmul.f32 %v9087_v13, %v9087_v13 }
 0x504   : > { %v6095_v29 = vpop.f32.mrf.mxu1  ;;  %v4479_v15 = vadd.f32 %v5910_v39, %v9588_v32  ;;  %v5922_v39 = vadd.f32 %v5921_v28, %v9039_v36 }
 0x505   : > { %v5926_v31 = vpop.f32.mrf.mxu0  ;;  %v4758_v44 = vadd.f32 %v4757_v23, %v4727_v34  ;;  %v4690_v40 = vadd.f32 %v4689_v21, %v9068_v11  ;;  %v4729_v0 = vmul.f32 %v9078_v26, %v9078_v26  ;;  %v9100_v9 = vadd.f32 %v6095_v29, %v4474_v62 }
 0x506   : > { %v4626_v61 = vpop.f32.mrf.mxu1  ;;  %v5919_v34 = vadd.f32 %v9030_v18, %v9018_v60  ;;  %v9590_v18 = vld [vmem:[#allocation24_spill] sm:$0xff] }
 0x507   : > { %v5927_v46 = vpop.f32.mrf.mxu0  ;;  %v4691_v38 = vadd.f32 %v4690_v40, %v9078_v26  ;;  %v4759_v55 = vadd.f32 %v4758_v44, %v4728_v27  ;;  %v9093_v42 = vadd.f32 %v4626_v61, %v4466_v8  ;;  %v4732_v27 = vmul.f32 %v9100_v9, %v9100_v9  ;;  %v9591_v8 = vld [vmem:[#allocation23_spill] sm:$0xff] }
 0x508   : > { %v6098_v47 = vpop.f32.mrf.mxu1  ;;  %v4482_v40 = vadd.f32 %v5913_v49, %v9590_v18  ;;  %v4490_v52 = vadd.f32 %v5919_v34, %v9591_v8  ;;  %v5928_v43 = vadd.f32 %v5927_v46, %v5926_v31 }
 0x509   : > { %v4760_v48 = vadd.f32 %v4759_v55, %v4729_v0  ;;  %v4692_v7 = vadd.f32 %v4691_v38, %v9093_v42  ;;  %v4730_v4 = vmul.f32 %v9093_v42, %v9093_v42  ;;  %v5929_v23 = vpop.f32.mrf.mxu0  ;;  %v9118_v16 = vadd.f32 %v6098_v47, %v4487_v22  ;;  %v9593_v22 = vld [vmem:[#allocation35_spill] sm:$0xff] }
 0x50a   : > { %v4639_v21 = vpop.f32.mrf.mxu1  ;;  %v5925_v55 = vadd.f32 %v5924_v63, %v9056_v53  ;;  %v4503_v31 = vadd.f32 %v5928_v43, %v8869_v5 }
 0x50b   : > { %v4693_v25 = vadd.f32 %v4692_v7, %v9087_v13  ;;  %v4761_v33 = vadd.f32 %v4760_v48, %v4730_v4  ;;  %v9110_v24 = vadd.f32 %v4639_v21, %v4479_v15  ;;  %v5930_v61 = vpop.f32.mrf.mxu0  ;;  %v9592_v15 = vld [vmem:[#allocation16_spill] sm:$0xff] }
 0x50c   : > { %v6099_v29 = vpop.f32.mrf.mxu1  ;;  %v4495_v49 = vadd.f32 %v5922_v39, %v9592_v15  ;;  %v5931_v34 = vadd.f32 %v5930_v61, %v5929_v23  ;;  %v4498_v23 = vadd.f32 %v5925_v55, %v9593_v22 }
 0x50d   : > { %v4762_v44 = vadd.f32 %v4761_v33, %v4731_v59  ;;  %v4694_v60 = vadd.f32 %v4693_v25, %v9100_v9  ;;  %v4733_v36 = vmul.f32 %v9110_v24, %v9110_v24  ;;  %v9128_v48 = vadd.f32 %v6099_v29, %v4490_v52 }
 0x50e   : > { %v4642_v62 = vpop.f32.mrf.mxu1  ;;  %v4735_v59 = vmul.f32 %v9118_v16, %v9118_v16 }
 0x50f   : > { %v4695_v38 = vadd.f32 %v4694_v60, %v9110_v24  ;;  %v4763_v28 = vadd.f32 %v4762_v44, %v4732_v27  ;;  %v9124_v0 = vadd.f32 %v4642_v62, %v4482_v40  ;;  %v4736_v33 = vmul.f32 %v9128_v48, %v9128_v48 }
 0x510   : > { %v6102_v32 = vpop.f32.mrf.mxu1  ;;  %v4506_v27 = vadd.f32 %v5931_v34, %v8880_v19 }
 0x511   : > { %v4764_v47 = vadd.f32 %v4763_v28, %v4733_v36  ;;  %v4696_v7 = vadd.f32 %v4695_v38, %v9124_v0  ;;  %v4734_v4 = vmul.f32 %v9124_v0, %v9124_v0  ;;  %v9143_v29 = vadd.f32 %v6102_v32, %v4503_v31 }
 0x512   : > { %v4655_v21 = vpop.f32.mrf.mxu1 }
 0x513   : > { %v4697_v25 = vadd.f32 %v4696_v7, %v9118_v16  ;;  %v4765_v53 = vadd.f32 %v4764_v47, %v4734_v4  ;;  %v9136_v63 = vadd.f32 %v4655_v21, %v4495_v49  ;;  %v4739_v19 = vmul.f32 %v9143_v29, %v9143_v29 }
 0x514   : > { %v6103_v46 = vpop.f32.mrf.mxu1 }
 0x515   : > { %v4766_v39 = vadd.f32 %v4765_v53, %v4735_v59  ;;  %v4698_v30 = vadd.f32 %v4697_v25, %v9128_v48  ;;  %v4737_v18 = vmul.f32 %v9136_v63, %v9136_v63  ;;  %v9151_v52 = vadd.f32 %v6103_v46, %v4506_v27 }
 0x516   : > { %v4658_v44 = vpop.f32.mrf.mxu1 }
 0x517   : > { %v4699_v60 = vadd.f32 %v4698_v30, %v9136_v63  ;;  %v4767_v5 = vadd.f32 %v4766_v39, %v4736_v33  ;;  %v9149_v40 = vadd.f32 %v4658_v44, %v4498_v23  ;;  %v4740_v28 = vmul.f32 %v9151_v52, %v9151_v52 }
 0x519   : > { %v4768_v8 = vadd.f32 %v4767_v5, %v4737_v18  ;;  %v4700_v62 = vadd.f32 %v4699_v60, %v9149_v40  ;;  %v4738_v61 = vmul.f32 %v9149_v40, %v9149_v40 }
 0x51b   : > { %v4701_v38 = vadd.f32 %v4700_v62, %v9143_v29  ;;  %v4769_v36 = vadd.f32 %v4768_v8, %v4738_v61  ;;  %v9595_v8 = vld [vmem:[#allocation19_spill] sm:$0xff] }
 0x51d   : > { %v4702_v55 = vadd.f32 %v4701_v38, %v9151_v52  ;;  %v4770_v43 = vadd.f32 %v4769_v36, %v4739_v19  ;;  %v4670_v19 = vld [vmem:[%s9331_s6] sm:$0x1] }
 0x51f   : > { %v4703_v32 = vrot.slane %v4702_v55, 4  ;;  %v4771_v15 = vadd.f32 %v4770_v43, %v4740_v28  ;;  %v4671_v28 = vld [vmem:[%s9332_s7] sm:$0x1] }
 0x520   : > { %v9596_v43 = vld [vmem:[#allocation20_spill] sm:$0xff] }
 0x521   : > { %v4704_v49 = vadd.f32 %v4703_v32, %v4702_v55  ;;  %v4772_v47 = vrot.slane %v4771_v15, 4 }
 0x523   : > { %v4705_v7 = vrot.slane %v4704_v49, 2  ;;  %v4773_v4 = vadd.f32 %v4772_v47, %v4771_v15 }
 0x525   : > { %v4706_v34 = vadd.f32 %v4705_v7, %v4704_v49  ;;  %v4774_v21 = vrot.slane %v4773_v4, 2 }
 0x527   : > { %v4707_v59 = vrot.slane %v4706_v34, 1  ;;  %v4775_v25 = vadd.f32 %v4774_v21, %v4773_v4 }
 0x529   : > { %v4776_v53 = vrot.slane %v4775_v25, 1  ;;  %v4708_v31 = vadd.f32 %v4707_v59, %v4706_v34 }
 0x52b   : > { %v4777_v46 = vadd.f32 %v4776_v53, %v4775_v25 }
 0x52d   : > { %v4778_v39 = vsel %vm832_vm7, %v4708_v31, %v4777_v46 }
 0x52e   : > { %6137 = vmatmul.mubr.f32.vlgmr.msra.gmra.mxu0 %v4778_v39 }
 0x5ee   : > { %v4861_v30 = vpop.f32.mrf.mxu0 }
 0x5ef   : > { %v4865_v22 = vmul.f32 0.00048828125, %v4861_v30 }
 0x5f0   : > { %v6138_v23 = vpop.f32.mrf.mxu0 }
 0x5f1   : > { %v4866_v27 = vmul.f32 %v4865_v22, %v4865_v22 }
 0x5f3   : > { %v4868_v44 = vrot.slane %v4866_v27, 7 }
 0x5f5   : > { %v4870_v60 = vsub.f32 %v4865_v22, %v4868_v44 }
 0x5f7   : > { %v4871_v18 = vadd.f32 1e-05, %v4870_v60 }
 0x5f9   : > { %6532 = vrsqrt.f32 %v4871_v18 }
 0x606   : > { %v6533_v5 = vpop.eup %6532 }
 0x607   : > { %v4880_v62 = vrot.slane %v6533_v5, %v9595_v8 }
 0x609   : > { %v4881_v61 = vcombine.high %v4880_v62, %v4880_v62 }
 0x60b   : > { %v4888_v38 = vrot.slane %v4881_v61, %v9595_v8 }
 0x60d   : > { %v4890_v36 = vmul.f32 %v4888_v38, %v4670_v19 }
 0x60f   : > { %v4891_v55 = vmul.f32 %v4890_v36, %v4865_v22  ;;  %v4897_v32 = vrot.slane %v4890_v36, %v9596_v43 }
 0x611   : > { %v4892_v15 = vsub.f32 %v4671_v28, %v4891_v55  ;;  %v4899_v49 = vmul.f32 %v4897_v32, %v8892_v45  ;;  %v4900_v47 = vmul.f32 %v4897_v32, %v8900_v20  ;;  %v4901_v7 = vmul.f32 %v4897_v32, %v8897_v58 }
 0x612   : > { %v4902_v4 = vmul.f32 %v4897_v32, %v8911_v35  ;;  %v4903_v34 = vmul.f32 %v4897_v32, %v8924_v14  ;;  %v4904_v21 = vmul.f32 %v4897_v32, %v8943_v54  ;;  %v4905_v59 = vmul.f32 %v4897_v32, %v8935_v1 }
 0x613   : > { %v9181_v25 = vrot.slane %v4892_v15, %v9596_v43  ;;  %v4906_v53 = vmul.f32 %v4897_v32, %v8952_v2  ;;  %v4907_v31 = vmul.f32 %v4897_v32, %v8964_v6  ;;  %v4908_v45 = vmul.f32 %v4897_v32, %v8983_v50 }
 0x614   : > { %v4909_v20 = vmul.f32 %v4897_v32, %v8975_v17  ;;  %v4910_v58 = vmul.f32 %v4897_v32, %v8992_v56  ;;  %v4911_v35 = vmul.f32 %v4897_v32, %v9004_v3  ;;  %v4912_v14 = vmul.f32 %v4897_v32, %v9023_v41 }
 0x615   : > { %v4913_v1 = vmul.f32 %v4897_v32, %v9015_v10  ;;  %v4914_v54 = vmul.f32 %v4897_v32, %v9032_v51  ;;  %v4915_v46 = vmul.f32 %v4897_v32, %v9044_v37  ;;  %v4916_v2 = vmul.f32 %v4897_v32, %v9061_v57 }
 0x616   : > { %v4917_v6 = vmul.f32 %v4897_v32, %v9053_v12  ;;  %v4918_v50 = vmul.f32 %v4897_v32, %v9068_v11  ;;  %v4919_v17 = vmul.f32 %v4897_v32, %v9078_v26  ;;  %v4920_v56 = vmul.f32 %v4897_v32, %v9093_v42 }
 0x617   : > { %v4921_v3 = vmul.f32 %v4897_v32, %v9087_v13  ;;  %v4922_v41 = vmul.f32 %v4897_v32, %v9100_v9  ;;  %v4923_v10 = vmul.f32 %v4897_v32, %v9110_v24  ;;  %v4924_v51 = vmul.f32 %v4897_v32, %v9124_v0 }
 0x618   : > { %v4925_v37 = vmul.f32 %v4897_v32, %v9118_v16  ;;  %v4926_v57 = vmul.f32 %v4897_v32, %v9128_v48  ;;  %v4927_v12 = vmul.f32 %v4897_v32, %v9136_v63  ;;  %v4928_v11 = vmul.f32 %v4897_v32, %v9149_v40 }
 0x619   : > { %v4929_v26 = vmul.f32 %v4897_v32, %v9143_v29  ;;  %v4930_v42 = vmul.f32 %v4897_v32, %v9151_v52  ;;  %v4937_v13 = vadd.f32 %v9181_v25, %v4899_v49  ;;  %v4938_v9 = vadd.f32 %v9181_v25, %v4900_v47 }
 0x61a   : > { %v4939_v24 = vadd.f32 %v9181_v25, %v4901_v7  ;;  %v4940_v0 = vadd.f32 %v9181_v25, %v4902_v4  ;;  %v4941_v16 = vadd.f32 %v9181_v25, %v4903_v34  ;;  %v4942_v48 = vadd.f32 %v9181_v25, %v4904_v21 }
 0x61b   : > { %v4943_v63 = vadd.f32 %v9181_v25, %v4905_v59  ;;  %v4944_v40 = vadd.f32 %v9181_v25, %v4906_v53  ;;  %v4945_v29 = vadd.f32 %v9181_v25, %v4907_v31  ;;  %v4946_v52 = vadd.f32 %v9181_v25, %v4908_v45  ;;  %4969 = vst [vmem:[%s9219_s21] sm:$0xff] %v4937_v13 }
 0x61c   : > { %4970 = vst [vmem:[%s9219_s21 + $0x8] sm:$0xff] %v4938_v9  ;;  %v4947_v33 = vadd.f32 %v9181_v25, %v4909_v20  ;;  %v4948_v39 = vadd.f32 %v9181_v25, %v4910_v58  ;;  %v4949_v30 = vadd.f32 %v9181_v25, %v4911_v35  ;;  %v4950_v22 = vadd.f32 %v9181_v25, %v4912_v14 }
 0x61d   : > { %4971 = vst [vmem:[%s9219_s21 + $0x10] sm:$0xff] %v4939_v24  ;;  %4972 = vst [vmem:[%s9219_s21 + $0x18] sm:$0xff] %v4940_v0  ;;  %v4951_v23 = vadd.f32 %v9181_v25, %v4913_v1  ;;  %v4952_v27 = vadd.f32 %v9181_v25, %v4914_v54  ;;  %v4953_v44 = vadd.f32 %v9181_v25, %v4915_v46 }
 0x61e   : > { %4973 = vst [vmem:[%s9219_s21 + $0x20] sm:$0xff] %v4941_v16  ;;  %4974 = vst [vmem:[%s9219_s21 + $0x28] sm:$0xff] %v4942_v48  ;;  %v4954_v60 = vadd.f32 %v9181_v25, %v4916_v2  ;;  %v4955_v18 = vadd.f32 %v9181_v25, %v4917_v6  ;;  %v4956_v5 = vadd.f32 %v9181_v25, %v4918_v50 }
 0x61f   : > { %4975 = vst [vmem:[%s9219_s21 + $0x30] sm:$0xff] %v4943_v63  ;;  %4976 = vst [vmem:[%s9219_s21 + $0x38] sm:$0xff] %v4944_v40  ;;  %v4957_v8 = vadd.f32 %v9181_v25, %v4919_v17  ;;  %v4958_v62 = vadd.f32 %v9181_v25, %v4920_v56  ;;  %v4959_v61 = vadd.f32 %v9181_v25, %v4921_v3 }
 0x620   : > { %4977 = vst [vmem:[%s9219_s21 + $0x40] sm:$0xff] %v4945_v29  ;;  %4978 = vst [vmem:[%s9219_s21 + $0x48] sm:$0xff] %v4946_v52  ;;  %v4960_v19 = vadd.f32 %v9181_v25, %v4922_v41  ;;  %v4961_v38 = vadd.f32 %v9181_v25, %v4923_v10  ;;  %v4962_v36 = vadd.f32 %v9181_v25, %v4924_v51 }
 0x621   : > { %4979 = vst [vmem:[%s9219_s21 + $0x50] sm:$0xff] %v4947_v33  ;;  %4980 = vst [vmem:[%s9219_s21 + $0x58] sm:$0xff] %v4948_v39  ;;  %v4963_v28 = vadd.f32 %v9181_v25, %v4925_v37  ;;  %v4964_v55 = vadd.f32 %v9181_v25, %v4926_v57  ;;  %v4965_v43 = vadd.f32 %v9181_v25, %v4927_v12 }
 0x622   : > { %4981 = vst [vmem:[%s9219_s21 + $0x60] sm:$0xff] %v4949_v30  ;;  %4982 = vst [vmem:[%s9219_s21 + $0x68] sm:$0xff] %v4950_v22  ;;  %v4966_v32 = vadd.f32 %v9181_v25, %v4928_v11  ;;  %v4967_v15 = vadd.f32 %v9181_v25, %v4929_v26  ;;  %v4968_v49 = vadd.f32 %v9181_v25, %v4930_v42 }
 0x623   : > { %4983 = vst [vmem:[%s9219_s21 + $0x70] sm:$0xff] %v4951_v23  ;;  %4984 = vst [vmem:[%s9219_s21 + $0x78] sm:$0xff] %v4952_v27 }
 0x624   : > { %4985 = vst [vmem:[%s9219_s21 + $0x80] sm:$0xff] %v4953_v44  ;;  %4986 = vst [vmem:[%s9219_s21 + $0x88] sm:$0xff] %v4954_v60 }
 0x625   : > { %4987 = vst [vmem:[%s9219_s21 + $0x90] sm:$0xff] %v4955_v18  ;;  %4988 = vst [vmem:[%s9219_s21 + $0x98] sm:$0xff] %v4956_v5 }
 0x626   : > { %4989 = vst [vmem:[%s9219_s21 + $0xa0] sm:$0xff] %v4957_v8  ;;  %4990 = vst [vmem:[%s9219_s21 + $0xa8] sm:$0xff] %v4958_v62 }
 0x627   : > { %4991 = vst [vmem:[%s9219_s21 + $0xb0] sm:$0xff] %v4959_v61  ;;  %4992 = vst [vmem:[%s9219_s21 + $0xb8] sm:$0xff] %v4960_v19 }
 0x628   : > { %4993 = vst [vmem:[%s9219_s21 + $0xc0] sm:$0xff] %v4961_v38  ;;  %4994 = vst [vmem:[%s9219_s21 + $0xc8] sm:$0xff] %v4962_v36 }
 0x629   : > { %4995 = vst [vmem:[%s9219_s21 + $0xd0] sm:$0xff] %v4963_v28  ;;  %4996 = vst [vmem:[%s9219_s21 + $0xd8] sm:$0xff] %v4964_v55 }
 0x62a   : > { %4997 = vst [vmem:[%s9219_s21 + $0xe0] sm:$0xff] %v4965_v43  ;;  %4998 = vst [vmem:[%s9219_s21 + $0xe8] sm:$0xff] %v4966_v32 }
 0x62b   : > { %4999 = vst [vmem:[%s9219_s21 + $0xf0] sm:$0xff] %v4967_v15  ;;  %5000 = vst [vmem:[%s9219_s21 + $0xf8] sm:$0xff] %v4968_v49 }
 0x62c   : > { %6653 = shalt.err (!%p6650_p9)
}
 0x62d   : > { %s6654_s16 = scalar_lea.hbm %s9268_s18, 4096  ;;  %s6658_s14 = scalar_lea.hbm %s9333_s8, 8192 }
 0x62e   : > { %p6655_p1 = scmp.ne.s32.totalorder %s9268_s18, %s6654_s16  ;;  %p6659_p8 = scmp.lt.s32.totalorder %s9268_s18, %s9333_s8 }
 0x62f   : > { %p6660_p3 = scmp.lt.s32.totalorder %s6658_s14, %s6654_s16 }
 0x630   : > { %p6656_p4 = pnand %p6655_p1, %p9597_p12 }
 0x631   : > { %p6661_p11 = por %p6660_p3, %p6659_p8 }
 0x632   : > { %p6657_p6 = pneg %p6656_p4 }
 0x634   : > { %p6662_p7 = pnand %p6661_p11, %p6657_p6 }
 0x636   : > { %6665 = shalt.err (!%p6662_p7)
}
 0x637   : > { %s6727_s9 = smov 128   ;;  %s6728_s15 = smov 8  }
 0x638   : > { %6153 = dma.vmem_to_hbm [thread:$0]  (%p9597_p12), %s9270_s2, 4096, %s9268_s18, %s5002_s11, %s6727_s9, %s6727_s9, %s6728_s15  }
 0x639 PF: > { %s5030_s13 = sand.u32 1, %s6700_s27   ;;  %p9598_p13 = scmp.ne.s32.totalorder %s9423_s12, 0 }
 0x63a   : > { %p9599_p0 = scmp.ge.s32.totalorder %s6712_s30, 2  ;;  %s5031_s20 = scalar_lea.sflag [#allocation5], %s5030_s13 }
 0x63c   : > { %p6170_p5 = pnand %p9599_p0, %p9598_p13 }
 0x63e   : > { %p6171_p10 = pneg %p6170_p5 }
 0x640   : > { %6695 = dma.done.wait (%p6171_p10), %s5031_s20, 4096  }
 0x641   : > { %6697 = vsyncadd (%p6171_p10), %s5031_s20, 4294963200  ;;  %p23_p2 = scmp.ge.s32.totalorder %s6849_s19, 4   ;;  %s9600_s27 = smov %s6704_s28 }
 0x642   : > { %s9601_s28 = smov %s6708_s29  ;;  %s9602_s29 = smov %s6870_s25 }
 0x643   : > { %s9603_s30 = smov %s6849_s19  ;;  %25 = sbr.rel (!%p23_p2) target bundleno = 10 (0xa), region = 111 }
 0x648   :  { %5036 = vsyncpa [#allocation4], 1 }
 0x649   :  { %5038 = vsyncpa [#allocation4 + $0x1], 1 }
 0x64a   :  { %5039 = vsyncpa [#allocation7], 1 }
 0x64b   :  { %5040 = vsyncpa [#allocation10], 1 }
 0x64c   :  { %5041 = vsyncpa [#allocation5], 1 }
 0x64d   :  { %5043 = vsyncpa [#allocation5 + $0x1], 1 }

</bundles_post_ra>
